<compile_context>
chip_gen: v6e
topology: v6e:2x2x1
jax: 0.10.0
libtpu: 0.0.40
codegen_flags: <defaults>
</compile_context>

<pallas_src>
import functools

import jax
import jax.numpy as jnp
from jax import lax
from jax.experimental import pallas as pl
from jax.experimental.pallas import tpu as pltpu

_L2_EPS = 1e-12   # F.normalize eps
_BN_EPS = 1e-5    # nn.BatchNorm1d default eps
_LANES = 128


# ---------------------------------------------------------------------------
# In-kernel helpers
# ---------------------------------------------------------------------------

def _mask_tail(x, k, tile_n, n_total):
    """Zero the out-of-range tail columns of the (partial) last N-tile."""
    ids = lax.broadcasted_iota(jnp.int32, x.shape, 2)
    return jnp.where(ids + k * tile_n < n_total, x, 0.0)


def _accum_step(x, acc_ref, *, normalize_input):
    """Per-tile work: optional per-(b,n) channel L2-normalize, then accumulate
    lane-partial sums into acc_ref (same-lane VPU adds only; the cross-lane
    reduce is deferred to the finalize)."""
    if normalize_input:
        # F.normalize(x, p=2, dim=1): per (b, n) vector over channels C
        ss = jnp.sum(x * x, axis=1, keepdims=True)               # (Bc, 1, tn)
        x = x * lax.rsqrt(jnp.maximum(ss, _L2_EPS * _L2_EPS))    # == x / max(||x||, eps)
    tn = x.shape[-1]
    L = acc_ref.shape[-1]                                        # 128 (or tn if tn < 128)
    part = x[:, :, 0:L]
    for j in range(1, tn // L):                                  # lane-aligned slices
        part = part + x[:, :, j * L:(j + 1) * L]
    acc_ref[...] += part


def _bn_l2(s, gamma, beta):
    """BatchNorm1d (training-mode batch stats) + final L2 normalize on (B, C)."""
    mean = jnp.mean(s, axis=0, keepdims=True)
    d = s - mean
    var = jnp.mean(d * d, axis=0, keepdims=True)                 # biased variance
    s = d * lax.rsqrt(var + _BN_EPS)
    s = s * gamma + beta
    inv = lax.rsqrt(jnp.maximum(jnp.sum(s * s, axis=-1, keepdims=True),
                                _L2_EPS * _L2_EPS))
    return s * inv


def _accumulate(x_ref, acc_ref, k, last, *, normalize_input, n_total, tile_n,
                mask_needed):
    x = x_ref[...].astype(jnp.float32)                           # (Bc, C, tn)
    if mask_needed:
        # Masking only runs on the (partial) last tile; full tiles skip the
        # iota/compare/select work entirely.
        @pl.when(k == last)
        def _tail():
            _accum_step(_mask_tail(x, k, tile_n, n_total), acc_ref,
                        normalize_input=normalize_input)

        @pl.when(k != last)
        def _full():
            _accum_step(x, acc_ref, normalize_input=normalize_input)
    else:
        _accum_step(x, acc_ref, normalize_input=normalize_input)


# ---------------------------------------------------------------------------
# Kernels
# ---------------------------------------------------------------------------

def _pool_bn_l2_kernel(x_ref, gamma_ref, beta_ref, o_ref, acc_ref, *,
                       normalize_input, n_total, tile_n, mask_needed):
    """Single-batch-chunk kernel: grid=(grid_n,), BN + final L2 fused in finalize."""
    k = pl.program_id(0)
    last = pl.num_programs(0) - 1

    @pl.when(k == 0)
    def _init():
        acc_ref[...] = jnp.zeros_like(acc_ref)

    _accumulate(x_ref, acc_ref, k, last, normalize_input=normalize_input,
                n_total=n_total, tile_n=tile_n, mask_needed=mask_needed)

    @pl.when(k == last)
    def _finalize():
        pooled = jnp.sum(acc_ref[...], axis=-1)                  # single lane reduce
        o_ref[...] = _bn_l2(pooled, gamma_ref[...], beta_ref[...]).astype(o_ref.dtype)


def _pool_partial_kernel(x_ref, o_ref, acc_ref, *,
                         normalize_input, n_total, tile_n, mask_needed):
    """Batch-chunked kernel: grid=(batch_chunks, grid_n); batch-chunk axis is
    'parallel' (uses both TensorCores on v7x).  Writes per-chunk pooled sums;
    the batch-coupled BN + L2 run in a separate tiny epilogue kernel."""
    k = pl.program_id(1)
    last = pl.num_programs(1) - 1

    @pl.when(k == 0)
    def _init():
        acc_ref[...] = jnp.zeros_like(acc_ref)

    _accumulate(x_ref, acc_ref, k, last, normalize_input=normalize_input,
                n_total=n_total, tile_n=tile_n, mask_needed=mask_needed)

    @pl.when(k == last)
    def _finalize():
        o_ref[...] = jnp.sum(acc_ref[...], axis=-1)


def _bn_l2_kernel(s_ref, gamma_ref, beta_ref, o_ref):
    o_ref[...] = _bn_l2(s_ref[...], gamma_ref[...], beta_ref[...]).astype(o_ref.dtype)


# ---------------------------------------------------------------------------
# Wrapper
# ---------------------------------------------------------------------------

def _select_tile_n(n_total, bytes_per_col, target_block_bytes):
    """Pick a lane-aligned N-tile from a VMEM byte budget (never > N)."""
    if n_total <= _LANES:
        return n_total                                   # one full-extent block
    n_floor = (n_total // _LANES) * _LANES               # largest 128-multiple <= N
    budget_cols = max(_LANES,
                      (target_block_bytes // bytes_per_col) // _LANES * _LANES)
    if budget_cols >= n_floor:
        return n_floor                                   # 1-2 steps cover all of N
    # must tile: aim for >= ~4 grid steps so prefetch overlaps compute/writeback
    quarter = max(_LANES, (n_total // 4) // _LANES * _LANES)
    return min(budget_cols, quarter)


def sum_pooling(x_bcn, gamma, beta, *, normalize_input=True,
                target_block_bytes=8 << 20, batch_chunks=None):
    """x_bcn: (B, C, N) array in the native PyTorch layout. Returns (B, C)."""
    B, C, N = x_bcn.shape

    # Batch-chunk "parallel" axis: only when the per-chunk batch stays a
    # multiple of 8 (output sublane constraint).  Engages both TCs on v7x;
    # harmless (sequential) on single-TC v5e/v6e.
    if batch_chunks is None:
        batch_chunks = 2 if (B % 16 == 0 and B >= 16) else 1
    assert B % batch_chunks == 0
    Bc = B // batch_chunks
    if batch_chunks > 1:
        assert Bc % 8 == 0, "per-chunk batch must be a multiple of 8"

    itemsize = jnp.dtype(x_bcn.dtype).itemsize
    tn = _select_tile_n(N, Bc * C * itemsize, target_block_bytes)
    grid_n = pl.cdiv(N, tn)
    mask_needed = (N % tn) != 0

    # Lane-partial accumulator width: 128 when tn is a 128-multiple, else tn
    # (only possible when N < 128 and the single block spans the full dim).
    acc_lanes = _LANES if tn % _LANES == 0 else tn

    # Explicit scoped-VMEM budget: double-buffered x blocks + accumulator +
    # headroom.  Stays well under v7x's 64 MiB physical VMEM with the default
    # 8 MiB block target; raises v5e's 16 MiB scoped default when needed.
    x_block_bytes = Bc * C * tn * itemsize
    acc_bytes = Bc * C * acc_lanes * 4
    vmem_limit_bytes = int(max(2 * x_block_bytes + acc_bytes + (8 << 20), 32 << 20))

    gamma2 = gamma.reshape(1, C).astype(jnp.float32)
    beta2 = beta.reshape(1, C).astype(jnp.float32)

    if batch_chunks == 1:
        kernel = functools.partial(
            _pool_bn_l2_kernel, normalize_input=normalize_input,
            n_total=N, tile_n=tn, mask_needed=mask_needed)
        return pl.pallas_call(
            kernel,
            out_shape=jax.ShapeDtypeStruct((B, C), x_bcn.dtype),
            grid_spec=pltpu.PrefetchScalarGridSpec(
                num_scalar_prefetch=0,
                grid=(grid_n,),
                in_specs=[
                    pl.BlockSpec((B, C, tn), lambda k: (0, 0, k)),   # x tile along N
                    pl.BlockSpec((1, C), lambda k: (0, 0)),          # gamma
                    pl.BlockSpec((1, C), lambda k: (0, 0)),          # beta
                ],
                out_specs=pl.BlockSpec((B, C), lambda k: (0, 0)),    # resident output
                scratch_shapes=[pltpu.VMEM((B, C, acc_lanes), jnp.float32)],
            ),
            compiler_params=pltpu.CompilerParams(
                dimension_semantics=("arbitrary",),                  # N is a reduction
                vmem_limit_bytes=vmem_limit_bytes,
            ),
        )(x_bcn, gamma2, beta2)

    # --- batch-chunked path: parallel pooling kernel + tiny BN/L2 epilogue ---
    kernel = functools.partial(
        _pool_partial_kernel, normalize_input=normalize_input,
        n_total=N, tile_n=tn, mask_needed=mask_needed)
    pooled = pl.pallas_call(
        kernel,
        out_shape=jax.ShapeDtypeStruct((B, C), jnp.float32),
        grid_spec=pltpu.PrefetchScalarGridSpec(
            num_scalar_prefetch=0,
            grid=(batch_chunks, grid_n),
            in_specs=[pl.BlockSpec((Bc, C, tn), lambda bi, k: (bi, 0, k))],
            out_specs=pl.BlockSpec((Bc, C), lambda bi, k: (bi, 0)),
            scratch_shapes=[pltpu.VMEM((Bc, C, acc_lanes), jnp.float32)],
        ),
        compiler_params=pltpu.CompilerParams(
            dimension_semantics=("parallel", "arbitrary"),
            vmem_limit_bytes=vmem_limit_bytes,
        ),
    )(x_bcn)

    return pl.pallas_call(
        _bn_l2_kernel,
        out_shape=jax.ShapeDtypeStruct((B, C), x_bcn.dtype),
        grid_spec=pltpu.PrefetchScalarGridSpec(
            num_scalar_prefetch=0,
            grid=(1,),
            in_specs=[
                pl.BlockSpec((B, C), lambda i: (0, 0)),
                pl.BlockSpec((1, C), lambda i: (0, 0)),
                pl.BlockSpec((1, C), lambda i: (0, 0)),
            ],
            out_specs=pl.BlockSpec((B, C), lambda i: (0, 0)),
        ),
    )(pooled, gamma2, beta2)


# ---------------------------------------------------------------------------
# Pure-JAX reference + tests
# ---------------------------------------------------------------------------

def _reference(x_bcn, gamma, beta, *, normalize_input=True):
    x = x_bcn.astype(jnp.float32)
    if normalize_input:
        nrm = jnp.sqrt(jnp.sum(x * x, axis=1, keepdims=True))
        x = x / jnp.maximum(nrm, _L2_EPS)
    s = jnp.sum(x, axis=2)                                   # (B, C)
    mean = jnp.mean(s, axis=0, keepdims=True)
    var = jnp.mean((s - mean) ** 2, axis=0, keepdims=True)
    s = (s - mean) / jnp.sqrt(var + _BN_EPS)
    s = s * gamma[None, :] + beta[None, :]
    nrm2 = jnp.sqrt(jnp.sum(s * s, axis=1, keepdims=True))
    return s / jnp.maximum(nrm2, _L2_EPS)


def _check(x, gamma, beta, *, normalize_input, **kw):
    out = jax.block_until_ready(
        sum_pooling(x, gamma, beta, normalize_input=normalize_input, **kw))
    ref = _reference(x, gamma, beta, normalize_input=normalize_input)
    assert out.shape == ref.shape
    assert jnp.allclose(out, ref, atol=1e-5, rtol=1e-5), "mismatch vs reference"


if __name__ == "__main__":
    C = 128   # dim=128 per module default
    key = jax.random.PRNGKey(0)
    kx1, kx2, kx3, kg, kb = jax.random.split(key, 5)

    gamma = 1.0 + 0.1 * jax.random.normal(kg, (C,), dtype=jnp.float32)
    beta = 0.1 * jax.random.normal(kb, (C,), dtype=jnp.float32)

    # Case A: B=16 -> batch-chunked "parallel" path (2 chunks) + BN/L2 epilogue;
    # small block budget forces tn=128 -> grid (2, 3) with a masked tail.
    xa = jax.random.normal(kx1, (16, C, 320), dtype=jnp.float32)
    _check(xa, gamma, beta, normalize_input=True, target_block_bytes=1 << 19)

    # Case B: B=8 -> fused single-chunk path, default byte budget -> tn=256,
    # 2 steps, masked tail, lane-partial accumulation (2 slices/step).
    xb = jax.random.normal(kx2, (8, C, 320), dtype=jnp.float32)
    _check(xb, gamma, beta, normalize_input=True)

    # Case C: normalize_input=False branch, tn=128, 3 steps, masked tail.
    _check(xb, gamma, beta, normalize_input=False, target_block_bytes=1 << 19)

    # Case D: unmasked multi-step path (N divisible by tn).
    xd = jax.random.normal(kx3, (8, C, 512), dtype=jnp.float32)
    _check(xd, gamma, beta, normalize_input=True, target_block_bytes=1 << 19)

    # Case E: N < 128 -> single full-extent (non-lane-padded) block path.
    _check(xd[:, :, :64], gamma, beta, normalize_input=True)

    print("KERNEL_OK")
</pallas_src>

<mosaic_0001>
module attributes {stable_mosaic.version = 11 : i64} {
  func.func @_pool_partial_kernel(%arg0: i32, %arg1: i32, %arg2: memref<8x128x128xf32, #tpu.memory_space<vmem>>, %arg3: memref<8x128xf32, #tpu.memory_space<vmem>>, %arg4: memref<8x128x128xf32, #tpu.memory_space<vmem>>) attributes {dimension_semantics = [#tpu.dimension_semantics<parallel>, #tpu.dimension_semantics<arbitrary>], iteration_bounds = array<i64: 2, 3>, scalar_prefetch = 0 : i64, scratch_operands = 1 : i64, tpu.core_type = #tpu.core_type<tc>, window_params = [{transform_indices = @transform_0, window_bounds = array<i64: 8, 128, 128>}, {transform_indices = @transform_1, window_bounds = array<i64: 8, 128>}]} {
    %c0_i32 = arith.constant 0 : i32
    %0 = arith.cmpi eq, %arg1, %c0_i32 : i32
    %1 = arith.extui %0 : i1 to i32
    %c0_i32_0 = arith.constant 0 : i32
    %2 = arith.cmpi ne, %1, %c0_i32_0 : i32
    scf.if %2 {
      %cst = arith.constant 0.000000e+00 : f32
      %13 = vector.broadcast %cst : f32 to vector<8x128x128xf32>
      %c0_8 = arith.constant 0 : index
      %c0_9 = arith.constant 0 : index
      %c0_10 = arith.constant 0 : index
      %14 = vector.load %arg4[%c0_8, %c0_9, %c0_10] : memref<8x128x128xf32, #tpu.memory_space<vmem>>, vector<8x128x128xf32>
      tpu.vector_store %arg4[%c0_8, %c0_9, %c0_10], %13 {strides = array<i32>} : memref<8x128x128xf32, #tpu.memory_space<vmem>>, vector<8x128x128xf32>,
    } else {
    }
    %c0 = arith.constant 0 : index
    %c0_1 = arith.constant 0 : index
    %c0_2 = arith.constant 0 : index
    %3 = vector.load %arg2[%c0, %c0_1, %c0_2] : memref<8x128x128xf32, #tpu.memory_space<vmem>>, vector<8x128x128xf32>
    %c2_i32 = arith.constant 2 : i32
    %4 = arith.cmpi eq, %arg1, %c2_i32 : i32
    %5 = arith.extui %4 : i1 to i32
    %c0_i32_3 = arith.constant 0 : i32
    %6 = arith.cmpi ne, %5, %c0_i32_3 : i32
    scf.if %6 {
      %13 = tpu.iota {dimensions = array<i32: 2>} : vector<8x128x128xi32>
      %c128_i32 = arith.constant 128 : i32
      %14 = arith.muli %arg1, %c128_i32 : i32
      %15 = vector.broadcast %14 : i32 to vector<8x128x128xi32>
      %16 = arith.addi %13, %15 : vector<8x128x128xi32>
      %c320_i32 = arith.constant 320 : i32
      %17 = vector.broadcast %c320_i32 : i32 to vector<8x128x128xi32>
      %18 = arith.cmpi slt, %16, %17 : vector<8x128x128xi32>
      %cst = arith.constant 0.000000e+00 : f32
      %19 = vector.broadcast %cst : f32 to vector<8x128x128xf32>
      %20 = arith.select %18, %3, %19 : vector<8x128x128xi1>, vector<8x128x128xf32>
      %21 = arith.mulf %20, %20 : vector<8x128x128xf32>
      %cst_8 = arith.constant dense<0.000000e+00> : vector<8x128xf32>
      %22 = vector.multi_reduction <add>, %21, %cst_8 [1] : vector<8x128x128xf32> to vector<8x128xf32>
      %23 = vector.shape_cast %22 : vector<8x128xf32> to vector<8x1x128xf32>
      %cst_9 = arith.constant 1.000000e-24 : f32
      %24 = vector.broadcast %cst_9 : f32 to vector<8x1x128xf32>
      %25 = arith.maximumf %23, %24 : vector<8x1x128xf32>
      %26 = math.rsqrt %25 : vector<8x1x128xf32>
      %27 = vector.broadcast %26 : vector<8x1x128xf32> to vector<8x128x128xf32>
      %28 = arith.mulf %20, %27 : vector<8x128x128xf32>
      %c0_10 = arith.constant 0 : index
      %c0_11 = arith.constant 0 : index
      %c0_12 = arith.constant 0 : index
      %29 = vector.load %arg4[%c0_10, %c0_11, %c0_12] : memref<8x128x128xf32, #tpu.memory_space<vmem>>, vector<8x128x128xf32>
      %30 = arith.addf %29, %28 : vector<8x128x128xf32>
      %c0_13 = arith.constant 0 : index
      %c0_14 = arith.constant 0 : index
      %c0_15 = arith.constant 0 : index
      %31 = vector.load %arg4[%c0_13, %c0_14, %c0_15] : memref<8x128x128xf32, #tpu.memory_space<vmem>>, vector<8x128x128xf32>
      tpu.vector_store %arg4[%c0_13, %c0_14, %c0_15], %30 {strides = array<i32>} : memref<8x128x128xf32, #tpu.memory_space<vmem>>, vector<8x128x128xf32>,
    } else {
    }
    %c2_i32_4 = arith.constant 2 : i32
    %7 = arith.cmpi ne, %arg1, %c2_i32_4 : i32
    %8 = arith.extui %7 : i1 to i32
    %c0_i32_5 = arith.constant 0 : i32
    %9 = arith.cmpi ne, %8, %c0_i32_5 : i32
    scf.if %9 {
      %13 = arith.mulf %3, %3 : vector<8x128x128xf32>
      %cst = arith.constant dense<0.000000e+00> : vector<8x128xf32>
      %14 = vector.multi_reduction <add>, %13, %cst [1] : vector<8x128x128xf32> to vector<8x128xf32>
      %15 = vector.shape_cast %14 : vector<8x128xf32> to vector<8x1x128xf32>
      %cst_8 = arith.constant 1.000000e-24 : f32
      %16 = vector.broadcast %cst_8 : f32 to vector<8x1x128xf32>
      %17 = arith.maximumf %15, %16 : vector<8x1x128xf32>
      %18 = math.rsqrt %17 : vector<8x1x128xf32>
      %19 = vector.broadcast %18 : vector<8x1x128xf32> to vector<8x128x128xf32>
      %20 = arith.mulf %3, %19 : vector<8x128x128xf32>
      %c0_9 = arith.constant 0 : index
      %c0_10 = arith.constant 0 : index
      %c0_11 = arith.constant 0 : index
      %21 = vector.load %arg4[%c0_9, %c0_10, %c0_11] : memref<8x128x128xf32, #tpu.memory_space<vmem>>, vector<8x128x128xf32>
      %22 = arith.addf %21, %20 : vector<8x128x128xf32>
      %c0_12 = arith.constant 0 : index
      %c0_13 = arith.constant 0 : index
      %c0_14 = arith.constant 0 : index
      %23 = vector.load %arg4[%c0_12, %c0_13, %c0_14] : memref<8x128x128xf32, #tpu.memory_space<vmem>>, vector<8x128x128xf32>
      tpu.vector_store %arg4[%c0_12, %c0_13, %c0_14], %22 {strides = array<i32>} : memref<8x128x128xf32, #tpu.memory_space<vmem>>, vector<8x128x128xf32>,
    } else {
    }
    %c2_i32_6 = arith.constant 2 : i32
    %10 = arith.cmpi eq, %arg1, %c2_i32_6 : i32
    %11 = arith.extui %10 : i1 to i32
    %c0_i32_7 = arith.constant 0 : i32
    %12 = arith.cmpi ne, %11, %c0_i32_7 : i32
    scf.if %12 {
      %c0_8 = arith.constant 0 : index
      %c0_9 = arith.constant 0 : index
      %c0_10 = arith.constant 0 : index
      %13 = vector.load %arg4[%c0_8, %c0_9, %c0_10] : memref<8x128x128xf32, #tpu.memory_space<vmem>>, vector<8x128x128xf32>
      %cst = arith.constant dense<0.000000e+00> : vector<8x128xf32>
      %14 = vector.multi_reduction <add>, %13, %cst [2] : vector<8x128x128xf32> to vector<8x128xf32>
      %c0_11 = arith.constant 0 : index
      %c0_12 = arith.constant 0 : index
      %15 = vector.load %arg3[%c0_11, %c0_12] : memref<8x128xf32, #tpu.memory_space<vmem>>, vector<8x128xf32>
      tpu.vector_store %arg3[%c0_11, %c0_12], %14 {strides = array<i32>} : memref<8x128xf32, #tpu.memory_space<vmem>>, vector<8x128xf32>,
    } else {
    }
    return
  }
  func.func @transform_0(%arg0: i32, %arg1: i32) -> (i32, i32, i32) {
    %c0_i32 = arith.constant 0 : i32
    %c0_i32_0 = arith.constant 0 : i32
    return %arg0, %c0_i32, %arg1 : i32, i32, i32
  }
  func.func @transform_1(%arg0: i32, %arg1: i32) -> (i32, i32) {
    %c0_i32 = arith.constant 0 : i32
    %c0_i32_0 = arith.constant 0 : i32
    return %arg0, %c0_i32 : i32, i32
  }
}

</mosaic_0001>

<bundles_post_ra>
// kernel: tpu_custom_call.1
= control target key start
LH: loop header
LB: loop body
LE: loop exit
PB: predicated region body
PF: predicated region fallthrough
CT: control target
= control target key end

     0   :  { %6 = vsyncpa [#allocation5], 0  ;;  %s7243_s0 = inlined_call_operand.vmem [shape: f32[16,128,320], index: 0, kind: input, shape index: {}]   ;;  %s7244_s1 = inlined_call_operand.hbm [shape: f32[16,128], index: 1, kind: output, shape index: {}]  }
   0x1   :  { %8 = vsyncpa [#allocation5 + $0x1], 0  ;;  %s4276_s6 = smov 0   ;;  %s4278_s7 = smov 0  }
   0x2   :  { %s4280_s8 = smov 0   ;;  %s4282_s9 = smov 0  }
   0x3   :  { %s4284_s10 = smov 0   ;;  %s4286_s11 = smov 0  }
   0x4   :  { %s4288_s12 = smov 0   ;;  %s4290_s13 = smov 0  }
   0x5   :  { %s4292_s14 = smov 0   ;;  %s4294_s15 = smov 0  }
   0x6 LB: > { %s4013_s16 = sadd.s32 4294967295, %s4262_s15   ;;  %s4014_s17 = sadd.s32 4294967294, %s4262_s15   ;;  %s4262_s15 = sphi %s4294_s15, %s14_s15   ;;  %s4258_s14 = sphi %s4292_s14, %s8093_s14   ;;  %s4254_s13 = sphi %s4290_s13, %s8092_s13   ;;  %s4250_s12 = sphi %s4288_s12, %s8091_s12   ;;  %s4246_s11 = sphi %s4286_s11, %s8090_s11   ;;  %s4242_s10 = sphi %s4284_s10, %s8089_s10   ;;  %s4238_s9 = sphi %s4282_s9, %s8088_s9   ;;  %s4234_s8 = sphi %s4280_s8, %s8087_s8   ;;  %s4230_s7 = sphi %s4278_s7, %s8086_s7   ;;  %s4226_s6 = sphi %s4276_s6, %s8085_s6  }
   0x7   : > { %s23_s18 = sadd.s32 1, %s4254_s13  ;;  %s26_s19 = sadd.s32 1, %s4258_s14 }
   0x8   : > { %p24_p0 = scmp.ge.s32.totalorder %s23_s18, 3  ;;  %s35_s20 = sadd.s32 1, %s4242_s10 }
   0x9   : > { %p42_p1 = scmp.ne.s32.totalorder %s4242_s10, %s4238_s9  ;;  %p43_p2 = scmp.eq.s32.totalorder %s4262_s15, 0 }
   0xa   : > { %s8095_s18 = smov (%p24_p0, %s23_s18), 0  ;;  %s8097_s19 = smov (!%p24_p0, %s26_s19), %s4258_s14 }
   0xb   : > { %s31_s21 = ssub.s32 %s4254_s13, %s8095_s18  ;;  %p4339_p3 = por %p43_p2, %p42_p1 }
   0xc   : > { %p28_p4 = scmp.ge.s32.totalorder %s8097_s19, 2  ;;  %s61_s23 = sadd.s32 1, %s4234_s8 }
   0xd   : > { %p71_p5 = scmp.ne.s32.totalorder %s4234_s8, %s4230_s7  ;;  %p72_p6 = scmp.eq.s32.totalorder %s4013_s16, 5 }
   0xe   : > { %s8099_s19 = smov (%p28_p4, %s8097_s19), 0  ;;  %p77_p8 = scmp.ne.s32.totalorder %s4230_s7, %s4226_s6 }
   0xf   : > { %p4348_p7 = por %p72_p6, %p71_p5  ;;  %s30_s25 = ssub.s32 %s4258_s14, %s8099_s19 }
  0x10   : > { %p78_p9 = scmp.eq.s32.totalorder %s4014_s17, 5  ;;  %s32_s26 = sor.u32 %s31_s21, %s30_s25 }
  0x11   : > { %p59_p10 = scmp.eq.s32.totalorder %s30_s25, 0  ;;  %p33_p11 = scmp.eq.s32.totalorder %s32_s26, 0 }
  0x12   : > { %p4356_p12 = por %p78_p9, %p77_p8  ;;  %p4016_p13 = scmp.ge.s32.totalorder %s4262_s15, 6 }
  0x13   : > { %s4361_s28 = scalar_select %p59_p10, %s4234_s8, %s61_s23  }
  0x14   : > { %s4364_s29 = scalar_select %p33_p11, %s4242_s10, %s35_s20  }
  0x15   : > { %94 = sbr.rel (%p4016_p13) target bundleno = 97 (0x61), region = 16 }
  0x1a   : > { %97 = sbr.rel (!%p4339_p3) target bundleno = 97 (0x61), region = 20  ;;  %s99_s30 = sand.u32 (%p4339_p3), 1, %s4242_s10  }
  0x1b   : > { %s4033_s2 = smul.u32 (%p4339_p3), 384, %s4258_s14  ;;  %s4017_s3 = sshll.u32 (%p4339_p3), %s99_s30, 10 }
  0x1c   : > { %s4380_s20 = scalar_lea.vmem (%p4339_p3), [#allocation3], %s4017_s3 }
  0x1d   : > { %s104_s4 = sadd.s32 (%p4339_p3), %s4254_s13, %s4033_s2 }
  0x1e   : > { %s4020_s5 = sshll.u32 (%p4339_p3), %s104_s4, 3 }
  0x1f   : > { %s4375_s21 = scalar_lea.vmem %s7243_s0, %s4020_s5 }
  0x20   : > { %v389_v0 = vld [vmem:[%s4375_s21] sm:$0xff]  ;;  %v391_v1 = vld [vmem:[%s4375_s21 + $0x18] sm:$0xff]  ;;  %v393_v2 = vld [vmem:[%s4375_s21 + $0x30] sm:$0xff] }
  0x21   : > { %390 = vst [vmem:[%s4380_s20] sm:$0xff] %v389_v0  ;;  %392 = vst [vmem:[%s4380_s20 + $0x8] sm:$0xff] %v391_v1  ;;  %v395_v3 = vld [vmem:[%s4375_s21 + $0x48] sm:$0xff]  ;;  %v397_v4 = vld [vmem:[%s4375_s21 + $0x60] sm:$0xff] }
  0x22   : > { %394 = vst [vmem:[%s4380_s20 + $0x10] sm:$0xff] %v393_v2  ;;  %v399_v5 = vld [vmem:[%s4375_s21 + $0x78] sm:$0xff]  ;;  %396 = vst [vmem:[%s4380_s20 + $0x18] sm:$0xff] %v395_v3  ;;  %v401_v6 = vld [vmem:[%s4375_s21 + $0x90] sm:$0xff] }
  0x23   : > { %398 = vst [vmem:[%s4380_s20 + $0x20] sm:$0xff] %v397_v4  ;;  %400 = vst [vmem:[%s4380_s20 + $0x28] sm:$0xff] %v399_v5  ;;  %v403_v7 = vld [vmem:[%s4375_s21 + $0xa8] sm:$0xff]  ;;  %v405_v8 = vld [vmem:[%s4375_s21 + $0xc0] sm:$0xff] }
  0x24   : > { %402 = vst [vmem:[%s4380_s20 + $0x30] sm:$0xff] %v401_v6  ;;  %404 = vst [vmem:[%s4380_s20 + $0x38] sm:$0xff] %v403_v7  ;;  %v407_v9 = vld [vmem:[%s4375_s21 + $0xd8] sm:$0xff]  ;;  %v409_v10 = vld [vmem:[%s4375_s21 + $0xf0] sm:$0xff] }
  0x25   : > { %406 = vst [vmem:[%s4380_s20 + $0x40] sm:$0xff] %v405_v8  ;;  %v411_v11 = vld [vmem:[%s4375_s21 + $0x108] sm:$0xff]  ;;  %408 = vst [vmem:[%s4380_s20 + $0x48] sm:$0xff] %v407_v9  ;;  %v413_v12 = vld [vmem:[%s4375_s21 + $0x120] sm:$0xff] }
  0x26   : > { %410 = vst [vmem:[%s4380_s20 + $0x50] sm:$0xff] %v409_v10  ;;  %412 = vst [vmem:[%s4380_s20 + $0x58] sm:$0xff] %v411_v11  ;;  %v415_v13 = vld [vmem:[%s4375_s21 + $0x138] sm:$0xff]  ;;  %v417_v14 = vld [vmem:[%s4375_s21 + $0x150] sm:$0xff] }
  0x27   : > { %414 = vst [vmem:[%s4380_s20 + $0x60] sm:$0xff] %v413_v12  ;;  %416 = vst [vmem:[%s4380_s20 + $0x68] sm:$0xff] %v415_v13  ;;  %v419_v15 = vld [vmem:[%s4375_s21 + $0x168] sm:$0xff]  ;;  %v421_v16 = vld [vmem:[%s4375_s21 + $0x180] sm:$0xff] }
  0x28   : > { %418 = vst [vmem:[%s4380_s20 + $0x70] sm:$0xff] %v417_v14  ;;  %v423_v17 = vld [vmem:[%s4375_s21 + $0x198] sm:$0xff]  ;;  %420 = vst [vmem:[%s4380_s20 + $0x78] sm:$0xff] %v419_v15  ;;  %v425_v18 = vld [vmem:[%s4375_s21 + $0x1b0] sm:$0xff] }
  0x29   : > { %422 = vst [vmem:[%s4380_s20 + $0x80] sm:$0xff] %v421_v16  ;;  %424 = vst [vmem:[%s4380_s20 + $0x88] sm:$0xff] %v423_v17  ;;  %v427_v19 = vld [vmem:[%s4375_s21 + $0x1c8] sm:$0xff]  ;;  %v429_v20 = vld [vmem:[%s4375_s21 + $0x1e0] sm:$0xff] }
  0x2a   : > { %426 = vst [vmem:[%s4380_s20 + $0x90] sm:$0xff] %v425_v18  ;;  %428 = vst [vmem:[%s4380_s20 + $0x98] sm:$0xff] %v427_v19  ;;  %v431_v21 = vld [vmem:[%s4375_s21 + $0x1f8] sm:$0xff]  ;;  %v433_v22 = vld [vmem:[%s4375_s21 + $0x210] sm:$0xff] }
  0x2b   : > { %430 = vst [vmem:[%s4380_s20 + $0xa0] sm:$0xff] %v429_v20  ;;  %v435_v23 = vld [vmem:[%s4375_s21 + $0x228] sm:$0xff]  ;;  %432 = vst [vmem:[%s4380_s20 + $0xa8] sm:$0xff] %v431_v21  ;;  %v437_v24 = vld [vmem:[%s4375_s21 + $0x240] sm:$0xff] }
  0x2c   : > { %434 = vst [vmem:[%s4380_s20 + $0xb0] sm:$0xff] %v433_v22  ;;  %436 = vst [vmem:[%s4380_s20 + $0xb8] sm:$0xff] %v435_v23  ;;  %v439_v25 = vld [vmem:[%s4375_s21 + $0x258] sm:$0xff]  ;;  %v441_v26 = vld [vmem:[%s4375_s21 + $0x270] sm:$0xff] }
  0x2d   : > { %438 = vst [vmem:[%s4380_s20 + $0xc0] sm:$0xff] %v437_v24  ;;  %440 = vst [vmem:[%s4380_s20 + $0xc8] sm:$0xff] %v439_v25  ;;  %v443_v27 = vld [vmem:[%s4375_s21 + $0x288] sm:$0xff]  ;;  %v445_v28 = vld [vmem:[%s4375_s21 + $0x2a0] sm:$0xff] }
  0x2e   : > { %442 = vst [vmem:[%s4380_s20 + $0xd0] sm:$0xff] %v441_v26  ;;  %v447_v29 = vld [vmem:[%s4375_s21 + $0x2b8] sm:$0xff]  ;;  %444 = vst [vmem:[%s4380_s20 + $0xd8] sm:$0xff] %v443_v27  ;;  %v449_v30 = vld [vmem:[%s4375_s21 + $0x2d0] sm:$0xff] }
  0x2f   : > { %446 = vst [vmem:[%s4380_s20 + $0xe0] sm:$0xff] %v445_v28  ;;  %448 = vst [vmem:[%s4380_s20 + $0xe8] sm:$0xff] %v447_v29  ;;  %v451_v31 = vld [vmem:[%s4375_s21 + $0x2e8] sm:$0xff]  ;;  %v453_v32 = vld [vmem:[%s4375_s21 + $0x300] sm:$0xff] }
  0x30   : > { %450 = vst [vmem:[%s4380_s20 + $0xf0] sm:$0xff] %v449_v30  ;;  %452 = vst [vmem:[%s4380_s20 + $0xf8] sm:$0xff] %v451_v31  ;;  %v455_v33 = vld [vmem:[%s4375_s21 + $0x318] sm:$0xff]  ;;  %v457_v34 = vld [vmem:[%s4375_s21 + $0x330] sm:$0xff] }
  0x31   : > { %454 = vst [vmem:[%s4380_s20 + $0x100] sm:$0xff] %v453_v32  ;;  %v459_v35 = vld [vmem:[%s4375_s21 + $0x348] sm:$0xff]  ;;  %456 = vst [vmem:[%s4380_s20 + $0x108] sm:$0xff] %v455_v33  ;;  %v461_v36 = vld [vmem:[%s4375_s21 + $0x360] sm:$0xff] }
  0x32   : > { %458 = vst [vmem:[%s4380_s20 + $0x110] sm:$0xff] %v457_v34  ;;  %460 = vst [vmem:[%s4380_s20 + $0x118] sm:$0xff] %v459_v35  ;;  %v463_v37 = vld [vmem:[%s4375_s21 + $0x378] sm:$0xff]  ;;  %v465_v38 = vld [vmem:[%s4375_s21 + $0x390] sm:$0xff] }
  0x33   : > { %462 = vst [vmem:[%s4380_s20 + $0x120] sm:$0xff] %v461_v36  ;;  %464 = vst [vmem:[%s4380_s20 + $0x128] sm:$0xff] %v463_v37  ;;  %v467_v39 = vld [vmem:[%s4375_s21 + $0x3a8] sm:$0xff]  ;;  %v469_v40 = vld [vmem:[%s4375_s21 + $0x3c0] sm:$0xff] }
  0x34   : > { %466 = vst [vmem:[%s4380_s20 + $0x130] sm:$0xff] %v465_v38  ;;  %v471_v41 = vld [vmem:[%s4375_s21 + $0x3d8] sm:$0xff]  ;;  %468 = vst [vmem:[%s4380_s20 + $0x138] sm:$0xff] %v467_v39  ;;  %v473_v42 = vld [vmem:[%s4375_s21 + $0x3f0] sm:$0xff] }
  0x35   : > { %470 = vst [vmem:[%s4380_s20 + $0x140] sm:$0xff] %v469_v40  ;;  %472 = vst [vmem:[%s4380_s20 + $0x148] sm:$0xff] %v471_v41  ;;  %v475_v43 = vld [vmem:[%s4375_s21 + $0x408] sm:$0xff]  ;;  %v477_v44 = vld [vmem:[%s4375_s21 + $0x420] sm:$0xff] }
  0x36   : > { %474 = vst [vmem:[%s4380_s20 + $0x150] sm:$0xff] %v473_v42  ;;  %476 = vst [vmem:[%s4380_s20 + $0x158] sm:$0xff] %v475_v43  ;;  %v479_v45 = vld [vmem:[%s4375_s21 + $0x438] sm:$0xff]  ;;  %v481_v46 = vld [vmem:[%s4375_s21 + $0x450] sm:$0xff] }
  0x37   : > { %478 = vst [vmem:[%s4380_s20 + $0x160] sm:$0xff] %v477_v44  ;;  %v483_v47 = vld [vmem:[%s4375_s21 + $0x468] sm:$0xff]  ;;  %480 = vst [vmem:[%s4380_s20 + $0x168] sm:$0xff] %v479_v45  ;;  %v485_v48 = vld [vmem:[%s4375_s21 + $0x480] sm:$0xff] }
  0x38   : > { %482 = vst [vmem:[%s4380_s20 + $0x170] sm:$0xff] %v481_v46  ;;  %484 = vst [vmem:[%s4380_s20 + $0x178] sm:$0xff] %v483_v47  ;;  %v487_v49 = vld [vmem:[%s4375_s21 + $0x498] sm:$0xff]  ;;  %v489_v50 = vld [vmem:[%s4375_s21 + $0x4b0] sm:$0xff] }
  0x39   : > { %486 = vst [vmem:[%s4380_s20 + $0x180] sm:$0xff] %v485_v48  ;;  %488 = vst [vmem:[%s4380_s20 + $0x188] sm:$0xff] %v487_v49  ;;  %v491_v51 = vld [vmem:[%s4375_s21 + $0x4c8] sm:$0xff]  ;;  %v493_v52 = vld [vmem:[%s4375_s21 + $0x4e0] sm:$0xff] }
  0x3a   : > { %490 = vst [vmem:[%s4380_s20 + $0x190] sm:$0xff] %v489_v50  ;;  %v495_v53 = vld [vmem:[%s4375_s21 + $0x4f8] sm:$0xff]  ;;  %492 = vst [vmem:[%s4380_s20 + $0x198] sm:$0xff] %v491_v51  ;;  %v497_v54 = vld [vmem:[%s4375_s21 + $0x510] sm:$0xff] }
  0x3b   : > { %494 = vst [vmem:[%s4380_s20 + $0x1a0] sm:$0xff] %v493_v52  ;;  %496 = vst [vmem:[%s4380_s20 + $0x1a8] sm:$0xff] %v495_v53  ;;  %v499_v55 = vld [vmem:[%s4375_s21 + $0x528] sm:$0xff]  ;;  %v501_v56 = vld [vmem:[%s4375_s21 + $0x540] sm:$0xff] }
  0x3c   : > { %498 = vst [vmem:[%s4380_s20 + $0x1b0] sm:$0xff] %v497_v54  ;;  %500 = vst [vmem:[%s4380_s20 + $0x1b8] sm:$0xff] %v499_v55  ;;  %v503_v57 = vld [vmem:[%s4375_s21 + $0x558] sm:$0xff]  ;;  %v505_v58 = vld [vmem:[%s4375_s21 + $0x570] sm:$0xff] }
  0x3d   : > { %502 = vst [vmem:[%s4380_s20 + $0x1c0] sm:$0xff] %v501_v56  ;;  %v507_v59 = vld [vmem:[%s4375_s21 + $0x588] sm:$0xff]  ;;  %504 = vst [vmem:[%s4380_s20 + $0x1c8] sm:$0xff] %v503_v57  ;;  %v509_v60 = vld [vmem:[%s4375_s21 + $0x5a0] sm:$0xff] }
  0x3e   : > { %506 = vst [vmem:[%s4380_s20 + $0x1d0] sm:$0xff] %v505_v58  ;;  %508 = vst [vmem:[%s4380_s20 + $0x1d8] sm:$0xff] %v507_v59  ;;  %v511_v61 = vld [vmem:[%s4375_s21 + $0x5b8] sm:$0xff]  ;;  %v513_v62 = vld [vmem:[%s4375_s21 + $0x5d0] sm:$0xff] }
  0x3f   : > { %510 = vst [vmem:[%s4380_s20 + $0x1e0] sm:$0xff] %v509_v60  ;;  %512 = vst [vmem:[%s4380_s20 + $0x1e8] sm:$0xff] %v511_v61  ;;  %v515_v63 = vld [vmem:[%s4375_s21 + $0x5e8] sm:$0xff]  ;;  %v517_v0 = vld [vmem:[%s4375_s21 + $0x600] sm:$0xff] }
  0x40   : > { %514 = vst [vmem:[%s4380_s20 + $0x1f0] sm:$0xff] %v513_v62  ;;  %v519_v1 = vld [vmem:[%s4375_s21 + $0x618] sm:$0xff]  ;;  %516 = vst [vmem:[%s4380_s20 + $0x1f8] sm:$0xff] %v515_v63  ;;  %v521_v2 = vld [vmem:[%s4375_s21 + $0x630] sm:$0xff] }
  0x41   : > { %518 = vst [vmem:[%s4380_s20 + $0x200] sm:$0xff] %v517_v0  ;;  %520 = vst [vmem:[%s4380_s20 + $0x208] sm:$0xff] %v519_v1  ;;  %v523_v3 = vld [vmem:[%s4375_s21 + $0x648] sm:$0xff]  ;;  %v525_v4 = vld [vmem:[%s4375_s21 + $0x660] sm:$0xff] }
  0x42   : > { %522 = vst [vmem:[%s4380_s20 + $0x210] sm:$0xff] %v521_v2  ;;  %524 = vst [vmem:[%s4380_s20 + $0x218] sm:$0xff] %v523_v3  ;;  %v527_v5 = vld [vmem:[%s4375_s21 + $0x678] sm:$0xff]  ;;  %v529_v6 = vld [vmem:[%s4375_s21 + $0x690] sm:$0xff] }
  0x43   : > { %526 = vst [vmem:[%s4380_s20 + $0x220] sm:$0xff] %v525_v4  ;;  %v531_v7 = vld [vmem:[%s4375_s21 + $0x6a8] sm:$0xff]  ;;  %528 = vst [vmem:[%s4380_s20 + $0x228] sm:$0xff] %v527_v5  ;;  %v533_v8 = vld [vmem:[%s4375_s21 + $0x6c0] sm:$0xff] }
  0x44   : > { %530 = vst [vmem:[%s4380_s20 + $0x230] sm:$0xff] %v529_v6  ;;  %532 = vst [vmem:[%s4380_s20 + $0x238] sm:$0xff] %v531_v7  ;;  %v535_v9 = vld [vmem:[%s4375_s21 + $0x6d8] sm:$0xff]  ;;  %v537_v10 = vld [vmem:[%s4375_s21 + $0x6f0] sm:$0xff] }
  0x45   : > { %534 = vst [vmem:[%s4380_s20 + $0x240] sm:$0xff] %v533_v8  ;;  %536 = vst [vmem:[%s4380_s20 + $0x248] sm:$0xff] %v535_v9  ;;  %v539_v11 = vld [vmem:[%s4375_s21 + $0x708] sm:$0xff]  ;;  %v541_v12 = vld [vmem:[%s4375_s21 + $0x720] sm:$0xff] }
  0x46   : > { %538 = vst [vmem:[%s4380_s20 + $0x250] sm:$0xff] %v537_v10  ;;  %v543_v13 = vld [vmem:[%s4375_s21 + $0x738] sm:$0xff]  ;;  %540 = vst [vmem:[%s4380_s20 + $0x258] sm:$0xff] %v539_v11  ;;  %v545_v14 = vld [vmem:[%s4375_s21 + $0x750] sm:$0xff] }
  0x47   : > { %542 = vst [vmem:[%s4380_s20 + $0x260] sm:$0xff] %v541_v12  ;;  %544 = vst [vmem:[%s4380_s20 + $0x268] sm:$0xff] %v543_v13  ;;  %v547_v15 = vld [vmem:[%s4375_s21 + $0x768] sm:$0xff]  ;;  %v549_v16 = vld [vmem:[%s4375_s21 + $0x780] sm:$0xff] }
  0x48   : > { %546 = vst [vmem:[%s4380_s20 + $0x270] sm:$0xff] %v545_v14  ;;  %548 = vst [vmem:[%s4380_s20 + $0x278] sm:$0xff] %v547_v15  ;;  %v551_v17 = vld [vmem:[%s4375_s21 + $0x798] sm:$0xff]  ;;  %v553_v18 = vld [vmem:[%s4375_s21 + $0x7b0] sm:$0xff] }
  0x49   : > { %550 = vst [vmem:[%s4380_s20 + $0x280] sm:$0xff] %v549_v16  ;;  %v555_v19 = vld [vmem:[%s4375_s21 + $0x7c8] sm:$0xff]  ;;  %552 = vst [vmem:[%s4380_s20 + $0x288] sm:$0xff] %v551_v17  ;;  %v557_v20 = vld [vmem:[%s4375_s21 + $0x7e0] sm:$0xff] }
  0x4a   : > { %554 = vst [vmem:[%s4380_s20 + $0x290] sm:$0xff] %v553_v18  ;;  %556 = vst [vmem:[%s4380_s20 + $0x298] sm:$0xff] %v555_v19  ;;  %v559_v21 = vld [vmem:[%s4375_s21 + $0x7f8] sm:$0xff]  ;;  %v561_v22 = vld [vmem:[%s4375_s21 + $0x810] sm:$0xff] }
  0x4b   : > { %558 = vst [vmem:[%s4380_s20 + $0x2a0] sm:$0xff] %v557_v20  ;;  %560 = vst [vmem:[%s4380_s20 + $0x2a8] sm:$0xff] %v559_v21  ;;  %v563_v23 = vld [vmem:[%s4375_s21 + $0x828] sm:$0xff]  ;;  %v565_v24 = vld [vmem:[%s4375_s21 + $0x840] sm:$0xff] }
  0x4c   : > { %562 = vst [vmem:[%s4380_s20 + $0x2b0] sm:$0xff] %v561_v22  ;;  %v567_v25 = vld [vmem:[%s4375_s21 + $0x858] sm:$0xff]  ;;  %564 = vst [vmem:[%s4380_s20 + $0x2b8] sm:$0xff] %v563_v23  ;;  %v569_v26 = vld [vmem:[%s4375_s21 + $0x870] sm:$0xff] }
  0x4d   : > { %566 = vst [vmem:[%s4380_s20 + $0x2c0] sm:$0xff] %v565_v24  ;;  %568 = vst [vmem:[%s4380_s20 + $0x2c8] sm:$0xff] %v567_v25  ;;  %v571_v27 = vld [vmem:[%s4375_s21 + $0x888] sm:$0xff]  ;;  %v573_v28 = vld [vmem:[%s4375_s21 + $0x8a0] sm:$0xff] }
  0x4e   : > { %570 = vst [vmem:[%s4380_s20 + $0x2d0] sm:$0xff] %v569_v26  ;;  %572 = vst [vmem:[%s4380_s20 + $0x2d8] sm:$0xff] %v571_v27  ;;  %v575_v29 = vld [vmem:[%s4375_s21 + $0x8b8] sm:$0xff]  ;;  %v577_v30 = vld [vmem:[%s4375_s21 + $0x8d0] sm:$0xff] }
  0x4f   : > { %574 = vst [vmem:[%s4380_s20 + $0x2e0] sm:$0xff] %v573_v28  ;;  %v579_v31 = vld [vmem:[%s4375_s21 + $0x8e8] sm:$0xff]  ;;  %576 = vst [vmem:[%s4380_s20 + $0x2e8] sm:$0xff] %v575_v29  ;;  %v581_v32 = vld [vmem:[%s4375_s21 + $0x900] sm:$0xff] }
  0x50   : > { %578 = vst [vmem:[%s4380_s20 + $0x2f0] sm:$0xff] %v577_v30  ;;  %580 = vst [vmem:[%s4380_s20 + $0x2f8] sm:$0xff] %v579_v31  ;;  %v583_v33 = vld [vmem:[%s4375_s21 + $0x918] sm:$0xff]  ;;  %v585_v34 = vld [vmem:[%s4375_s21 + $0x930] sm:$0xff] }
  0x51   : > { %582 = vst [vmem:[%s4380_s20 + $0x300] sm:$0xff] %v581_v32  ;;  %584 = vst [vmem:[%s4380_s20 + $0x308] sm:$0xff] %v583_v33  ;;  %v587_v35 = vld [vmem:[%s4375_s21 + $0x948] sm:$0xff]  ;;  %v589_v36 = vld [vmem:[%s4375_s21 + $0x960] sm:$0xff] }
  0x52   : > { %586 = vst [vmem:[%s4380_s20 + $0x310] sm:$0xff] %v585_v34  ;;  %v591_v37 = vld [vmem:[%s4375_s21 + $0x978] sm:$0xff]  ;;  %588 = vst [vmem:[%s4380_s20 + $0x318] sm:$0xff] %v587_v35  ;;  %v593_v38 = vld [vmem:[%s4375_s21 + $0x990] sm:$0xff] }
  0x53   : > { %590 = vst [vmem:[%s4380_s20 + $0x320] sm:$0xff] %v589_v36  ;;  %592 = vst [vmem:[%s4380_s20 + $0x328] sm:$0xff] %v591_v37  ;;  %v595_v39 = vld [vmem:[%s4375_s21 + $0x9a8] sm:$0xff]  ;;  %v597_v40 = vld [vmem:[%s4375_s21 + $0x9c0] sm:$0xff] }
  0x54   : > { %594 = vst [vmem:[%s4380_s20 + $0x330] sm:$0xff] %v593_v38  ;;  %596 = vst [vmem:[%s4380_s20 + $0x338] sm:$0xff] %v595_v39  ;;  %v599_v41 = vld [vmem:[%s4375_s21 + $0x9d8] sm:$0xff]  ;;  %v601_v42 = vld [vmem:[%s4375_s21 + $0x9f0] sm:$0xff] }
  0x55   : > { %598 = vst [vmem:[%s4380_s20 + $0x340] sm:$0xff] %v597_v40  ;;  %v603_v43 = vld [vmem:[%s4375_s21 + $0xa08] sm:$0xff]  ;;  %600 = vst [vmem:[%s4380_s20 + $0x348] sm:$0xff] %v599_v41  ;;  %v605_v44 = vld [vmem:[%s4375_s21 + $0xa20] sm:$0xff] }
  0x56   : > { %602 = vst [vmem:[%s4380_s20 + $0x350] sm:$0xff] %v601_v42  ;;  %604 = vst [vmem:[%s4380_s20 + $0x358] sm:$0xff] %v603_v43  ;;  %v607_v45 = vld [vmem:[%s4375_s21 + $0xa38] sm:$0xff]  ;;  %v609_v46 = vld [vmem:[%s4375_s21 + $0xa50] sm:$0xff] }
  0x57   : > { %606 = vst [vmem:[%s4380_s20 + $0x360] sm:$0xff] %v605_v44  ;;  %608 = vst [vmem:[%s4380_s20 + $0x368] sm:$0xff] %v607_v45  ;;  %v611_v47 = vld [vmem:[%s4375_s21 + $0xa68] sm:$0xff]  ;;  %v613_v48 = vld [vmem:[%s4375_s21 + $0xa80] sm:$0xff] }
  0x58   : > { %610 = vst [vmem:[%s4380_s20 + $0x370] sm:$0xff] %v609_v46  ;;  %v615_v49 = vld [vmem:[%s4375_s21 + $0xa98] sm:$0xff]  ;;  %612 = vst [vmem:[%s4380_s20 + $0x378] sm:$0xff] %v611_v47  ;;  %v617_v50 = vld [vmem:[%s4375_s21 + $0xab0] sm:$0xff] }
  0x59   : > { %614 = vst [vmem:[%s4380_s20 + $0x380] sm:$0xff] %v613_v48  ;;  %616 = vst [vmem:[%s4380_s20 + $0x388] sm:$0xff] %v615_v49  ;;  %v619_v51 = vld [vmem:[%s4375_s21 + $0xac8] sm:$0xff]  ;;  %v621_v52 = vld [vmem:[%s4375_s21 + $0xae0] sm:$0xff] }
  0x5a   : > { %618 = vst [vmem:[%s4380_s20 + $0x390] sm:$0xff] %v617_v50  ;;  %620 = vst [vmem:[%s4380_s20 + $0x398] sm:$0xff] %v619_v51  ;;  %v623_v53 = vld [vmem:[%s4375_s21 + $0xaf8] sm:$0xff]  ;;  %v625_v54 = vld [vmem:[%s4375_s21 + $0xb10] sm:$0xff] }
  0x5b   : > { %622 = vst [vmem:[%s4380_s20 + $0x3a0] sm:$0xff] %v621_v52  ;;  %v627_v55 = vld [vmem:[%s4375_s21 + $0xb28] sm:$0xff]  ;;  %624 = vst [vmem:[%s4380_s20 + $0x3a8] sm:$0xff] %v623_v53  ;;  %v629_v56 = vld [vmem:[%s4375_s21 + $0xb40] sm:$0xff] }
  0x5c   : > { %626 = vst [vmem:[%s4380_s20 + $0x3b0] sm:$0xff] %v625_v54  ;;  %628 = vst [vmem:[%s4380_s20 + $0x3b8] sm:$0xff] %v627_v55  ;;  %v631_v57 = vld [vmem:[%s4375_s21 + $0xb58] sm:$0xff]  ;;  %v633_v58 = vld [vmem:[%s4375_s21 + $0xb70] sm:$0xff] }
  0x5d   : > { %630 = vst [vmem:[%s4380_s20 + $0x3c0] sm:$0xff] %v629_v56  ;;  %632 = vst [vmem:[%s4380_s20 + $0x3c8] sm:$0xff] %v631_v57  ;;  %v635_v59 = vld [vmem:[%s4375_s21 + $0xb88] sm:$0xff]  ;;  %v637_v60 = vld [vmem:[%s4375_s21 + $0xba0] sm:$0xff] }
  0x5e   : > { %634 = vst [vmem:[%s4380_s20 + $0x3d0] sm:$0xff] %v633_v58  ;;  %v639_v61 = vld [vmem:[%s4375_s21 + $0xbb8] sm:$0xff]  ;;  %636 = vst [vmem:[%s4380_s20 + $0x3d8] sm:$0xff] %v635_v59  ;;  %v641_v62 = vld [vmem:[%s4375_s21 + $0xbd0] sm:$0xff] }
  0x5f   : > { %638 = vst [vmem:[%s4380_s20 + $0x3e0] sm:$0xff] %v637_v60  ;;  %640 = vst [vmem:[%s4380_s20 + $0x3e8] sm:$0xff] %v639_v61  ;;  %v643_v63 = vld [vmem:[%s4375_s21 + $0xbe8] sm:$0xff] }
  0x60   : > { %642 = vst [vmem:[%s4380_s20 + $0x3f0] sm:$0xff] %v641_v62  ;;  %644 = vst [vmem:[%s4380_s20 + $0x3f8] sm:$0xff] %v643_v63 }
  0x61 PF: > { %p4021_p0 = scmp.ge.s32.totalorder %s4262_s15, 1  ;;  %p649_p1 = scmp.lt.s32.totalorder %s4262_s15, 7 }
  0x63   : > { %p650_p2 = pnand %p4021_p0, %p649_p1 }
  0x65   : > { %653 = sbr.rel (%p650_p2) target bundleno = 1087 (0x43f), region = 58 }
  0x6a   : > { %s656_s22 = sand.u32 1, %s4238_s9   ;;  %s672_s23 = sand.u32 1, %s4230_s7  }
  0x6b   : > { %s4022_s25 = sshll.u32 %s656_s22, 10  ;;  %s4641_s26 = sshll.u32 %s672_s23, 3 }
  0x6c   : > { %s4643_s30 = scalar_lea.vmem [#allocation3], %s4022_s25  ;;  %s674_s2 = scalar_lea.vmem [#allocation4], %s4641_s26 }
  0x6d   : > { %p4024_p3 = scmp.ne.s32.totalorder %s4246_s11, 0 }
  0x6f   : > { %679 = sbr.rel (%p4024_p3) target bundleno = 181 (0xb5), region = 66 }
  0x74   : > { %v4264_v0 = vmov 0.0  }
  0x75   : > { %680 = vst [vmem:[#allocation2 + $0x2b0] sm:$0xff] %v4264_v0  ;;  %681 = vst [vmem:[#allocation2 + $0x3b0] sm:$0xff] %v4264_v0 }
  0x76   : > { %682 = vst [vmem:[#allocation2 + $0xd8] sm:$0xff] %v4264_v0  ;;  %683 = vst [vmem:[#allocation2 + $0x18] sm:$0xff] %v4264_v0 }
  0x77   : > { %684 = vst [vmem:[#allocation2 + $0x50] sm:$0xff] %v4264_v0  ;;  %685 = vst [vmem:[#allocation2 + $0x368] sm:$0xff] %v4264_v0 }
  0x78   : > { %686 = vst [vmem:[#allocation2 + $0x330] sm:$0xff] %v4264_v0  ;;  %687 = vst [vmem:[#allocation2 + $0x48] sm:$0xff] %v4264_v0 }
  0x79   : > { %688 = vst [vmem:[#allocation2 + $0x380] sm:$0xff] %v4264_v0  ;;  %689 = vst [vmem:[#allocation2 + $0x110] sm:$0xff] %v4264_v0 }
  0x7a   : > { %690 = vst [vmem:[#allocation2 + $0x118] sm:$0xff] %v4264_v0  ;;  %691 = vst [vmem:[#allocation2 + $0x98] sm:$0xff] %v4264_v0 }
  0x7b   : > { %692 = vst [vmem:[#allocation2 + $0x320] sm:$0xff] %v4264_v0  ;;  %693 = vst [vmem:[#allocation2 + $0x150] sm:$0xff] %v4264_v0 }
  0x7c   : > { %694 = vst [vmem:[#allocation2 + $0x108] sm:$0xff] %v4264_v0  ;;  %695 = vst [vmem:[#allocation2 + $0x60] sm:$0xff] %v4264_v0 }
  0x7d   : > { %696 = vst [vmem:[#allocation2 + $0x2e0] sm:$0xff] %v4264_v0  ;;  %697 = vst [vmem:[#allocation2 + $0x388] sm:$0xff] %v4264_v0 }
  0x7e   : > { %698 = vst [vmem:[#allocation2 + $0x338] sm:$0xff] %v4264_v0  ;;  %699 = vst [vmem:[#allocation2 + $0x340] sm:$0xff] %v4264_v0 }
  0x7f   : > { %700 = vst [vmem:[#allocation2 + $0x80] sm:$0xff] %v4264_v0  ;;  %701 = vst [vmem:[#allocation2 + $0x1a8] sm:$0xff] %v4264_v0 }
  0x80   : > { %702 = vst [vmem:[#allocation2 + $0x1b8] sm:$0xff] %v4264_v0  ;;  %703 = vst [vmem:[#allocation2 + $0x168] sm:$0xff] %v4264_v0 }
  0x81   : > { %704 = vst [vmem:[#allocation2 + $0x3e8] sm:$0xff] %v4264_v0  ;;  %705 = vst [vmem:[#allocation2 + $0x2f8] sm:$0xff] %v4264_v0 }
  0x82   : > { %706 = vst [vmem:[#allocation2 + $0x290] sm:$0xff] %v4264_v0  ;;  %707 = vst [vmem:[#allocation2 + $0x28] sm:$0xff] %v4264_v0 }
  0x83   : > { %708 = vst [vmem:[#allocation2 + $0x138] sm:$0xff] %v4264_v0  ;;  %709 = vst [vmem:[#allocation2 + $0xc0] sm:$0xff] %v4264_v0 }
  0x84   : > { %710 = vst [vmem:[#allocation2 + $0x1c0] sm:$0xff] %v4264_v0  ;;  %711 = vst [vmem:[#allocation2 + $0x280] sm:$0xff] %v4264_v0 }
  0x85   : > { %712 = vst [vmem:[#allocation2 + $0x100] sm:$0xff] %v4264_v0  ;;  %713 = vst [vmem:[#allocation2 + $0x3c0] sm:$0xff] %v4264_v0 }
  0x86   : > { %714 = vst [vmem:[#allocation2 + $0x158] sm:$0xff] %v4264_v0  ;;  %715 = vst [vmem:[#allocation2 + $0x3e0] sm:$0xff] %v4264_v0 }
  0x87   : > { %716 = vst [vmem:[#allocation2 + $0x218] sm:$0xff] %v4264_v0  ;;  %717 = vst [vmem:[#allocation2 + $0x3f8] sm:$0xff] %v4264_v0 }
  0x88   : > { %718 = vst [vmem:[#allocation2 + $0x8] sm:$0xff] %v4264_v0  ;;  %719 = vst [vmem:[#allocation2 + $0x128] sm:$0xff] %v4264_v0 }
  0x89   : > { %720 = vst [vmem:[#allocation2 + $0x2a0] sm:$0xff] %v4264_v0  ;;  %721 = vst [vmem:[#allocation2 + $0x3f0] sm:$0xff] %v4264_v0 }
  0x8a   : > { %722 = vst [vmem:[#allocation2 + $0xa0] sm:$0xff] %v4264_v0  ;;  %723 = vst [vmem:[#allocation2 + $0x2c0] sm:$0xff] %v4264_v0 }
  0x8b   : > { %724 = vst [vmem:[#allocation2 + $0xb0] sm:$0xff] %v4264_v0  ;;  %725 = vst [vmem:[#allocation2 + $0x1e0] sm:$0xff] %v4264_v0 }
  0x8c   : > { %726 = vst [vmem:[#allocation2 + $0x1f0] sm:$0xff] %v4264_v0  ;;  %727 = vst [vmem:[#allocation2 + $0x10] sm:$0xff] %v4264_v0 }
  0x8d   : > { %728 = vst [vmem:[#allocation2 + $0x230] sm:$0xff] %v4264_v0  ;;  %729 = vst [vmem:[#allocation2 + $0x240] sm:$0xff] %v4264_v0 }
  0x8e   : > { %730 = vst [vmem:[#allocation2 + $0x90] sm:$0xff] %v4264_v0  ;;  %731 = vst [vmem:[#allocation2 + $0x3a0] sm:$0xff] %v4264_v0 }
  0x8f   : > { %732 = vst [vmem:[#allocation2 + $0x208] sm:$0xff] %v4264_v0  ;;  %733 = vst [vmem:[#allocation2 + $0xd0] sm:$0xff] %v4264_v0 }
  0x90   : > { %734 = vst [vmem:[#allocation2 + $0x88] sm:$0xff] %v4264_v0  ;;  %735 = vst [vmem:[#allocation2 + $0x2f0] sm:$0xff] %v4264_v0 }
  0x91   : > { %736 = vst [vmem:[#allocation2 + $0x358] sm:$0xff] %v4264_v0  ;;  %737 = vst [vmem:[#allocation2 + $0x268] sm:$0xff] %v4264_v0 }
  0x92   : > { %738 = vst [vmem:[#allocation2 + $0x350] sm:$0xff] %v4264_v0  ;;  %739 = vst [vmem:[#allocation2 + $0x188] sm:$0xff] %v4264_v0 }
  0x93   : > { %740 = vst [vmem:[#allocation2 + $0x1d8] sm:$0xff] %v4264_v0  ;;  %741 = vst [vmem:[#allocation2 + $0x30] sm:$0xff] %v4264_v0 }
  0x94   : > { %742 = vst [vmem:[#allocation2 + $0x140] sm:$0xff] %v4264_v0  ;;  %743 = vst [vmem:[#allocation2 + $0x2a8] sm:$0xff] %v4264_v0 }
  0x95   : > { %744 = vst [vmem:[#allocation2 + $0x130] sm:$0xff] %v4264_v0  ;;  %745 = vst [vmem:[#allocation2 + $0x200] sm:$0xff] %v4264_v0 }
  0x96   : > { %746 = vst [vmem:[#allocation2 + $0x318] sm:$0xff] %v4264_v0  ;;  %747 = vst [vmem:[#allocation2 + $0x220] sm:$0xff] %v4264_v0 }
  0x97   : > { %748 = vst [vmem:[#allocation2 + $0x70] sm:$0xff] %v4264_v0  ;;  %749 = vst [vmem:[#allocation2 + $0x300] sm:$0xff] %v4264_v0 }
  0x98   : > { %750 = vst [vmem:[#allocation2 + $0xe0] sm:$0xff] %v4264_v0  ;;  %751 = vst [vmem:[#allocation2 + $0x178] sm:$0xff] %v4264_v0 }
  0x99   : > { %752 = vst [vmem:[#allocation2 + $0x328] sm:$0xff] %v4264_v0  ;;  %753 = vst [vmem:[#allocation2 + $0x260] sm:$0xff] %v4264_v0 }
  0x9a   : > { %754 = vst [vmem:[#allocation2 + $0x3b8] sm:$0xff] %v4264_v0  ;;  %755 = vst [vmem:[#allocation2 + $0x2b8] sm:$0xff] %v4264_v0 }
  0x9b   : > { %756 = vst [vmem:[#allocation2 + $0x248] sm:$0xff] %v4264_v0  ;;  %757 = vst [vmem:[#allocation2 + $0x40] sm:$0xff] %v4264_v0 }
  0x9c   : > { %758 = vst [vmem:[#allocation2 + $0x20] sm:$0xff] %v4264_v0  ;;  %759 = vst [vmem:[#allocation2 + $0xe8] sm:$0xff] %v4264_v0 }
  0x9d   : > { %760 = vst [vmem:[#allocation2 + $0x288] sm:$0xff] %v4264_v0  ;;  %761 = vst [vmem:[#allocation2 + $0x3a8] sm:$0xff] %v4264_v0 }
  0x9e   : > { %762 = vst [vmem:[#allocation2 + $0x3c8] sm:$0xff] %v4264_v0  ;;  %763 = vst [vmem:[#allocation2 + $0x160] sm:$0xff] %v4264_v0 }
  0x9f   : > { %764 = vst [vmem:[#allocation2 + $0x2c8] sm:$0xff] %v4264_v0  ;;  %765 = vst [vmem:[#allocation2 + $0x210] sm:$0xff] %v4264_v0 }
  0xa0   : > { %766 = vst [vmem:[#allocation2 + $0x3d8] sm:$0xff] %v4264_v0  ;;  %767 = vst [vmem:[#allocation2 + $0x1e8] sm:$0xff] %v4264_v0 }
  0xa1   : > { %768 = vst [vmem:[#allocation2 + $0x1b0] sm:$0xff] %v4264_v0  ;;  %769 = vst [vmem:[#allocation2 + $0x1c8] sm:$0xff] %v4264_v0 }
  0xa2   : > { %770 = vst [vmem:[#allocation2 + $0x2d0] sm:$0xff] %v4264_v0  ;;  %771 = vst [vmem:[#allocation2 + $0x1d0] sm:$0xff] %v4264_v0 }
  0xa3   : > { %772 = vst [vmem:[#allocation2 + $0x58] sm:$0xff] %v4264_v0  ;;  %773 = vst [vmem:[#allocation2 + $0x120] sm:$0xff] %v4264_v0 }
  0xa4   : > { %774 = vst [vmem:[#allocation2 + $0x198] sm:$0xff] %v4264_v0  ;;  %775 = vst [vmem:[#allocation2 + $0x2e8] sm:$0xff] %v4264_v0 }
  0xa5   : > { %776 = vst [vmem:[#allocation2 + $0x1f8] sm:$0xff] %v4264_v0  ;;  %777 = vst [vmem:[#allocation2 + $0x238] sm:$0xff] %v4264_v0 }
  0xa6   : > { %778 = vst [vmem:[#allocation2 + $0x398] sm:$0xff] %v4264_v0  ;;  %779 = vst [vmem:[#allocation2 + $0x390] sm:$0xff] %v4264_v0 }
  0xa7   : > { %780 = vst [vmem:[#allocation2 + $0x1a0] sm:$0xff] %v4264_v0  ;;  %781 = vst [vmem:[#allocation2 + $0xa8] sm:$0xff] %v4264_v0 }
  0xa8   : > { %782 = vst [vmem:[#allocation2 + $0x258] sm:$0xff] %v4264_v0  ;;  %783 = vst [vmem:[#allocation2 + $0x2d8] sm:$0xff] %v4264_v0 }
  0xa9   : > { %784 = vst [vmem:[#allocation2 + $0xf0] sm:$0xff] %v4264_v0  ;;  %785 = vst [vmem:[#allocation2 + $0x180] sm:$0xff] %v4264_v0 }
  0xaa   : > { %786 = vst [vmem:[#allocation2 + $0x170] sm:$0xff] %v4264_v0  ;;  %787 = vst [vmem:[#allocation2 + $0x3d0] sm:$0xff] %v4264_v0 }
  0xab   : > { %788 = vst [vmem:[#allocation2 + $0x250] sm:$0xff] %v4264_v0  ;;  %789 = vst [vmem:[#allocation2 + $0x378] sm:$0xff] %v4264_v0 }
  0xac   : > { %790 = vst [vmem:[#allocation2 + $0xb8] sm:$0xff] %v4264_v0  ;;  %791 = vst [vmem:[#allocation2 + $0x38] sm:$0xff] %v4264_v0 }
  0xad   : > { %792 = vst [vmem:[#allocation2 + $0x78] sm:$0xff] %v4264_v0  ;;  %793 = vst [vmem:[#allocation2 + $0x308] sm:$0xff] %v4264_v0 }
  0xae   : > { %794 = vst [vmem:[#allocation2 + $0x370] sm:$0xff] %v4264_v0  ;;  %795 = vst [vmem:[#allocation2 + $0xc8] sm:$0xff] %v4264_v0 }
  0xaf   : > { %796 = vst [vmem:[#allocation2 + $0x278] sm:$0xff] %v4264_v0  ;;  %797 = vst [vmem:[#allocation2 + $0x360] sm:$0xff] %v4264_v0 }
  0xb0   : > { %798 = vst [vmem:[#allocation2 + $0x228] sm:$0xff] %v4264_v0  ;;  %799 = vst [vmem:[#allocation2 + $0x348] sm:$0xff] %v4264_v0 }
  0xb1   : > { %800 = vst [vmem:[#allocation2 + $0x148] sm:$0xff] %v4264_v0  ;;  %801 = vst [vmem:[#allocation2 + $0xf8] sm:$0xff] %v4264_v0 }
  0xb2   : > { %802 = vst [vmem:[#allocation2 + $0x68] sm:$0xff] %v4264_v0  ;;  %803 = vst [vmem:[#allocation2] sm:$0xff] %v4264_v0 }
  0xb3   : > { %804 = vst [vmem:[#allocation2 + $0x298] sm:$0xff] %v4264_v0  ;;  %805 = vst [vmem:[#allocation2 + $0x270] sm:$0xff] %v4264_v0 }
  0xb4   : > { %806 = vst [vmem:[#allocation2 + $0x310] sm:$0xff] %v4264_v0  ;;  %807 = vst [vmem:[#allocation2 + $0x190] sm:$0xff] %v4264_v0 }
  0xb5 PF: > { %v4776_v1 = vld [vmem:[%s4643_s30] sm:$0xff]  ;;  %v4779_v2 = vld [vmem:[%s4643_s30 + $0x8] sm:$0xff]  ;;  %v4782_v3 = vld [vmem:[%s4643_s30 + $0x10] sm:$0xff]  ;;  %p4025_p4 = scmp.ne.s32.totalorder %s4246_s11, 2 }
  0xb6   : > { %7510 = vst [vmem:[#allocation7_spill] sm:$0xff] %v4776_v1  ;;  %7511 = vst [vmem:[#allocation8_spill] sm:$0xff] %v4779_v2  ;;  %v4785_v4 = vld [vmem:[%s4643_s30 + $0x18] sm:$0xff]  ;;  %v4788_v5 = vld [vmem:[%s4643_s30 + $0x20] sm:$0xff] }
  0xb7   : > { %7512 = vst [vmem:[#allocation9_spill] sm:$0xff] %v4782_v3  ;;  %7513 = vst [vmem:[#allocation10_spill] sm:$0xff] %v4785_v4  ;;  %v4791_v6 = vld [vmem:[%s4643_s30 + $0x28] sm:$0xff]  ;;  %v4794_v7 = vld [vmem:[%s4643_s30 + $0x30] sm:$0xff] }
  0xb8   : > { %7514 = vst [vmem:[#allocation11_spill] sm:$0xff] %v4788_v5  ;;  %7515 = vst [vmem:[#allocation12_spill] sm:$0xff] %v4791_v6  ;;  %v4797_v8 = vld [vmem:[%s4643_s30 + $0x38] sm:$0xff]  ;;  %v4800_v9 = vld [vmem:[%s4643_s30 + $0x40] sm:$0xff] }
  0xb9   : > { %7516 = vst [vmem:[#allocation13_spill] sm:$0xff] %v4794_v7  ;;  %7517 = vst [vmem:[#allocation14_spill] sm:$0xff] %v4797_v8  ;;  %v4803_v10 = vld [vmem:[%s4643_s30 + $0x48] sm:$0xff]  ;;  %v4806_v11 = vld [vmem:[%s4643_s30 + $0x50] sm:$0xff] }
  0xba   : > { %7518 = vst [vmem:[#allocation15_spill] sm:$0xff] %v4800_v9  ;;  %7519 = vst [vmem:[#allocation16_spill] sm:$0xff] %v4803_v10  ;;  %v4809_v12 = vld [vmem:[%s4643_s30 + $0x58] sm:$0xff]  ;;  %v4812_v13 = vld [vmem:[%s4643_s30 + $0x60] sm:$0xff] }
  0xbb   : > { %7520 = vst [vmem:[#allocation17_spill] sm:$0xff] %v4806_v11  ;;  %7521 = vst [vmem:[#allocation18_spill] sm:$0xff] %v4809_v12  ;;  %v4815_v14 = vld [vmem:[%s4643_s30 + $0x68] sm:$0xff]  ;;  %v4818_v15 = vld [vmem:[%s4643_s30 + $0x70] sm:$0xff] }
  0xbc   : > { %7522 = vst [vmem:[#allocation19_spill] sm:$0xff] %v4812_v13  ;;  %7523 = vst [vmem:[#allocation20_spill] sm:$0xff] %v4815_v14  ;;  %v4821_v16 = vld [vmem:[%s4643_s30 + $0x78] sm:$0xff]  ;;  %v4824_v17 = vld [vmem:[%s4643_s30 + $0x80] sm:$0xff] }
  0xbd   : > { %7524 = vst [vmem:[#allocation21_spill] sm:$0xff] %v4818_v15  ;;  %7525 = vst [vmem:[#allocation22_spill] sm:$0xff] %v4821_v16  ;;  %v4827_v18 = vld [vmem:[%s4643_s30 + $0x88] sm:$0xff]  ;;  %v4830_v19 = vld [vmem:[%s4643_s30 + $0x90] sm:$0xff] }
  0xbe   : > { %7526 = vst [vmem:[#allocation23_spill] sm:$0xff] %v4824_v17  ;;  %7527 = vst [vmem:[#allocation24_spill] sm:$0xff] %v4827_v18  ;;  %v4833_v20 = vld [vmem:[%s4643_s30 + $0x98] sm:$0xff]  ;;  %v4836_v21 = vld [vmem:[%s4643_s30 + $0xa0] sm:$0xff] }
  0xbf   : > { %7528 = vst [vmem:[#allocation25_spill] sm:$0xff] %v4830_v19  ;;  %7529 = vst [vmem:[#allocation26_spill] sm:$0xff] %v4833_v20  ;;  %v4839_v22 = vld [vmem:[%s4643_s30 + $0xa8] sm:$0xff]  ;;  %v4842_v23 = vld [vmem:[%s4643_s30 + $0xb0] sm:$0xff] }
  0xc0   : > { %7530 = vst [vmem:[#allocation27_spill] sm:$0xff] %v4836_v21  ;;  %7531 = vst [vmem:[#allocation28_spill] sm:$0xff] %v4839_v22  ;;  %v4845_v24 = vld [vmem:[%s4643_s30 + $0xb8] sm:$0xff]  ;;  %v4848_v25 = vld [vmem:[%s4643_s30 + $0xc0] sm:$0xff] }
  0xc1   : > { %7532 = vst [vmem:[#allocation29_spill] sm:$0xff] %v4842_v23  ;;  %7533 = vst [vmem:[#allocation30_spill] sm:$0xff] %v4845_v24  ;;  %v4851_v26 = vld [vmem:[%s4643_s30 + $0xc8] sm:$0xff]  ;;  %v4854_v27 = vld [vmem:[%s4643_s30 + $0xd0] sm:$0xff] }
  0xc2   : > { %7534 = vst [vmem:[#allocation31_spill] sm:$0xff] %v4848_v25  ;;  %7535 = vst [vmem:[#allocation32_spill] sm:$0xff] %v4851_v26  ;;  %v4857_v28 = vld [vmem:[%s4643_s30 + $0xd8] sm:$0xff]  ;;  %v4860_v29 = vld [vmem:[%s4643_s30 + $0xe0] sm:$0xff] }
  0xc3   : > { %7536 = vst [vmem:[#allocation33_spill] sm:$0xff] %v4854_v27  ;;  %7537 = vst [vmem:[#allocation34_spill] sm:$0xff] %v4857_v28  ;;  %v4863_v30 = vld [vmem:[%s4643_s30 + $0xe8] sm:$0xff]  ;;  %v4866_v31 = vld [vmem:[%s4643_s30 + $0xf0] sm:$0xff] }
  0xc4   : > { %7538 = vst [vmem:[#allocation35_spill] sm:$0xff] %v4860_v29  ;;  %7539 = vst [vmem:[#allocation36_spill] sm:$0xff] %v4863_v30  ;;  %v4869_v32 = vld [vmem:[%s4643_s30 + $0xf8] sm:$0xff]  ;;  %v4872_v33 = vld [vmem:[%s4643_s30 + $0x100] sm:$0xff] }
  0xc5   : > { %7540 = vst [vmem:[#allocation37_spill] sm:$0xff] %v4866_v31  ;;  %7541 = vst [vmem:[#allocation38_spill] sm:$0xff] %v4869_v32  ;;  %v4875_v34 = vld [vmem:[%s4643_s30 + $0x108] sm:$0xff]  ;;  %v4878_v35 = vld [vmem:[%s4643_s30 + $0x110] sm:$0xff] }
  0xc6   : > { %7542 = vst [vmem:[#allocation39_spill] sm:$0xff] %v4872_v33  ;;  %7543 = vst [vmem:[#allocation40_spill] sm:$0xff] %v4875_v34  ;;  %v4881_v36 = vld [vmem:[%s4643_s30 + $0x118] sm:$0xff]  ;;  %v4884_v37 = vld [vmem:[%s4643_s30 + $0x120] sm:$0xff] }
  0xc7   : > { %7544 = vst [vmem:[#allocation41_spill] sm:$0xff] %v4878_v35  ;;  %7545 = vst [vmem:[#allocation42_spill] sm:$0xff] %v4881_v36  ;;  %v4887_v38 = vld [vmem:[%s4643_s30 + $0x128] sm:$0xff]  ;;  %v4890_v39 = vld [vmem:[%s4643_s30 + $0x130] sm:$0xff] }
  0xc8   : > { %7546 = vst [vmem:[#allocation43_spill] sm:$0xff] %v4884_v37  ;;  %7547 = vst [vmem:[#allocation44_spill] sm:$0xff] %v4887_v38  ;;  %v4893_v40 = vld [vmem:[%s4643_s30 + $0x138] sm:$0xff]  ;;  %v4896_v41 = vld [vmem:[%s4643_s30 + $0x140] sm:$0xff] }
  0xc9   : > { %7548 = vst [vmem:[#allocation45_spill] sm:$0xff] %v4890_v39  ;;  %7549 = vst [vmem:[#allocation46_spill] sm:$0xff] %v4893_v40  ;;  %v4899_v42 = vld [vmem:[%s4643_s30 + $0x148] sm:$0xff]  ;;  %v4902_v43 = vld [vmem:[%s4643_s30 + $0x150] sm:$0xff] }
  0xca   : > { %7550 = vst [vmem:[#allocation47_spill] sm:$0xff] %v4896_v41  ;;  %7551 = vst [vmem:[#allocation48_spill] sm:$0xff] %v4899_v42  ;;  %v4905_v44 = vld [vmem:[%s4643_s30 + $0x158] sm:$0xff]  ;;  %v4908_v45 = vld [vmem:[%s4643_s30 + $0x160] sm:$0xff] }
  0xcb   : > { %7552 = vst [vmem:[#allocation49_spill] sm:$0xff] %v4902_v43  ;;  %7553 = vst [vmem:[#allocation50_spill] sm:$0xff] %v4905_v44  ;;  %v4911_v46 = vld [vmem:[%s4643_s30 + $0x168] sm:$0xff]  ;;  %v4914_v47 = vld [vmem:[%s4643_s30 + $0x170] sm:$0xff] }
  0xcc   : > { %7554 = vst [vmem:[#allocation51_spill] sm:$0xff] %v4908_v45  ;;  %7555 = vst [vmem:[#allocation52_spill] sm:$0xff] %v4911_v46  ;;  %v4917_v48 = vld [vmem:[%s4643_s30 + $0x178] sm:$0xff]  ;;  %v4920_v49 = vld [vmem:[%s4643_s30 + $0x180] sm:$0xff] }
  0xcd   : > { %7556 = vst [vmem:[#allocation53_spill] sm:$0xff] %v4914_v47  ;;  %7557 = vst [vmem:[#allocation54_spill] sm:$0xff] %v4917_v48  ;;  %v4923_v50 = vld [vmem:[%s4643_s30 + $0x188] sm:$0xff]  ;;  %v4926_v51 = vld [vmem:[%s4643_s30 + $0x190] sm:$0xff] }
  0xce   : > { %7558 = vst [vmem:[#allocation55_spill] sm:$0xff] %v4920_v49  ;;  %7559 = vst [vmem:[#allocation56_spill] sm:$0xff] %v4923_v50  ;;  %v4929_v52 = vld [vmem:[%s4643_s30 + $0x198] sm:$0xff]  ;;  %v4932_v53 = vld [vmem:[%s4643_s30 + $0x1a0] sm:$0xff] }
  0xcf   : > { %7560 = vst [vmem:[#allocation57_spill] sm:$0xff] %v4926_v51  ;;  %7561 = vst [vmem:[#allocation58_spill] sm:$0xff] %v4929_v52  ;;  %v4935_v54 = vld [vmem:[%s4643_s30 + $0x1a8] sm:$0xff]  ;;  %v4938_v55 = vld [vmem:[%s4643_s30 + $0x1b0] sm:$0xff] }
  0xd0   : > { %7562 = vst [vmem:[#allocation59_spill] sm:$0xff] %v4932_v53  ;;  %7563 = vst [vmem:[#allocation60_spill] sm:$0xff] %v4935_v54  ;;  %v4941_v56 = vld [vmem:[%s4643_s30 + $0x1b8] sm:$0xff]  ;;  %v4944_v57 = vld [vmem:[%s4643_s30 + $0x1c0] sm:$0xff] }
  0xd1   : > { %7564 = vst [vmem:[#allocation61_spill] sm:$0xff] %v4938_v55  ;;  %7565 = vst [vmem:[#allocation62_spill] sm:$0xff] %v4941_v56  ;;  %v4947_v58 = vld [vmem:[%s4643_s30 + $0x1c8] sm:$0xff]  ;;  %v4950_v59 = vld [vmem:[%s4643_s30 + $0x1d0] sm:$0xff] }
  0xd2   : > { %7566 = vst [vmem:[#allocation63_spill] sm:$0xff] %v4944_v57  ;;  %7567 = vst [vmem:[#allocation64_spill] sm:$0xff] %v4947_v58  ;;  %v4953_v60 = vld [vmem:[%s4643_s30 + $0x1d8] sm:$0xff]  ;;  %v4956_v61 = vld [vmem:[%s4643_s30 + $0x1e0] sm:$0xff] }
  0xd3   : > { %7568 = vst [vmem:[#allocation65_spill] sm:$0xff] %v4950_v59  ;;  %7569 = vst [vmem:[#allocation66_spill] sm:$0xff] %v4953_v60  ;;  %v4959_v62 = vld [vmem:[%s4643_s30 + $0x1e8] sm:$0xff]  ;;  %v4962_v63 = vld [vmem:[%s4643_s30 + $0x1f0] sm:$0xff] }
  0xd4   : > { %7570 = vst [vmem:[#allocation67_spill] sm:$0xff] %v4956_v61  ;;  %7571 = vst [vmem:[#allocation68_spill] sm:$0xff] %v4959_v62  ;;  %v4965_v0 = vld [vmem:[%s4643_s30 + $0x1f8] sm:$0xff]  ;;  %v4968_v58 = vld [vmem:[%s4643_s30 + $0x200] sm:$0xff] }
  0xd5   : > { %7572 = vst [vmem:[#allocation69_spill] sm:$0xff] %v4962_v63  ;;  %7573 = vst [vmem:[#allocation70_spill] sm:$0xff] %v4965_v0  ;;  %v4971_v59 = vld [vmem:[%s4643_s30 + $0x208] sm:$0xff]  ;;  %v4974_v60 = vld [vmem:[%s4643_s30 + $0x210] sm:$0xff] }
  0xd6   : > { %7574 = vst [vmem:[#allocation71_spill] sm:$0xff] %v4968_v58  ;;  %7575 = vst [vmem:[#allocation72_spill] sm:$0xff] %v4971_v59  ;;  %v4977_v61 = vld [vmem:[%s4643_s30 + $0x218] sm:$0xff]  ;;  %v4980_v62 = vld [vmem:[%s4643_s30 + $0x220] sm:$0xff] }
  0xd7   : > { %7576 = vst [vmem:[#allocation73_spill] sm:$0xff] %v4974_v60  ;;  %7577 = vst [vmem:[#allocation74_spill] sm:$0xff] %v4977_v61  ;;  %v4983_v63 = vld [vmem:[%s4643_s30 + $0x228] sm:$0xff]  ;;  %v4986_v0 = vld [vmem:[%s4643_s30 + $0x230] sm:$0xff] }
  0xd8   : > { %7578 = vst [vmem:[#allocation75_spill] sm:$0xff] %v4980_v62  ;;  %7579 = vst [vmem:[#allocation76_spill] sm:$0xff] %v4983_v63  ;;  %v4989_v58 = vld [vmem:[%s4643_s30 + $0x238] sm:$0xff]  ;;  %v4992_v59 = vld [vmem:[%s4643_s30 + $0x240] sm:$0xff] }
  0xd9   : > { %7580 = vst [vmem:[#allocation77_spill] sm:$0xff] %v4986_v0  ;;  %7581 = vst [vmem:[#allocation78_spill] sm:$0xff] %v4989_v58  ;;  %v4995_v60 = vld [vmem:[%s4643_s30 + $0x248] sm:$0xff]  ;;  %v4998_v61 = vld [vmem:[%s4643_s30 + $0x250] sm:$0xff] }
  0xda   : > { %7582 = vst [vmem:[#allocation79_spill] sm:$0xff] %v4992_v59  ;;  %7583 = vst [vmem:[#allocation80_spill] sm:$0xff] %v4995_v60  ;;  %v5001_v62 = vld [vmem:[%s4643_s30 + $0x258] sm:$0xff]  ;;  %v5004_v63 = vld [vmem:[%s4643_s30 + $0x260] sm:$0xff] }
  0xdb   : > { %7584 = vst [vmem:[#allocation81_spill] sm:$0xff] %v4998_v61  ;;  %7585 = vst [vmem:[#allocation82_spill] sm:$0xff] %v5001_v62  ;;  %v5007_v0 = vld [vmem:[%s4643_s30 + $0x268] sm:$0xff]  ;;  %v5010_v58 = vld [vmem:[%s4643_s30 + $0x270] sm:$0xff] }
  0xdc   : > { %7586 = vst [vmem:[#allocation83_spill] sm:$0xff] %v5004_v63  ;;  %7587 = vst [vmem:[#allocation84_spill] sm:$0xff] %v5007_v0  ;;  %v5013_v59 = vld [vmem:[%s4643_s30 + $0x278] sm:$0xff]  ;;  %v5016_v60 = vld [vmem:[%s4643_s30 + $0x280] sm:$0xff] }
  0xdd   : > { %7588 = vst [vmem:[#allocation85_spill] sm:$0xff] %v5010_v58  ;;  %7589 = vst [vmem:[#allocation86_spill] sm:$0xff] %v5013_v59  ;;  %v5019_v61 = vld [vmem:[%s4643_s30 + $0x288] sm:$0xff]  ;;  %v5022_v62 = vld [vmem:[%s4643_s30 + $0x290] sm:$0xff] }
  0xde   : > { %7590 = vst [vmem:[#allocation87_spill] sm:$0xff] %v5016_v60  ;;  %7591 = vst [vmem:[#allocation88_spill] sm:$0xff] %v5019_v61  ;;  %v5025_v63 = vld [vmem:[%s4643_s30 + $0x298] sm:$0xff]  ;;  %v5028_v0 = vld [vmem:[%s4643_s30 + $0x2a0] sm:$0xff] }
  0xdf   : > { %7592 = vst [vmem:[#allocation89_spill] sm:$0xff] %v5022_v62  ;;  %7593 = vst [vmem:[#allocation90_spill] sm:$0xff] %v5025_v63  ;;  %v5031_v58 = vld [vmem:[%s4643_s30 + $0x2a8] sm:$0xff]  ;;  %v5034_v59 = vld [vmem:[%s4643_s30 + $0x2b0] sm:$0xff] }
  0xe0   : > { %7594 = vst [vmem:[#allocation91_spill] sm:$0xff] %v5028_v0  ;;  %7595 = vst [vmem:[#allocation92_spill] sm:$0xff] %v5031_v58  ;;  %v5037_v60 = vld [vmem:[%s4643_s30 + $0x2b8] sm:$0xff]  ;;  %v5040_v61 = vld [vmem:[%s4643_s30 + $0x2c0] sm:$0xff] }
  0xe1   : > { %7596 = vst [vmem:[#allocation93_spill] sm:$0xff] %v5034_v59  ;;  %7597 = vst [vmem:[#allocation94_spill] sm:$0xff] %v5037_v60  ;;  %v5043_v62 = vld [vmem:[%s4643_s30 + $0x2c8] sm:$0xff]  ;;  %v5046_v63 = vld [vmem:[%s4643_s30 + $0x2d0] sm:$0xff] }
  0xe2   : > { %7598 = vst [vmem:[#allocation95_spill] sm:$0xff] %v5040_v61  ;;  %7599 = vst [vmem:[#allocation96_spill] sm:$0xff] %v5043_v62  ;;  %v5049_v0 = vld [vmem:[%s4643_s30 + $0x2d8] sm:$0xff]  ;;  %v5052_v58 = vld [vmem:[%s4643_s30 + $0x2e0] sm:$0xff] }
  0xe3   : > { %7600 = vst [vmem:[#allocation97_spill] sm:$0xff] %v5046_v63  ;;  %7601 = vst [vmem:[#allocation98_spill] sm:$0xff] %v5049_v0  ;;  %v5055_v59 = vld [vmem:[%s4643_s30 + $0x2e8] sm:$0xff]  ;;  %v5058_v60 = vld [vmem:[%s4643_s30 + $0x2f0] sm:$0xff] }
  0xe4   : > { %7602 = vst [vmem:[#allocation99_spill] sm:$0xff] %v5052_v58  ;;  %7603 = vst [vmem:[#allocation100_spill] sm:$0xff] %v5055_v59  ;;  %v5061_v61 = vld [vmem:[%s4643_s30 + $0x2f8] sm:$0xff]  ;;  %v5064_v62 = vld [vmem:[%s4643_s30 + $0x300] sm:$0xff] }
  0xe5   : > { %7604 = vst [vmem:[#allocation101_spill] sm:$0xff] %v5058_v60  ;;  %7605 = vst [vmem:[#allocation102_spill] sm:$0xff] %v5061_v61  ;;  %v5067_v63 = vld [vmem:[%s4643_s30 + $0x308] sm:$0xff]  ;;  %v5070_v0 = vld [vmem:[%s4643_s30 + $0x310] sm:$0xff] }
  0xe6   : > { %7606 = vst [vmem:[#allocation103_spill] sm:$0xff] %v5064_v62  ;;  %7607 = vst [vmem:[#allocation104_spill] sm:$0xff] %v5067_v63  ;;  %v5073_v58 = vld [vmem:[%s4643_s30 + $0x318] sm:$0xff]  ;;  %v5076_v59 = vld [vmem:[%s4643_s30 + $0x320] sm:$0xff] }
  0xe7   : > { %7608 = vst [vmem:[#allocation105_spill] sm:$0xff] %v5070_v0  ;;  %7609 = vst [vmem:[#allocation106_spill] sm:$0xff] %v5073_v58  ;;  %v5079_v60 = vld [vmem:[%s4643_s30 + $0x328] sm:$0xff]  ;;  %v5082_v61 = vld [vmem:[%s4643_s30 + $0x330] sm:$0xff] }
  0xe8   : > { %7610 = vst [vmem:[#allocation107_spill] sm:$0xff] %v5076_v59  ;;  %7611 = vst [vmem:[#allocation108_spill] sm:$0xff] %v5079_v60  ;;  %v5085_v62 = vld [vmem:[%s4643_s30 + $0x338] sm:$0xff]  ;;  %v5088_v63 = vld [vmem:[%s4643_s30 + $0x340] sm:$0xff] }
  0xe9   : > { %7612 = vst [vmem:[#allocation109_spill] sm:$0xff] %v5082_v61  ;;  %7613 = vst [vmem:[#allocation110_spill] sm:$0xff] %v5085_v62  ;;  %v5091_v0 = vld [vmem:[%s4643_s30 + $0x348] sm:$0xff]  ;;  %v5094_v58 = vld [vmem:[%s4643_s30 + $0x350] sm:$0xff] }
  0xea   : > { %7614 = vst [vmem:[#allocation111_spill] sm:$0xff] %v5088_v63  ;;  %7615 = vst [vmem:[#allocation112_spill] sm:$0xff] %v5091_v0  ;;  %v5097_v59 = vld [vmem:[%s4643_s30 + $0x358] sm:$0xff]  ;;  %v5100_v60 = vld [vmem:[%s4643_s30 + $0x360] sm:$0xff] }
  0xeb   : > { %7616 = vst [vmem:[#allocation113_spill] sm:$0xff] %v5094_v58  ;;  %7617 = vst [vmem:[#allocation114_spill] sm:$0xff] %v5097_v59  ;;  %v5103_v61 = vld [vmem:[%s4643_s30 + $0x368] sm:$0xff]  ;;  %v5106_v62 = vld [vmem:[%s4643_s30 + $0x370] sm:$0xff] }
  0xec   : > { %7618 = vst [vmem:[#allocation115_spill] sm:$0xff] %v5100_v60  ;;  %7619 = vst [vmem:[#allocation116_spill] sm:$0xff] %v5103_v61  ;;  %v5109_v63 = vld [vmem:[%s4643_s30 + $0x378] sm:$0xff]  ;;  %v5112_v0 = vld [vmem:[%s4643_s30 + $0x380] sm:$0xff] }
  0xed   : > { %7620 = vst [vmem:[#allocation117_spill] sm:$0xff] %v5106_v62  ;;  %7621 = vst [vmem:[#allocation118_spill] sm:$0xff] %v5109_v63  ;;  %v5115_v57 = vld [vmem:[%s4643_s30 + $0x388] sm:$0xff]  ;;  %v5118_v58 = vld [vmem:[%s4643_s30 + $0x390] sm:$0xff] }
  0xee   : > { %7622 = vst [vmem:[#allocation119_spill] sm:$0xff] %v5112_v0  ;;  %7623 = vst [vmem:[#allocation120_spill] sm:$0xff] %v5115_v57  ;;  %v5121_v59 = vld [vmem:[%s4643_s30 + $0x398] sm:$0xff]  ;;  %v5124_v56 = vld [vmem:[%s4643_s30 + $0x3a0] sm:$0xff] }
  0xef   : > { %7624 = vst [vmem:[#allocation121_spill] sm:$0xff] %v5118_v58  ;;  %7625 = vst [vmem:[#allocation122_spill] sm:$0xff] %v5121_v59  ;;  %v5127_v60 = vld [vmem:[%s4643_s30 + $0x3a8] sm:$0xff]  ;;  %v5130_v61 = vld [vmem:[%s4643_s30 + $0x3b0] sm:$0xff] }
  0xf0   : > { %7626 = vst [vmem:[#allocation123_spill] sm:$0xff] %v5124_v56  ;;  %7627 = vst [vmem:[#allocation124_spill] sm:$0xff] %v5127_v60  ;;  %v5133_v55 = vld [vmem:[%s4643_s30 + $0x3b8] sm:$0xff]  ;;  %v5136_v62 = vld [vmem:[%s4643_s30 + $0x3c0] sm:$0xff] }
  0xf1   : > { %7628 = vst [vmem:[#allocation125_spill] sm:$0xff] %v5130_v61  ;;  %7629 = vst [vmem:[#allocation126_spill] sm:$0xff] %v5133_v55  ;;  %v5139_v63 = vld [vmem:[%s4643_s30 + $0x3c8] sm:$0xff]  ;;  %v5142_v54 = vld [vmem:[%s4643_s30 + $0x3d0] sm:$0xff]  ;;  %939 = sbr.rel (%p4025_p4) target bundleno = 476 (0x1dc), region = 70 }
  0xf2   : > { %7630 = vst [vmem:[#allocation127_spill] sm:$0xff] %v5136_v62  ;;  %7631 = vst [vmem:[#allocation128_spill] sm:$0xff] %v5139_v63  ;;  %v5145_v0 = vld [vmem:[%s4643_s30 + $0x3d8] sm:$0xff]  ;;  %v5148_v57 = vld [vmem:[%s4643_s30 + $0x3e0] sm:$0xff] }
  0xf3   : > { %7632 = vst [vmem:[#allocation129_spill] sm:$0xff] %v5142_v54  ;;  %7633 = vst [vmem:[#allocation130_spill] sm:$0xff] %v5145_v0  ;;  %v5151_v58 = vld [vmem:[%s4643_s30 + $0x3e8] sm:$0xff]  ;;  %v5154_v59 = vld [vmem:[%s4643_s30 + $0x3f0] sm:$0xff] }
  0xf4   : > { %7634 = vst [vmem:[#allocation131_spill] sm:$0xff] %v5148_v57  ;;  %7635 = vst [vmem:[#allocation132_spill] sm:$0xff] %v5151_v58  ;;  %v5157_v56 = vld [vmem:[%s4643_s30 + $0x3f8] sm:$0xff] }
  0xf5   : > { %7636 = vst [vmem:[#allocation133_spill] sm:$0xff] %v5154_v59  ;;  %7637 = vst [vmem:[#allocation134_spill] sm:$0xff] %v5157_v56 }
  0xf6   : > { %v940_v62 = vlaneseq  ;;  %s4026_s9 = sshll.u32 %s4246_s11, 7 }
  0xf7   : > { %v943_v63 = vstv %s4026_s9 }
  0xf8   : > { %v941_v54 = vand.u32 127, %v940_v62 }
  0xfa   : > { %v5163_v55 = vadd.s32 %v943_v63, %v941_v54 }
  0xfc   : > { %vm945_vm0 = vcmp.lt.s32.totalorder %v5163_v55, 320 }
  0xfd   : > { %v5169_v59 = vsel %vm945_vm0, %v4776_v1, 0.0  ;;  %v5174_v56 = vsel %vm945_vm0, %v4779_v2, 0.0  ;;  %v5179_v58 = vsel %vm945_vm0, %v4782_v3, 0.0  ;;  %v5188_v63 = vsel %vm945_vm0, %v4785_v4, 0.0 }
  0xfe   : > { %v1074_v54 = vmul.f32 %v5169_v59, %v5169_v59  ;;  %v1075_v62 = vmul.f32 %v5174_v56, %v5174_v56  ;;  %v1076_v2 = vmul.f32 %v5179_v58, %v5179_v58  ;;  %v5195_v1 = vsel %vm945_vm0, %v4788_v5, 0.0 }
  0xff   : > { %v1077_v3 = vmul.f32 %v5188_v63, %v5188_v63  ;;  %v5202_v0 = vsel %vm945_vm0, %v4791_v6, 0.0  ;;  %v5207_v4 = vsel %vm945_vm0, %v4794_v7, 0.0  ;;  %v5212_v61 = vsel %vm945_vm0, %v4797_v8, 0.0 }
 0x100   : > { %v1202_v57 = vadd.f32 %v1075_v62, %v1074_v54  ;;  %7638 = vst [vmem:[#allocation135_spill] sm:$0xff] %v5207_v4  ;;  %7639 = vst [vmem:[#allocation136_spill] sm:$0xff] %v5212_v61  ;;  %v1078_v5 = vmul.f32 %v5195_v1, %v5195_v1  ;;  %v5219_v54 = vsel %vm945_vm0, %v4824_v17, 0.0  ;;  %v5224_v62 = vsel %vm945_vm0, %v4827_v18, 0.0 }
 0x101   : > { %7640 = vst [vmem:[#allocation137_spill] sm:$0xff] %v5219_v54  ;;  %7641 = vst [vmem:[#allocation138_spill] sm:$0xff] %v5224_v62  ;;  %v5229_v7 = vsel %vm945_vm0, %v4800_v9, 0.0  ;;  %v5234_v8 = vsel %vm945_vm0, %v4803_v10, 0.0  ;;  %v5249_v9 = vsel %vm945_vm0, %v4812_v13, 0.0  ;;  %v1079_v6 = vmul.f32 %v5202_v0, %v5202_v0 }
 0x102   : > { %v1203_v60 = vadd.f32 %v1202_v57, %v1076_v2  ;;  %7642 = vst [vmem:[#allocation139_spill] sm:$0xff] %v5229_v7  ;;  %7643 = vst [vmem:[#allocation140_spill] sm:$0xff] %v5234_v8  ;;  %v5239_v2 = vsel %vm945_vm0, %v4806_v11, 0.0  ;;  %v5244_v57 = vsel %vm945_vm0, %v4809_v12, 0.0  ;;  %v5256_v18 = vsel %vm945_vm0, %v4830_v19, 0.0 }
 0x103   : > { %7644 = vst [vmem:[#allocation141_spill] sm:$0xff] %v5239_v2  ;;  %7645 = vst [vmem:[#allocation142_spill] sm:$0xff] %v5256_v18  ;;  %v5261_v11 = vsel %vm945_vm0, %v4815_v14, 0.0  ;;  %v5266_v12 = vsel %vm945_vm0, %v4818_v15, 0.0  ;;  %v1090_v13 = vmul.f32 %v5219_v54, %v5219_v54  ;;  %v1080_v14 = vmul.f32 %v5207_v4, %v5207_v4 }
 0x104   : > { %v1204_v10 = vadd.f32 %v1203_v60, %v1077_v3  ;;  %7646 = vst [vmem:[#allocation143_spill] sm:$0xff] %v5261_v11  ;;  %v1091_v3 = vmul.f32 %v5224_v62, %v5224_v62  ;;  %v5275_v60 = vsel %vm945_vm0, %v4821_v16, 0.0  ;;  %v5282_v15 = vsel %vm945_vm0, %v4833_v20, 0.0 }
 0x105   : > { %7647 = vst [vmem:[#allocation144_spill] sm:$0xff] %v5282_v15  ;;  %v1081_v17 = vmul.f32 %v5212_v61, %v5212_v61  ;;  %v1082_v62 = vmul.f32 %v5229_v7, %v5229_v7  ;;  %v1083_v54 = vmul.f32 %v5234_v8, %v5234_v8  ;;  %v1092_v16 = vmul.f32 %v5256_v18, %v5256_v18 }
 0x106   : > { %v1205_v19 = vadd.f32 %v1204_v10, %v1078_v5  ;;  %v1084_v5 = vmul.f32 %v5239_v2, %v5239_v2  ;;  %v1085_v10 = vmul.f32 %v5244_v57, %v5244_v57  ;;  %v5299_v61 = vsel %vm945_vm0, %v4836_v21, 0.0 }
 0x107   : > { %v1086_v7 = vmul.f32 %v5249_v9, %v5249_v9  ;;  %v1087_v8 = vmul.f32 %v5261_v11, %v5261_v11  ;;  %v1093_v18 = vmul.f32 %v5282_v15, %v5282_v15  ;;  %v1223_v4 = vadd.f32 %v1091_v3, %v1090_v13 }
 0x108   : > { %v1206_v20 = vadd.f32 %v1205_v19, %v1079_v6  ;;  %v5309_v2 = vmul.f32 %v5266_v12, %v5266_v12  ;;  %v5313_v6 = vmul.f32 %v5275_v60, %v5275_v60  ;;  %v5318_v21 = vsel %vm945_vm0, %v4839_v22, 0.0 }
 0x109   : > { %v5323_v11 = vsel %vm945_vm0, %v4842_v23, 0.0  ;;  %v5328_v13 = vsel %vm945_vm0, %v4845_v24, 0.0  ;;  %v1094_v3 = vmul.f32 %v5299_v61, %v5299_v61  ;;  %v1224_v15 = vadd.f32 %v1223_v4, %v1092_v16 }
 0x10a   : > { %v1207_v19 = vadd.f32 %v1206_v20, %v1080_v14  ;;  %v5335_v20 = vsel %vm945_vm0, %v4848_v25, 0.0  ;;  %v5340_v23 = vsel %vm945_vm0, %v4851_v26, 0.0  ;;  %v5345_v24 = vsel %vm945_vm0, %v4854_v27, 0.0 }
 0x10b   : > { %v1095_v22 = vmul.f32 %v5318_v21, %v5318_v21  ;;  %v1225_v4 = vadd.f32 %v1224_v15, %v1093_v18  ;;  %v5352_v16 = vsel %vm945_vm0, %v4872_v33, 0.0  ;;  %v5362_v27 = vsel %vm945_vm0, %v4857_v28, 0.0 }
 0x10c   : > { %v1208_v14 = vadd.f32 %v1207_v19, %v1081_v17  ;;  %7648 = vst [vmem:[#allocation145_spill] sm:$0xff] %v5352_v16  ;;  %v5357_v17 = vsel %vm945_vm0, %v4875_v34, 0.0  ;;  %7650 = vst [vmem:[#allocation147_spill] sm:$0xff] %v5362_v27  ;;  %v5367_v15 = vsel %vm945_vm0, %v4860_v29, 0.0  ;;  %v5372_v18 = vsel %vm945_vm0, %v4863_v30, 0.0 }
 0x10d   : > { %7649 = vst [vmem:[#allocation146_spill] sm:$0xff] %v5357_v17  ;;  %7651 = vst [vmem:[#allocation148_spill] sm:$0xff] %v5367_v15  ;;  %v5377_v26 = vsel %vm945_vm0, %v4866_v31, 0.0  ;;  %v5384_v28 = vsel %vm945_vm0, %v4878_v35, 0.0  ;;  %v5389_v30 = vsel %vm945_vm0, %v4869_v32, 0.0  ;;  %v1106_v25 = vmul.f32 %v5352_v16, %v5352_v16 }
 0x10e   : > { %v1209_v19 = vadd.f32 %v1208_v14, %v1082_v62  ;;  %v1096_v62 = vmul.f32 %v5323_v11, %v5323_v11  ;;  %v1226_v14 = vadd.f32 %v1225_v4, %v1094_v3  ;;  %7652 = vst [vmem:[#allocation149_spill] sm:$0xff] %v5384_v28  ;;  %v1107_v31 = vmul.f32 %v5357_v17, %v5357_v17 }
 0x10f   : > { %v1097_v3 = vmul.f32 %v5328_v13, %v5328_v13  ;;  %v1098_v4 = vmul.f32 %v5335_v20, %v5335_v20  ;;  %v1099_v32 = vmul.f32 %v5340_v23, %v5340_v23  ;;  %v1100_v34 = vmul.f32 %v5345_v24, %v5345_v24 }
 0x110   : > { %v1210_v29 = vadd.f32 %v1209_v19, %v1083_v54  ;;  %v1227_v35 = vadd.f32 %v1226_v14, %v1095_v22  ;;  %v5402_v54 = vsel %vm945_vm0, %v4881_v36, 0.0  ;;  %v1108_v33 = vmul.f32 %v5384_v28, %v5384_v28 }
 0x111   : > { %7653 = vst [vmem:[#allocation150_spill] sm:$0xff] %v5402_v54  ;;  %v1101_v17 = vmul.f32 %v5362_v27, %v5362_v27  ;;  %v1102_v22 = vmul.f32 %v5367_v15, %v5367_v15  ;;  %v1103_v36 = vmul.f32 %v5372_v18, %v5372_v18  ;;  %v1109_v16 = vmul.f32 %v5402_v54, %v5402_v54  ;;  %v1526_v54 = vld [vmem:[#allocation2 + $0x320] sm:$0xff] }
 0x112   : > { %v1211_v19 = vadd.f32 %v1210_v29, %v1084_v5  ;;  %v1228_v14 = vadd.f32 %v1227_v35, %v1096_v62  ;;  %v5417_v29 = vsel %vm945_vm0, %v4884_v37, 0.0  ;;  %v1244_v28 = vadd.f32 %v1107_v31, %v1106_v25 }
 0x113   : > { %7654 = vst [vmem:[#allocation151_spill] sm:$0xff] %v5417_v29  ;;  %v1104_v27 = vmul.f32 %v5377_v26, %v5377_v26  ;;  %v5427_v15 = vmul.f32 %v5389_v30, %v5389_v30  ;;  %v5432_v62 = vsel %vm945_vm0, %v4887_v38, 0.0  ;;  %v1110_v25 = vmul.f32 %v5417_v29, %v5417_v29  ;;  %v7671_v38 = vld [vmem:[#allocation60_spill] sm:$0xff] }
 0x114   : > { %v1212_v5 = vadd.f32 %v1211_v19, %v1085_v10  ;;  %v1229_v35 = vadd.f32 %v1228_v14, %v1097_v3  ;;  %7655 = vst [vmem:[#allocation152_spill] sm:$0xff] %v5432_v62  ;;  %v5437_v19 = vsel %vm945_vm0, %v4890_v39, 0.0  ;;  %v1245_v31 = vadd.f32 %v1244_v28, %v1108_v33  ;;  %v1525_v29 = vld [vmem:[#allocation2 + $0x98] sm:$0xff] }
 0x115   : > { %7656 = vst [vmem:[#allocation153_spill] sm:$0xff] %v5437_v19  ;;  %v5444_v3 = vsel %vm945_vm0, %v4893_v40, 0.0  ;;  %v5449_v14 = vsel %vm945_vm0, %v4896_v41, 0.0  ;;  %v5459_v28 = vsel %vm945_vm0, %v4902_v43, 0.0  ;;  %v1111_v33 = vmul.f32 %v5432_v62, %v5432_v62  ;;  %v1524_v62 = vld [vmem:[#allocation2 + $0x118] sm:$0xff] }
 0x116   : > { %v1213_v10 = vadd.f32 %v1212_v5, %v1086_v7  ;;  %v1230_v37 = vadd.f32 %v1229_v35, %v1098_v4  ;;  %7657 = vst [vmem:[#allocation154_spill] sm:$0xff] %v5444_v3  ;;  %7658 = vst [vmem:[#allocation155_spill] sm:$0xff] %v5449_v14  ;;  %v5454_v7 = vsel %vm945_vm0, %v4899_v42, 0.0  ;;  %v1246_v4 = vadd.f32 %v1245_v31, %v1109_v16 }
 0x117   : > { %7659 = vst [vmem:[#allocation156_spill] sm:$0xff] %v5454_v7  ;;  %7660 = vst [vmem:[#allocation157_spill] sm:$0xff] %v5459_v28  ;;  %v5466_v41 = vsel %vm945_vm0, %v4905_v44, 0.0  ;;  %v5471_v42 = vsel %vm945_vm0, %v4908_v45, 0.0  ;;  %v5489_v31 = vsel %vm945_vm0, %v4911_v46, 0.0 }
 0x118   : > { %v1214_v5 = vadd.f32 %v1213_v10, %v1087_v8  ;;  %v1231_v35 = vadd.f32 %v1230_v37, %v1099_v32  ;;  %7661 = vst [vmem:[#allocation158_spill] sm:$0xff] %v5466_v41  ;;  %7662 = vst [vmem:[#allocation159_spill] sm:$0xff] %v5471_v42  ;;  %v1112_v8 = vmul.f32 %v5437_v19, %v5437_v19  ;;  %v5479_v32 = vsel %vm945_vm0, %v4920_v49, 0.0 }
 0x119   : > { %v1247_v43 = vadd.f32 %v1246_v4, %v1110_v25  ;;  %7663 = vst [vmem:[#allocation160_spill] sm:$0xff] %v5479_v32  ;;  %v5484_v37 = vsel %vm945_vm0, %v4923_v50, 0.0  ;;  %7665 = vst [vmem:[#allocation162_spill] sm:$0xff] %v5489_v31  ;;  %v5499_v25 = vsel %vm945_vm0, %v4917_v48, 0.0  ;;  %v1122_v45 = vmul.f32 %v5479_v32, %v5479_v32  ;;  %v7687_v32 = vld [vmem:[#allocation71_spill] sm:$0xff] }
 0x11a   : > { %v1215_v10 = vadd.f32 %v1214_v5, %v5309_v2  ;;  %7664 = vst [vmem:[#allocation161_spill] sm:$0xff] %v5484_v37  ;;  %v1232_v16 = vadd.f32 %v1231_v35, %v1100_v34  ;;  %v5494_v2 = vsel %vm945_vm0, %v4914_v47, 0.0  ;;  %7667 = vst [vmem:[#allocation164_spill] sm:$0xff] %v5499_v25  ;;  %v1113_v34 = vmul.f32 %v5444_v3, %v5444_v3 }
 0x11b   : > { %7666 = vst [vmem:[#allocation163_spill] sm:$0xff] %v5494_v2  ;;  %v1248_v4 = vadd.f32 %v1247_v43, %v1111_v33  ;;  %v5507_v35 = vsel %vm945_vm0, %v4926_v51, 0.0  ;;  %v1114_v47 = vmul.f32 %v5449_v14, %v5449_v14  ;;  %v1123_v48 = vmul.f32 %v5484_v37, %v5484_v37  ;;  %v1523_v14 = vld [vmem:[#allocation2 + $0x110] sm:$0xff] }
 0x11c   : > { %v1216_v5 = vadd.f32 %v1215_v10, %v5313_v6  ;;  %7668 = vst [vmem:[#allocation165_spill] sm:$0xff] %v5507_v35  ;;  %v1233_v46 = vadd.f32 %v1232_v16, %v1101_v17  ;;  %v1115_v10 = vmul.f32 %v5454_v7, %v5454_v7  ;;  %v5520_v33 = vsel %vm945_vm0, %v4929_v52, 0.0 }
 0x11d   : > { %v1249_v43 = vadd.f32 %v1248_v4, %v1112_v8  ;;  %7669 = vst [vmem:[#allocation166_spill] sm:$0xff] %v5520_v33  ;;  %v1116_v16 = vmul.f32 %v5459_v28, %v5459_v28  ;;  %v1117_v44 = vmul.f32 %v5466_v41, %v5466_v41  ;;  %v1124_v51 = vmul.f32 %v5507_v35, %v5507_v35 }
 0x11e   : > { %v1217_v6 = vrot.slane %v1216_v5, 4  ;;  %v1234_v17 = vadd.f32 %v1233_v46, %v1102_v22  ;;  %v1118_v39 = vmul.f32 %v5471_v42, %v5471_v42  ;;  %v5533_v4 = vsel %vm945_vm0, %v4932_v53, 0.0  ;;  %v7720_v42 = vld [vmem:[#allocation136_spill] sm:$0xff] }
 0x11f   : > { %v1250_v8 = vadd.f32 %v1249_v43, %v1113_v34  ;;  %7670 = vst [vmem:[#allocation167_spill] sm:$0xff] %v5533_v4  ;;  %v1119_v22 = vmul.f32 %v5489_v31, %v5489_v31  ;;  %v1125_v52 = vmul.f32 %v5520_v33, %v5520_v33  ;;  %v1265_v50 = vadd.f32 %v1123_v48, %v1122_v45  ;;  %v7673_v48 = vld [vmem:[#allocation61_spill] sm:$0xff]  ;;  %v1519_v31 = vld [vmem:[#allocation2 + $0x368] sm:$0xff] }
 0x120   : > { %v1218_v40 = vadd.f32 %v1217_v6, %v1216_v5  ;;  %v1235_v46 = vadd.f32 %v1234_v17, %v1103_v36  ;;  %v1120_v5 = vmul.f32 %v5494_v2, %v5494_v2  ;;  %v5544_v34 = vsel %vm945_vm0, %v7671_v38, 0.0 }
 0x121   : > { %v1251_v6 = vadd.f32 %v1250_v8, %v1114_v47  ;;  %7672 = vst [vmem:[#allocation168_spill] sm:$0xff] %v5544_v34  ;;  %v1121_v36 = vmul.f32 %v5499_v25, %v5499_v25  ;;  %v1126_v17 = vmul.f32 %v5533_v4, %v5533_v4  ;;  %v1266_v53 = vadd.f32 %v1265_v50, %v1124_v51  ;;  %v7675_v47 = vld [vmem:[#allocation62_spill] sm:$0xff]  ;;  %v7677_v8 = vld [vmem:[#allocation63_spill] sm:$0xff]  ;;  %v7689_v25 = vld [vmem:[#allocation72_spill] sm:$0xff] }
 0x122   : > { %v1219_v49 = vrot.slane %v1218_v40, 2  ;;  %v1236_v43 = vadd.f32 %v1235_v46, %v1104_v27  ;;  %v5553_v35 = vsel %vm945_vm0, %v7673_v48, 0.0  ;;  %v5558_v38 = vsel %vm945_vm0, %v7675_v47, 0.0  ;;  %v7681_v48 = vld [vmem:[#allocation65_spill] sm:$0xff]  ;;  %v7683_v47 = vld [vmem:[#allocation66_spill] sm:$0xff] }
 0x123   : > { %v1252_v45 = vadd.f32 %v1251_v6, %v1115_v10  ;;  %7674 = vst [vmem:[#allocation169_spill] sm:$0xff] %v5553_v35  ;;  %7676 = vst [vmem:[#allocation170_spill] sm:$0xff] %v5558_v38  ;;  %v5564_v46 = vsel %vm945_vm0, %v7677_v8, 0.0  ;;  %v7679_v10 = vld [vmem:[#allocation64_spill] sm:$0xff]  ;;  %v5581_v8 = vsel %vm945_vm0, %v7683_v47, 0.0  ;;  %v5595_v47 = vsel %vm945_vm0, %v7687_v32, 0.0 }
 0x124   : > { %v1220_v33 = vadd.f32 %v1219_v49, %v1218_v40  ;;  %v1237_v27 = vadd.f32 %v1236_v43, %v5427_v15  ;;  %7678 = vst [vmem:[#allocation171_spill] sm:$0xff] %v5564_v46  ;;  %v1127_v40 = vmul.f32 %v5544_v34, %v5544_v34  ;;  %v1267_v49 = vadd.f32 %v1266_v53, %v1125_v52  ;;  %v7685_v34 = vld [vmem:[#allocation67_spill] sm:$0xff] }
 0x125   : > { %v1253_v51 = vadd.f32 %v1252_v45, %v1116_v16  ;;  %v5571_v6 = vsel %vm945_vm0, %v7679_v10, 0.0  ;;  %v5576_v15 = vsel %vm945_vm0, %v7681_v48, 0.0  ;;  %7684 = vst [vmem:[#allocation174_spill] sm:$0xff] %v5581_v8  ;;  %v1128_v52 = vmul.f32 %v5553_v35, %v5553_v35  ;;  %7688 = vst [vmem:[#allocation176_spill] sm:$0xff] %v5595_v47 }
 0x126   : > { %v1221_v50 = vrot.slane %v1220_v33, 1  ;;  %7680 = vst [vmem:[#allocation172_spill] sm:$0xff] %v5571_v6  ;;  %7682 = vst [vmem:[#allocation173_spill] sm:$0xff] %v5576_v15  ;;  %v1238_v43 = vrot.slane %v1237_v27, 4  ;;  %v1268_v53 = vadd.f32 %v1267_v49, %v1126_v17  ;;  %v5588_v10 = vsel %vm945_vm0, %v7685_v34, 0.0  ;;  %v7691_v49 = vld [vmem:[#allocation68_spill] sm:$0xff] }
 0x127   : > { %v1254_v45 = vadd.f32 %v1253_v51, %v1117_v44  ;;  %7686 = vst [vmem:[#allocation175_spill] sm:$0xff] %v5588_v10  ;;  %v1129_v48 = vmul.f32 %v5558_v38, %v5558_v38  ;;  %v5605_v34 = vsel %vm945_vm0, %v7691_v49, 0.0  ;;  %v1130_v32 = vmul.f32 %v5564_v46, %v5564_v46  ;;  %v7697_v46 = vld [vmem:[#allocation74_spill] sm:$0xff] }
 0x128   : > { %v1222_v16 = vadd.f32 %v1221_v50, %v1220_v33  ;;  %v1239_v4 = vadd.f32 %v1238_v43, %v1237_v27  ;;  %v1269_v37 = vadd.f32 %v1268_v53, %v1127_v40  ;;  %v5600_v33 = vsel %vm945_vm0, %v7689_v25, 0.0  ;;  %7692 = vst [vmem:[#allocation178_spill] sm:$0xff] %v5605_v34  ;;  %v7693_v50 = vld [vmem:[#allocation69_spill] sm:$0xff] }
 0x129   : > { %7690 = vst [vmem:[#allocation177_spill] sm:$0xff] %v5600_v33  ;;  %v1255_v17 = vadd.f32 %v1254_v45, %v1118_v39  ;;  %v5610_v27 = vsel %vm945_vm0, %v7693_v50, 0.0  ;;  %v7695_v43 = vld [vmem:[#allocation73_spill] sm:$0xff]  ;;  %v1138_v53 = vmul.f32 %v5595_v47, %v5595_v47  ;;  %v1131_v49 = vmul.f32 %v5571_v6, %v5571_v6  ;;  %v7718_v6 = vld [vmem:[#allocation90_spill] sm:$0xff] }
 0x12a   : > { %v1370_v44 = vmax.f32 %v1222_v16, 1e-24  ;;  %7694 = vst [vmem:[#allocation179_spill] sm:$0xff] %v5610_v27  ;;  %v1240_v40 = vrot.slane %v1239_v4, 2  ;;  %v1270_v51 = vadd.f32 %v1269_v37, %v1128_v52  ;;  %v5617_v25 = vsel %vm945_vm0, %v7695_v43, 0.0  ;;  %v7699_v43 = vld [vmem:[#allocation70_spill] sm:$0xff] }
 0x12b   : > { %7696 = vst [vmem:[#allocation180_spill] sm:$0xff] %v5617_v25  ;;  %v1256_v39 = vadd.f32 %v1255_v17, %v1119_v22  ;;  %v1139_v16 = vmul.f32 %v5600_v33, %v5600_v33  ;;  %v5628_v37 = vsel %vm945_vm0, %v7697_v46, 0.0  ;;  %v5633_v22 = vsel %vm945_vm0, %v7699_v43, 0.0 }
 0x12c   : > { %4122 = vrsqrt.f32 %v1370_v44  ;;  %v1241_v45 = vadd.f32 %v1240_v40, %v1239_v4  ;;  %v1271_v50 = vadd.f32 %v1270_v51, %v1129_v48  ;;  %7698 = vst [vmem:[#allocation181_spill] sm:$0xff] %v5628_v37  ;;  %7700 = vst [vmem:[#allocation182_spill] sm:$0xff] %v5633_v22  ;;  %v1132_v44 = vmul.f32 %v5576_v15, %v5576_v15  ;;  %v7701_v51 = vld [vmem:[#allocation75_spill] sm:$0xff] }
 0x12d   : > { %v1257_v52 = vadd.f32 %v1256_v39, %v1120_v5  ;;  %v1140_v4 = vmul.f32 %v5617_v25, %v5617_v25  ;;  %v1133_v48 = vmul.f32 %v5581_v8, %v5581_v8  ;;  %v5644_v5 = vsel %vm945_vm0, %v7701_v51, 0.0  ;;  %v7703_v51 = vld [vmem:[#allocation76_spill] sm:$0xff] }
 0x12e   : > { %v1242_v17 = vrot.slane %v1241_v45, 1  ;;  %v1272_v40 = vadd.f32 %v1271_v50, %v1130_v32  ;;  %7702 = vst [vmem:[#allocation183_spill] sm:$0xff] %v5644_v5  ;;  %v1134_v39 = vmul.f32 %v5588_v10, %v5588_v10  ;;  %v1141_v43 = vmul.f32 %v5628_v37, %v5628_v37 }
 0x12f   : > { %v1258_v46 = vadd.f32 %v1257_v52, %v1121_v36  ;;  %v1286_v33 = vadd.f32 %v1139_v16, %v1138_v53  ;;  %v1135_v25 = vmul.f32 %v5605_v34, %v5605_v34  ;;  %v5654_v32 = vmul.f32 %v5610_v27, %v5610_v27  ;;  %v7707_v27 = vld [vmem:[#allocation78_spill] sm:$0xff]  ;;  %v7709_v34 = vld [vmem:[#allocation79_spill] sm:$0xff] }
 0x130   : > { %v1243_v47 = vadd.f32 %v1242_v17, %v1241_v45  ;;  %v1273_v50 = vadd.f32 %v1272_v40, %v1131_v49  ;;  %v5659_v36 = vsel %vm945_vm0, %v7703_v51, 0.0  ;;  %v1142_v52 = vmul.f32 %v5644_v5, %v5644_v5  ;;  %v7705_v17 = vld [vmem:[#allocation77_spill] sm:$0xff]  ;;  %v7714_v5 = vld [vmem:[#allocation82_spill] sm:$0xff] }
 0x131   : > { %v1259_v8 = vrot.slane %v1258_v46, 4  ;;  %7704 = vst [vmem:[#allocation184_spill] sm:$0xff] %v5659_v36  ;;  %v1287_v37 = vadd.f32 %v1286_v33, %v1140_v4  ;;  %v5665_v16 = vmul.f32 %v5633_v22, %v5633_v22  ;;  %v5670_v49 = vsel %vm945_vm0, %v7705_v17, 0.0  ;;  %v7713_v17 = vld [vmem:[#allocation81_spill] sm:$0xff]  ;;  %v1517_v22 = vld [vmem:[#allocation2 + $0x18] sm:$0xff] }
 0x132   : > { %v1371_v53 = vmax.f32 %v1243_v47, 1e-24  ;;  %v1274_v45 = vadd.f32 %v1273_v50, %v1132_v44  ;;  %7706 = vst [vmem:[#allocation185_spill] sm:$0xff] %v5670_v49  ;;  %v5675_v51 = vsel %vm945_vm0, %v7707_v27, 0.0  ;;  %v5680_v47 = vsel %vm945_vm0, %v7709_v34, 0.0  ;;  %v7711_v44 = vld [vmem:[#allocation80_spill] sm:$0xff] }
 0x133   : > { %v1260_v40 = vadd.f32 %v1259_v8, %v1258_v46  ;;  %7708 = vst [vmem:[#allocation186_spill] sm:$0xff] %v5675_v51  ;;  %7710 = vst [vmem:[#allocation187_spill] sm:$0xff] %v5680_v47  ;;  %v1288_v33 = vadd.f32 %v1287_v37, %v1141_v43  ;;  %v5685_v50 = vsel %vm945_vm0, %v7711_v44, 0.0  ;;  %v1143_v8 = vmul.f32 %v5659_v36, %v5659_v36  ;;  %v1514_v44 = vld [vmem:[#allocation2 + $0x2b0] sm:$0xff]  ;;  %v1516_v36 = vld [vmem:[#allocation2 + $0xd8] sm:$0xff] }
 0x134   : > { %4124 = vrsqrt.f32 %v1371_v53  ;;  %v1275_v4 = vadd.f32 %v1274_v45, %v1133_v48  ;;  %7712 = vst [vmem:[#allocation188_spill] sm:$0xff] %v5685_v50  ;;  %v5692_v27 = vsel %vm945_vm0, %v7713_v17, 0.0  ;;  %v5697_v34 = vsel %vm945_vm0, %v7714_v5, 0.0  ;;  %v1515_v17 = vld [vmem:[#allocation2 + $0x3b0] sm:$0xff] }
 0x135   : > { %v1261_v46 = vrot.slane %v1260_v40, 2  ;;  %v1289_v37 = vadd.f32 %v1288_v33, %v1142_v52  ;;  %v5701_v43 = vmul.f32 %v5670_v49, %v5670_v49  ;;  %v5705_v53 = vmul.f32 %v5675_v51, %v5675_v51  ;;  %v7715_v52 = vld [vmem:[#allocation87_spill] sm:$0xff]  ;;  %v7716_v33 = vld [vmem:[#allocation88_spill] sm:$0xff]  ;;  %v7717_v51 = vld [vmem:[#allocation89_spill] sm:$0xff] }
 0x136   : > { %v1276_v48 = vadd.f32 %v1275_v4, %v1134_v39  ;;  %v5709_v45 = vmul.f32 %v5680_v47, %v5680_v47  ;;  %v5713_v5 = vmul.f32 %v5685_v50, %v5685_v50  ;;  %v5718_v39 = vsel %vm945_vm0, %v7715_v52, 0.0  ;;  %v1518_v50 = vld [vmem:[#allocation2 + $0x50] sm:$0xff] }
 0x137   : > { %v5723_v4 = vsel %vm945_vm0, %v7716_v33, 0.0  ;;  %v5728_v47 = vsel %vm945_vm0, %v7717_v51, 0.0  ;;  %v5730_v10 = vadd.f32 %v1261_v46, %v1260_v40  ;;  %v5734_v52 = vadd.f32 %v1289_v37, %v1143_v8  ;;  %v1520_v40 = vld [vmem:[#allocation2 + $0x330] sm:$0xff]  ;;  %v1521_v46 = vld [vmem:[#allocation2 + $0x48] sm:$0xff] }
 0x138   : > { %v5732_v15 = vadd.f32 %v1276_v48, %v1135_v25  ;;  %v5739_v33 = vsel %vm945_vm0, %v7718_v6, 0.0  ;;  %v7719_v37 = vld [vmem:[#allocation135_spill] sm:$0xff] }
 0x139   : > { %v4123_v49 = vpop.eup %4122 }
 0x13a   : > { %v1386_v38 = vmul.f32 %v4123_v49, %v5169_v59  ;;  %v1387_v51 = vmul.f32 %v4123_v49, %v5174_v56  ;;  %v1388_v35 = vmul.f32 %v4123_v49, %v5179_v58  ;;  %v1389_v2 = vmul.f32 %v4123_v49, %v5188_v63  ;;  %v1522_v56 = vld [vmem:[#allocation2 + $0x380] sm:$0xff] }
 0x13b   : > { %v1390_v25 = vmul.f32 %v4123_v49, %v5195_v1  ;;  %v1391_v8 = vmul.f32 %v4123_v49, %v5202_v0  ;;  %v1392_v48 = vmul.f32 %v4123_v49, %v7719_v37  ;;  %v1393_v6 = vmul.f32 %v4123_v49, %v7720_v42  ;;  %v7721_v1 = vld [vmem:[#allocation139_spill] sm:$0xff]  ;;  %v7722_v42 = vld [vmem:[#allocation140_spill] sm:$0xff] }
 0x13c   : > { %v1642_v41 = vadd.f32 %v1514_v44, %v1386_v38  ;;  %v1643_v28 = vadd.f32 %v1515_v17, %v1387_v51  ;;  %v1644_v59 = vadd.f32 %v1516_v36, %v1388_v35  ;;  %v1645_v7 = vadd.f32 %v1517_v22, %v1389_v2  ;;  %v7723_v44 = vld [vmem:[#allocation141_spill] sm:$0xff]  ;;  %v1527_v22 = vld [vmem:[#allocation2 + $0x150] sm:$0xff]  ;;  %v1528_v36 = vld [vmem:[#allocation2 + $0x108] sm:$0xff] }
 0x13d   : > { %v1646_v58 = vadd.f32 %v1518_v50, %v1390_v25  ;;  %v1647_v3 = vadd.f32 %v1519_v31, %v1391_v8  ;;  %v1648_v63 = vadd.f32 %v1520_v40, %v1392_v48  ;;  %v1649_v19 = vadd.f32 %v1521_v46, %v1393_v6  ;;  %v1529_v31 = vld [vmem:[#allocation2 + $0x60] sm:$0xff] }
 0x13e   : > { %1770 = vst [vmem:[#allocation2 + $0x2b0] sm:$0xff] %v1642_v41  ;;  %1771 = vst [vmem:[#allocation2 + $0x3b0] sm:$0xff] %v1643_v28  ;;  %v1394_v0 = vmul.f32 %v4123_v49, %v7721_v1  ;;  %v1395_v38 = vmul.f32 %v4123_v49, %v7722_v42  ;;  %v1396_v35 = vmul.f32 %v4123_v49, %v7723_v44  ;;  %v7724_v28 = vld [vmem:[#allocation143_spill] sm:$0xff]  ;;  %v1530_v6 = vld [vmem:[#allocation2 + $0x2e0] sm:$0xff] }
 0x13f   : > { %1772 = vst [vmem:[#allocation2 + $0xd8] sm:$0xff] %v1644_v59  ;;  %1773 = vst [vmem:[#allocation2 + $0x18] sm:$0xff] %v1645_v7  ;;  %v1397_v2 = vmul.f32 %v4123_v49, %v5244_v57  ;;  %v1398_v41 = vmul.f32 %v4123_v49, %v5249_v9  ;;  %v1399_v50 = vmul.f32 %v4123_v49, %v7724_v28  ;;  %v1532_v9 = vld [vmem:[#allocation2 + $0x338] sm:$0xff] }
 0x140   : > { %1774 = vst [vmem:[#allocation2 + $0x50] sm:$0xff] %v1646_v58  ;;  %1775 = vst [vmem:[#allocation2 + $0x368] sm:$0xff] %v1647_v3  ;;  %v1400_v7 = vmul.f32 %v4123_v49, %v5266_v12  ;;  %v1401_v17 = vmul.f32 %v4123_v49, %v5275_v60  ;;  %v1650_v51 = vadd.f32 %v1522_v56, %v1394_v0  ;;  %v1531_v3 = vld [vmem:[#allocation2 + $0x388] sm:$0xff]  ;;  %v1534_v12 = vld [vmem:[#allocation2 + $0x80] sm:$0xff]  ;;  %v1263_v60 = vrot.slane %v5730_v10, 1 }
 0x141   : > { %1776 = vst [vmem:[#allocation2 + $0x330] sm:$0xff] %v1648_v63  ;;  %1777 = vst [vmem:[#allocation2 + $0x48] sm:$0xff] %v1649_v19  ;;  %v1651_v40 = vadd.f32 %v1523_v14, %v1395_v38  ;;  %v1652_v46 = vadd.f32 %v1524_v62, %v1396_v35  ;;  %v1653_v25 = vadd.f32 %v1525_v29, %v1397_v2  ;;  %v4125_v59 = vpop.eup %4124  ;;  %v1533_v19 = vld [vmem:[#allocation2 + $0x340] sm:$0xff]  ;;  %v7726_v56 = vld [vmem:[#allocation138_spill] sm:$0xff] }
 0x142   : > { %v1654_v57 = vadd.f32 %v1526_v54, %v1398_v41  ;;  %v1655_v8 = vadd.f32 %v1527_v22, %v1399_v50  ;;  %v1656_v37 = vadd.f32 %v1528_v36, %v1400_v7  ;;  %v1657_v48 = vadd.f32 %v1529_v31, %v1401_v17  ;;  %1778 = vst [vmem:[#allocation2 + $0x380] sm:$0xff] %v1650_v51  ;;  %v7725_v14 = vld [vmem:[#allocation137_spill] sm:$0xff]  ;;  %v7727_v63 = vld [vmem:[#allocation142_spill] sm:$0xff]  ;;  %v1536_v42 = vld [vmem:[#allocation2 + $0x1b8] sm:$0xff] }
 0x143   : > { %1779 = vst [vmem:[#allocation2 + $0x110] sm:$0xff] %v1651_v40  ;;  %1780 = vst [vmem:[#allocation2 + $0x118] sm:$0xff] %v1652_v46  ;;  %v5760_v62 = vadd.f32 %v5732_v15, %v5654_v32  ;;  %v5764_v54 = vadd.f32 %v5734_v52, %v5701_v43  ;;  %v5768_v29 = vmul.f32 %v5718_v39, %v5718_v39  ;;  %v7728_v15 = vld [vmem:[#allocation144_spill] sm:$0xff]  ;;  %v1535_v0 = vld [vmem:[#allocation2 + $0x1a8] sm:$0xff] }
 0x144   : > { %1781 = vst [vmem:[#allocation2 + $0x98] sm:$0xff] %v1653_v25  ;;  %1782 = vst [vmem:[#allocation2 + $0x320] sm:$0xff] %v1654_v57  ;;  %v1402_v49 = vmul.f32 %v4125_v59, %v7725_v14  ;;  %v1403_v58 = vmul.f32 %v4125_v59, %v7726_v56  ;;  %v1404_v1 = vmul.f32 %v4125_v59, %v7727_v63  ;;  %v1537_v43 = vld [vmem:[#allocation2 + $0x168] sm:$0xff]  ;;  %v1539_v28 = vld [vmem:[#allocation2 + $0x2f8] sm:$0xff] }
 0x145   : > { %1783 = vst [vmem:[#allocation2 + $0x150] sm:$0xff] %v1655_v8  ;;  %1784 = vst [vmem:[#allocation2 + $0x108] sm:$0xff] %v1656_v37  ;;  %v1405_v32 = vmul.f32 %v4125_v59, %v7728_v15  ;;  %v1406_v52 = vmul.f32 %v4125_v59, %v5299_v61  ;;  %v1407_v38 = vmul.f32 %v4125_v59, %v5318_v21  ;;  %v1538_v41 = vld [vmem:[#allocation2 + $0x3e8] sm:$0xff]  ;;  %v1540_v40 = vld [vmem:[#allocation2 + $0x290] sm:$0xff] }
 0x146   : > { %1785 = vst [vmem:[#allocation2 + $0x60] sm:$0xff] %v1657_v48  ;;  %v1408_v44 = vmul.f32 %v4125_v59, %v5323_v11  ;;  %v1409_v35 = vmul.f32 %v4125_v59, %v5328_v13  ;;  %v1658_v2 = vadd.f32 %v1530_v6, %v1402_v49  ;;  %v1659_v22 = vadd.f32 %v1531_v3, %v1403_v58  ;;  %v1541_v46 = vld [vmem:[#allocation2 + $0x28] sm:$0xff]  ;;  %v1542_v25 = vld [vmem:[#allocation2 + $0x138] sm:$0xff]  ;;  %v7729_v13 = vld [vmem:[#allocation147_spill] sm:$0xff] }
 0x147   : > { %v1660_v36 = vadd.f32 %v1532_v9, %v1404_v1  ;;  %v1661_v31 = vadd.f32 %v1533_v19, %v1405_v32  ;;  %v1662_v50 = vadd.f32 %v1534_v12, %v1406_v52  ;;  %v1663_v7 = vadd.f32 %v1535_v0, %v1407_v38  ;;  %v1543_v8 = vld [vmem:[#allocation2 + $0xc0] sm:$0xff]  ;;  %v7730_v6 = vld [vmem:[#allocation148_spill] sm:$0xff]  ;;  %v7731_v1 = vld [vmem:[#allocation83_spill] sm:$0xff] }
 0x148   : > { %v1664_v17 = vadd.f32 %v1536_v42, %v1408_v44  ;;  %v1665_v51 = vadd.f32 %v1537_v43, %v1409_v35  ;;  %1786 = vst [vmem:[#allocation2 + $0x2e0] sm:$0xff] %v1658_v2  ;;  %1787 = vst [vmem:[#allocation2 + $0x388] sm:$0xff] %v1659_v22  ;;  %v1410_v11 = vmul.f32 %v4125_v59, %v5335_v20  ;;  %v1544_v37 = vld [vmem:[#allocation2 + $0x1c0] sm:$0xff]  ;;  %v5798_v15 = vsel %vm945_vm0, %v7731_v1, 0.0  ;;  %v7733_v42 = vld [vmem:[#allocation91_spill] sm:$0xff] }
 0x149   : > { %1788 = vst [vmem:[#allocation2 + $0x338] sm:$0xff] %v1660_v36  ;;  %1789 = vst [vmem:[#allocation2 + $0x340] sm:$0xff] %v1661_v31  ;;  %v1411_v21 = vmul.f32 %v4125_v59, %v5340_v23  ;;  %v1412_v61 = vmul.f32 %v4125_v59, %v5345_v24  ;;  %v1413_v57 = vmul.f32 %v4125_v59, %v7729_v13  ;;  %v1545_v48 = vld [vmem:[#allocation2 + $0x280] sm:$0xff]  ;;  %v5815_v43 = vsel %vm945_vm0, %v7733_v42, 0.0  ;;  %v7735_v36 = vld [vmem:[#allocation92_spill] sm:$0xff] }
 0x14a   : > { %1790 = vst [vmem:[#allocation2 + $0x80] sm:$0xff] %v1662_v50  ;;  %1791 = vst [vmem:[#allocation2 + $0x1a8] sm:$0xff] %v1663_v7  ;;  %v1414_v3 = vmul.f32 %v4125_v59, %v7730_v6  ;;  %v1415_v9 = vmul.f32 %v4125_v59, %v5372_v18  ;;  %v1416_v19 = vmul.f32 %v4125_v59, %v5377_v26  ;;  %v7734_v35 = vld [vmem:[#allocation85_spill] sm:$0xff]  ;;  %v5831_v31 = vsel %vm945_vm0, %v7735_v36, 0.0  ;;  %v7738_v13 = vld [vmem:[#allocation94_spill] sm:$0xff] }
 0x14b   : > { %1792 = vst [vmem:[#allocation2 + $0x1b8] sm:$0xff] %v1664_v17  ;;  %1793 = vst [vmem:[#allocation2 + $0x168] sm:$0xff] %v1665_v51  ;;  %v1417_v20 = vmul.f32 %v4125_v59, %v5389_v30  ;;  %v1666_v23 = vadd.f32 %v1538_v41, %v1410_v11  ;;  %v1667_v12 = vadd.f32 %v1539_v28, %v1411_v21  ;;  %v5824_v2 = vsel %vm945_vm0, %v7734_v35, 0.0  ;;  %v7736_v41 = vld [vmem:[#allocation93_spill] sm:$0xff]  ;;  %v7737_v17 = vld [vmem:[#allocation86_spill] sm:$0xff] }
 0x14c   : > { %v1668_v24 = vadd.f32 %v1540_v40, %v1412_v61  ;;  %v1669_v14 = vadd.f32 %v1541_v46, %v1413_v57  ;;  %v1670_v49 = vadd.f32 %v1542_v25, %v1414_v3  ;;  %v1671_v56 = vadd.f32 %v1543_v8, %v1415_v9  ;;  %v7752_v42 = vld [vmem:[#allocation106_spill] sm:$0xff] }
 0x14d   : > { %v1672_v58 = vadd.f32 %v1544_v37, %v1416_v19  ;;  %v1673_v63 = vadd.f32 %v1545_v48, %v1417_v20  ;;  %1794 = vst [vmem:[#allocation2 + $0x3e8] sm:$0xff] %v1666_v23  ;;  %1795 = vst [vmem:[#allocation2 + $0x2f8] sm:$0xff] %v1667_v12  ;;  %v1264_v18 = vadd.f32 %v1263_v60, %v5730_v10  ;;  %v5836_v28 = vsel %vm945_vm0, %v7736_v41, 0.0  ;;  %v7739_v37 = vld [vmem:[#allocation103_spill] sm:$0xff]  ;;  %v7741_v19 = vld [vmem:[#allocation104_spill] sm:$0xff] }
 0x14e   : > { %1796 = vst [vmem:[#allocation2 + $0x290] sm:$0xff] %v1668_v24  ;;  %1797 = vst [vmem:[#allocation2 + $0x28] sm:$0xff] %v1669_v14  ;;  %v1279_v26 = vadd.f32 %v5760_v62, %v5665_v16  ;;  %v1292_v30 = vadd.f32 %v5764_v54, %v5705_v53  ;;  %v1155_v59 = vmul.f32 %v5723_v4, %v5723_v4  ;;  %v7732_v54 = vld [vmem:[#allocation84_spill] sm:$0xff]  ;;  %v5843_v51 = vsel %vm945_vm0, %v7737_v17, 0.0  ;;  %v7743_v12 = vld [vmem:[#allocation95_spill] sm:$0xff] }
 0x14f   : > { %1798 = vst [vmem:[#allocation2 + $0x138] sm:$0xff] %v1670_v49  ;;  %1799 = vst [vmem:[#allocation2 + $0xc0] sm:$0xff] %v1671_v56  ;;  %v1148_v10 = vmul.f32 %v5692_v27, %v5692_v27  ;;  %v1372_v60 = vmax.f32 %v1264_v18, 1e-24  ;;  %v1156_v53 = vmul.f32 %v5728_v47, %v5728_v47  ;;  %v5808_v32 = vsel %vm945_vm0, %v7732_v54, 0.0  ;;  %v7744_v14 = vld [vmem:[#allocation96_spill] sm:$0xff] }
 0x150   : > { %1800 = vst [vmem:[#allocation2 + $0x1c0] sm:$0xff] %v1672_v58  ;;  %1801 = vst [vmem:[#allocation2 + $0x280] sm:$0xff] %v1673_v63  ;;  %v1280_v16 = vrot.slane %v1279_v26, 4  ;;  %v1293_v62 = vadd.f32 %v1292_v30, %v5709_v45  ;;  %v1149_v0 = vmul.f32 %v5697_v34, %v5697_v34  ;;  %v1157_v52 = vmul.f32 %v5739_v33, %v5739_v33  ;;  %v7746_v56 = vld [vmem:[#allocation97_spill] sm:$0xff] }
 0x151   : > { %4126 = vrsqrt.f32 %v1372_v60  ;;  %v1307_v44 = vadd.f32 %v1155_v59, %v5768_v29  ;;  %v1150_v22 = vmul.f32 %v5798_v15, %v5798_v15  ;;  %v1158_v50 = vmul.f32 %v5815_v43, %v5815_v43 }
 0x152   : > { %v1281_v45 = vadd.f32 %v1280_v16, %v1279_v26  ;;  %v1294_v38 = vadd.f32 %v1293_v62, %v5713_v5  ;;  %v1151_v40 = vmul.f32 %v5808_v32, %v5808_v32  ;;  %v1159_v11 = vmul.f32 %v5831_v31, %v5831_v31  ;;  %v7748_v26 = vld [vmem:[#allocation98_spill] sm:$0xff] }
 0x153   : > { %v1308_v7 = vadd.f32 %v1307_v44, %v1156_v53  ;;  %v1152_v61 = vmul.f32 %v5824_v2, %v5824_v2  ;;  %v5854_v57 = vsel %vm945_vm0, %v7738_v13, 0.0  ;;  %v1160_v8 = vmul.f32 %v5836_v28, %v5836_v28  ;;  %v7756_v44 = vld [vmem:[#allocation100_spill] sm:$0xff] }
 0x154   : > { %v1282_v5 = vrot.slane %v1281_v45, 2  ;;  %v1295_v29 = vadd.f32 %v1294_v38, %v1148_v10  ;;  %v5861_v48 = vsel %vm945_vm0, %v7739_v37, 0.0  ;;  %v5866_v20 = vsel %vm945_vm0, %v7741_v19, 0.0  ;;  %v7750_v10 = vld [vmem:[#allocation105_spill] sm:$0xff] }
 0x155   : > { %v1309_v21 = vadd.f32 %v1308_v7, %v1157_v52  ;;  %7740 = vst [vmem:[#allocation135_spill] sm:$0xff] %v5861_v48  ;;  %7742 = vst [vmem:[#allocation136_spill] sm:$0xff] %v5866_v20  ;;  %v1153_v23 = vmul.f32 %v5843_v51, %v5843_v51  ;;  %v5873_v24 = vsel %vm945_vm0, %v7743_v12, 0.0  ;;  %v5878_v49 = vsel %vm945_vm0, %v7744_v14, 0.0  ;;  %v7758_v7 = vld [vmem:[#allocation107_spill] sm:$0xff]  ;;  %v7762_v12 = vld [vmem:[#allocation149_spill] sm:$0xff] }
 0x156   : > { %v1283_v46 = vadd.f32 %v1282_v5, %v1281_v45  ;;  %v1296_v25 = vadd.f32 %v1295_v29, %v1149_v0  ;;  %7745 = vst [vmem:[#allocation139_spill] sm:$0xff] %v5878_v49  ;;  %v5883_v58 = vsel %vm945_vm0, %v7746_v56, 0.0  ;;  %v5888_v30 = vsel %vm945_vm0, %v7748_v26, 0.0  ;;  %v7754_v45 = vld [vmem:[#allocation99_spill] sm:$0xff]  ;;  %v1546_v5 = vld [vmem:[#allocation2 + $0x100] sm:$0xff]  ;;  %v7763_v56 = vld [vmem:[#allocation150_spill] sm:$0xff] }
 0x157   : > { %v1310_v9 = vadd.f32 %v1309_v21, %v1158_v50  ;;  %7747 = vst [vmem:[#allocation140_spill] sm:$0xff] %v5883_v58  ;;  %7749 = vst [vmem:[#allocation141_spill] sm:$0xff] %v5888_v30  ;;  %v1161_v1 = vmul.f32 %v5854_v57, %v5854_v57  ;;  %v5895_v60 = vsel %vm945_vm0, %v7750_v10, 0.0  ;;  %v1170_v16 = vmul.f32 %v5861_v48, %v5861_v48  ;;  %v1547_v29 = vld [vmem:[#allocation2 + $0x3c0] sm:$0xff]  ;;  %v1550_v21 = vld [vmem:[#allocation2 + $0x218] sm:$0xff] }
 0x158   : > { %v1284_v6 = vrot.slane %v1283_v46, 1  ;;  %v1297_v3 = vadd.f32 %v1296_v25, %v1150_v22  ;;  %7751 = vst [vmem:[#allocation143_spill] sm:$0xff] %v5895_v60  ;;  %v1171_v62 = vmul.f32 %v5866_v20, %v5866_v20  ;;  %v5904_v52 = vsel %vm945_vm0, %v7752_v42, 0.0  ;;  %v7757_v22 = vld [vmem:[#allocation101_spill] sm:$0xff]  ;;  %v1548_v25 = vld [vmem:[#allocation2 + $0x158] sm:$0xff]  ;;  %v1552_v26 = vld [vmem:[#allocation2 + $0x8] sm:$0xff] }
 0x159   : > { %v1311_v59 = vadd.f32 %v1310_v9, %v1159_v11  ;;  %7753 = vst [vmem:[#allocation137_spill] sm:$0xff] %v5904_v52  ;;  %v5909_v38 = vsel %vm945_vm0, %v7754_v45, 0.0  ;;  %v5914_v35 = vsel %vm945_vm0, %v7756_v44, 0.0  ;;  %v5919_v36 = vsel %vm945_vm0, %v7757_v22, 0.0  ;;  %v1549_v11 = vld [vmem:[#allocation2 + $0x3e0] sm:$0xff]  ;;  %v7761_v9 = vld [vmem:[#allocation146_spill] sm:$0xff] }
 0x15a   : > { %v1285_v63 = vadd.f32 %v1284_v6, %v1283_v46  ;;  %v1298_v18 = vadd.f32 %v1297_v3, %v1151_v40  ;;  %7755 = vst [vmem:[#allocation138_spill] sm:$0xff] %v5909_v38  ;;  %v5923_v41 = vmul.f32 %v5873_v24, %v5873_v24  ;;  %v5927_v50 = vmul.f32 %v5878_v49, %v5878_v49  ;;  %v7760_v6 = vld [vmem:[#allocation145_spill] sm:$0xff]  ;;  %v7764_v10 = vld [vmem:[#allocation151_spill] sm:$0xff]  ;;  %v7767_v42 = vld [vmem:[#allocation154_spill] sm:$0xff] }
 0x15b   : > { %v1312_v0 = vadd.f32 %v1311_v59, %v1160_v8  ;;  %v5932_v17 = vsel %vm945_vm0, %v7758_v7, 0.0  ;;  %v5936_v40 = vmul.f32 %v5895_v60, %v5895_v60  ;;  %v5942_v8 = vmul.f32 %v5904_v52, %v5904_v52  ;;  %v1553_v59 = vld [vmem:[#allocation2 + $0x128] sm:$0xff]  ;;  %v1554_v7 = vld [vmem:[#allocation2 + $0x2a0] sm:$0xff]  ;;  %v1558_v48 = vld [vmem:[#allocation2 + $0xb0] sm:$0xff] }
 0x15c   : > { %v1373_v53 = vmax.f32 %v1285_v63, 1e-24  ;;  %v1299_v54 = vadd.f32 %v1298_v18, %v1152_v61  ;;  %7759 = vst [vmem:[#allocation142_spill] sm:$0xff] %v5932_v17  ;;  %v1328_v37 = vadd.f32 %v1171_v62, %v1170_v16  ;;  %v1551_v18 = vld [vmem:[#allocation2 + $0x3f8] sm:$0xff]  ;;  %v1556_v60 = vld [vmem:[#allocation2 + $0xa0] sm:$0xff] }
 0x15d   : > { %v1313_v13 = vadd.f32 %v1312_v0, %v1161_v1  ;;  %v1557_v20 = vld [vmem:[#allocation2 + $0x2c0] sm:$0xff]  ;;  %v1574_v49 = vld [vmem:[#allocation2 + $0x1d8] sm:$0xff] }
 0x15e   : > { %4128 = vrsqrt.f32 %v1373_v53  ;;  %v4127_v46 = vpop.eup %4126  ;;  %v5938_v61 = vadd.f32 %v1299_v54, %v1153_v23  ;;  %v7765_v53 = vld [vmem:[#allocation152_spill] sm:$0xff]  ;;  %v7766_v54 = vld [vmem:[#allocation153_spill] sm:$0xff] }
 0x15f   : > { %v1418_v3 = vmul.f32 %v4127_v46, %v7760_v6  ;;  %v1419_v19 = vmul.f32 %v4127_v46, %v7761_v9  ;;  %v1420_v14 = vmul.f32 %v4127_v46, %v7762_v12  ;;  %v1421_v63 = vmul.f32 %v4127_v46, %v7763_v56  ;;  %v1555_v6 = vld [vmem:[#allocation2 + $0x3f0] sm:$0xff] }
 0x160   : > { %v1422_v23 = vmul.f32 %v4127_v46, %v7764_v10  ;;  %v1423_v1 = vmul.f32 %v4127_v46, %v7765_v53  ;;  %v1424_v0 = vmul.f32 %v4127_v46, %v7766_v54  ;;  %v1425_v45 = vmul.f32 %v4127_v46, %v7767_v42  ;;  %v7768_v10 = vld [vmem:[#allocation155_spill] sm:$0xff]  ;;  %v7769_v54 = vld [vmem:[#allocation156_spill] sm:$0xff] }
 0x161   : > { %v1674_v16 = vadd.f32 %v1546_v5, %v1418_v3  ;;  %v1675_v62 = vadd.f32 %v1547_v29, %v1419_v19  ;;  %v1676_v44 = vadd.f32 %v1548_v25, %v1420_v14  ;;  %v1677_v22 = vadd.f32 %v1549_v11, %v1421_v63  ;;  %v7770_v29 = vld [vmem:[#allocation157_spill] sm:$0xff]  ;;  %v7771_v11 = vld [vmem:[#allocation158_spill] sm:$0xff]  ;;  %v1561_v14 = vld [vmem:[#allocation2 + $0x10] sm:$0xff] }
 0x162   : > { %v1678_v9 = vadd.f32 %v1550_v21, %v1422_v23  ;;  %v1679_v12 = vadd.f32 %v1551_v18, %v1423_v1  ;;  %v1680_v56 = vadd.f32 %v1552_v26, %v1424_v0  ;;  %v1681_v52 = vadd.f32 %v1553_v59, %v1425_v45  ;;  %v1559_v19 = vld [vmem:[#allocation2 + $0x1e0] sm:$0xff]  ;;  %v1560_v21 = vld [vmem:[#allocation2 + $0x1f0] sm:$0xff]  ;;  %v7773_v26 = vld [vmem:[#allocation162_spill] sm:$0xff] }
 0x163   : > { %1802 = vst [vmem:[#allocation2 + $0x100] sm:$0xff] %v1674_v16  ;;  %1803 = vst [vmem:[#allocation2 + $0x3c0] sm:$0xff] %v1675_v62  ;;  %v1426_v53 = vmul.f32 %v4127_v46, %v7768_v10  ;;  %v1427_v5 = vmul.f32 %v4127_v46, %v7769_v54  ;;  %v1428_v25 = vmul.f32 %v4127_v46, %v7770_v29  ;;  %v7772_v63 = vld [vmem:[#allocation159_spill] sm:$0xff]  ;;  %v7775_v0 = vld [vmem:[#allocation164_spill] sm:$0xff] }
 0x164   : > { %1804 = vst [vmem:[#allocation2 + $0x158] sm:$0xff] %v1676_v44  ;;  %1805 = vst [vmem:[#allocation2 + $0x3e0] sm:$0xff] %v1677_v22  ;;  %v1429_v3 = vmul.f32 %v4127_v46, %v7771_v11  ;;  %v1430_v18 = vmul.f32 %v4127_v46, %v7772_v63  ;;  %v1431_v59 = vmul.f32 %v4127_v46, %v7773_v26  ;;  %v7774_v23 = vld [vmem:[#allocation163_spill] sm:$0xff]  ;;  %v1566_v63 = vld [vmem:[#allocation2 + $0x208] sm:$0xff] }
 0x165   : > { %1806 = vst [vmem:[#allocation2 + $0x218] sm:$0xff] %v1678_v9  ;;  %1807 = vst [vmem:[#allocation2 + $0x3f8] sm:$0xff] %v1679_v12  ;;  %v1432_v1 = vmul.f32 %v4127_v46, %v7774_v23  ;;  %v1433_v42 = vmul.f32 %v4127_v46, %v7775_v0  ;;  %v1682_v45 = vadd.f32 %v1554_v7, %v1426_v53  ;;  %v7776_v12 = vld [vmem:[#allocation108_spill] sm:$0xff]  ;;  %v7780_v53 = vld [vmem:[#allocation110_spill] sm:$0xff] }
 0x166   : > { %1808 = vst [vmem:[#allocation2 + $0x8] sm:$0xff] %v1680_v56  ;;  %1809 = vst [vmem:[#allocation2 + $0x128] sm:$0xff] %v1681_v52  ;;  %v1683_v16 = vadd.f32 %v1555_v6, %v1427_v5  ;;  %v1684_v62 = vadd.f32 %v1556_v60, %v1428_v25  ;;  %v1685_v44 = vadd.f32 %v1557_v20, %v1429_v3  ;;  %v1301_v52 = vrot.slane %v5938_v61, 4  ;;  %v7779_v6 = vld [vmem:[#allocation109_spill] sm:$0xff]  ;;  %v7781_v25 = vld [vmem:[#allocation111_spill] sm:$0xff] }
 0x167   : > { %v1686_v22 = vadd.f32 %v1558_v48, %v1430_v18  ;;  %v1687_v10 = vadd.f32 %v1559_v19, %v1431_v59  ;;  %v1688_v54 = vadd.f32 %v1560_v21, %v1432_v1  ;;  %v1689_v29 = vadd.f32 %v1561_v14, %v1433_v42  ;;  %1810 = vst [vmem:[#allocation2 + $0x2a0] sm:$0xff] %v1682_v45  ;;  %v7778_v48 = vld [vmem:[#allocation102_spill] sm:$0xff]  ;;  %v1564_v21 = vld [vmem:[#allocation2 + $0x90] sm:$0xff]  ;;  %v1565_v14 = vld [vmem:[#allocation2 + $0x3a0] sm:$0xff] }
 0x168   : > { %1811 = vst [vmem:[#allocation2 + $0x3f0] sm:$0xff] %v1683_v16  ;;  %1812 = vst [vmem:[#allocation2 + $0xa0] sm:$0xff] %v1684_v62  ;;  %v1314_v9 = vadd.f32 %v1313_v13, %v5923_v41  ;;  %v5965_v46 = vsel %vm945_vm0, %v7776_v12, 0.0  ;;  %v1329_v60 = vadd.f32 %v1328_v37, %v5936_v40  ;;  %v5971_v20 = vsel %vm945_vm0, %v7778_v48, 0.0  ;;  %v1562_v13 = vld [vmem:[#allocation2 + $0x230] sm:$0xff]  ;;  %v1563_v37 = vld [vmem:[#allocation2 + $0x240] sm:$0xff] }
 0x169   : > { %1813 = vst [vmem:[#allocation2 + $0x2c0] sm:$0xff] %v1685_v44  ;;  %7777 = vst [vmem:[#allocation144_spill] sm:$0xff] %v5965_v46  ;;  %v5975_v7 = vmul.f32 %v5883_v58, %v5883_v58  ;;  %v5979_v41 = vmul.f32 %v5888_v30, %v5888_v30  ;;  %v5983_v40 = vmul.f32 %v5909_v38, %v5909_v38  ;;  %v5988_v56 = vsel %vm945_vm0, %v7779_v6, 0.0  ;;  %v7782_v1 = vld [vmem:[#allocation160_spill] sm:$0xff]  ;;  %v7783_v42 = vld [vmem:[#allocation161_spill] sm:$0xff] }
 0x16a   : > { %1814 = vst [vmem:[#allocation2 + $0xb0] sm:$0xff] %v1686_v22  ;;  %1815 = vst [vmem:[#allocation2 + $0x1e0] sm:$0xff] %v1687_v10  ;;  %v5993_v5 = vsel %vm945_vm0, %v7780_v53, 0.0  ;;  %v5998_v11 = vsel %vm945_vm0, %v7781_v25, 0.0  ;;  %v6002_v3 = vmul.f32 %v5932_v17, %v5932_v17  ;;  %v6005_v18 = vadd.f32 %v1301_v52, %v5938_v61  ;;  %v7784_v16 = vld [vmem:[#allocation165_spill] sm:$0xff]  ;;  %v7785_v44 = vld [vmem:[#allocation166_spill] sm:$0xff] }
 0x16b   : > { %1816 = vst [vmem:[#allocation2 + $0x1f0] sm:$0xff] %v1688_v54  ;;  %1817 = vst [vmem:[#allocation2 + $0x10] sm:$0xff] %v1689_v29  ;;  %v4129_v19 = vpop.eup %4128  ;;  %v1315_v26 = vadd.f32 %v1314_v9, %v5927_v50  ;;  %v6010_v59 = vmul.f32 %v5965_v46, %v5965_v46  ;;  %v1330_v23 = vadd.f32 %v1329_v60, %v5942_v8  ;;  %v1567_v10 = vld [vmem:[#allocation2 + $0xd0] sm:$0xff]  ;;  %v1568_v54 = vld [vmem:[#allocation2 + $0x88] sm:$0xff] }
 0x16c   : > { %v1434_v0 = vmul.f32 %v4129_v19, %v7782_v1  ;;  %v1435_v45 = vmul.f32 %v4129_v19, %v7783_v42  ;;  %v1436_v62 = vmul.f32 %v4129_v19, %v7784_v16  ;;  %v1437_v22 = vmul.f32 %v4129_v19, %v7785_v44  ;;  %v1569_v61 = vld [vmem:[#allocation2 + $0x2f0] sm:$0xff]  ;;  %v7787_v50 = vld [vmem:[#allocation168_spill] sm:$0xff]  ;;  %v7788_v12 = vld [vmem:[#allocation169_spill] sm:$0xff] }
 0x16d   : > { %v7786_v29 = vld [vmem:[#allocation167_spill] sm:$0xff]  ;;  %v1439_v9 = vmul.f32 %v4129_v19, %v7787_v50  ;;  %v1440_v48 = vmul.f32 %v4129_v19, %v7788_v12  ;;  %v7789_v6 = vld [vmem:[#allocation170_spill] sm:$0xff]  ;;  %v1570_v42 = vld [vmem:[#allocation2 + $0x358] sm:$0xff] }
 0x16e   : > { %v1438_v52 = vmul.f32 %v4129_v19, %v7786_v29  ;;  %v1441_v53 = vmul.f32 %v4129_v19, %v7789_v6  ;;  %v1690_v8 = vadd.f32 %v1562_v13, %v1434_v0  ;;  %v1691_v60 = vadd.f32 %v1563_v37, %v1435_v45  ;;  %v1571_v46 = vld [vmem:[#allocation2 + $0x268] sm:$0xff]  ;;  %v1572_v30 = vld [vmem:[#allocation2 + $0x350] sm:$0xff]  ;;  %v7791_v12 = vld [vmem:[#allocation172_spill] sm:$0xff] }
 0x16f   : > { %v1692_v25 = vadd.f32 %v1564_v21, %v1436_v62  ;;  %v1693_v1 = vadd.f32 %v1565_v14, %v1437_v22  ;;  %v1695_v17 = vadd.f32 %v1567_v10, %v1439_v9  ;;  %v1696_v44 = vadd.f32 %v1568_v54, %v1440_v48  ;;  %v1573_v58 = vld [vmem:[#allocation2 + $0x188] sm:$0xff]  ;;  %v7790_v29 = vld [vmem:[#allocation171_spill] sm:$0xff]  ;;  %v7792_v37 = vld [vmem:[#allocation173_spill] sm:$0xff] }
 0x170   : > { %v1694_v16 = vadd.f32 %v1566_v63, %v1438_v52  ;;  %v1697_v38 = vadd.f32 %v1569_v61, %v1441_v53  ;;  %1818 = vst [vmem:[#allocation2 + $0x230] sm:$0xff] %v1690_v8  ;;  %1819 = vst [vmem:[#allocation2 + $0x240] sm:$0xff] %v1691_v60  ;;  %v1442_v50 = vmul.f32 %v4129_v19, %v7790_v29  ;;  %v7793_v14 = vld [vmem:[#allocation174_spill] sm:$0xff]  ;;  %v1575_v45 = vld [vmem:[#allocation2 + $0x30] sm:$0xff] }
 0x171   : > { %1820 = vst [vmem:[#allocation2 + $0x90] sm:$0xff] %v1692_v25  ;;  %1821 = vst [vmem:[#allocation2 + $0x3a0] sm:$0xff] %v1693_v1  ;;  %v1443_v13 = vmul.f32 %v4129_v19, %v7791_v12  ;;  %v1444_v21 = vmul.f32 %v4129_v19, %v7792_v37  ;;  %v1445_v0 = vmul.f32 %v4129_v19, %v7793_v14  ;;  %v1576_v63 = vld [vmem:[#allocation2 + $0x140] sm:$0xff]  ;;  %v1577_v62 = vld [vmem:[#allocation2 + $0x2a8] sm:$0xff] }
 0x172   : > { %1822 = vst [vmem:[#allocation2 + $0x208] sm:$0xff] %v1694_v16  ;;  %1823 = vst [vmem:[#allocation2 + $0xd0] sm:$0xff] %v1695_v17  ;;  %v7794_v22 = vld [vmem:[#allocation175_spill] sm:$0xff]  ;;  %v7795_v54 = vld [vmem:[#allocation178_spill] sm:$0xff]  ;;  %v1698_v53 = vadd.f32 %v1570_v42, %v1442_v50  ;;  %v1316_v17 = vadd.f32 %v1315_v26, %v5975_v7  ;;  %v1176_v16 = vmul.f32 %v5988_v56, %v5988_v56 }
 0x173   : > { %1824 = vst [vmem:[#allocation2 + $0x88] sm:$0xff] %v1696_v44  ;;  %1825 = vst [vmem:[#allocation2 + $0x2f0] sm:$0xff] %v1697_v38  ;;  %v1446_v10 = vmul.f32 %v4129_v19, %v7794_v22  ;;  %v1447_v61 = vmul.f32 %v4129_v19, %v7795_v54  ;;  %v7796_v52 = vld [vmem:[#allocation179_spill] sm:$0xff]  ;;  %v7797_v48 = vld [vmem:[#allocation182_spill] sm:$0xff]  ;;  %v1699_v8 = vadd.f32 %v1571_v46, %v1443_v13  ;;  %v1303_v38 = vrot.slane %v6005_v18, 2 }
 0x174   : > { %v1448_v9 = vmul.f32 %v4129_v19, %v7796_v52  ;;  %v1449_v6 = vmul.f32 %v4129_v19, %v7797_v48  ;;  %v1700_v60 = vadd.f32 %v1572_v30, %v1444_v21  ;;  %v1701_v25 = vadd.f32 %v1573_v58, %v1445_v0  ;;  %1826 = vst [vmem:[#allocation2 + $0x358] sm:$0xff] %v1698_v53  ;;  %v7798_v58 = vld [vmem:[#allocation112_spill] sm:$0xff]  ;;  %v7799_v7 = vld [vmem:[#allocation119_spill] sm:$0xff]  ;;  %v7803_v14 = vld [vmem:[#allocation113_spill] sm:$0xff] }
 0x175   : > { %v1702_v1 = vadd.f32 %v1574_v49, %v1446_v10  ;;  %v1703_v29 = vadd.f32 %v1575_v45, %v1447_v61  ;;  %1827 = vst [vmem:[#allocation2 + $0x268] sm:$0xff] %v1699_v8  ;;  %v1331_v19 = vadd.f32 %v1330_v23, %v6002_v3  ;;  %v1167_v49 = vmul.f32 %v5914_v35, %v5914_v35  ;;  %v7801_v44 = vld [vmem:[#allocation120_spill] sm:$0xff]  ;;  %v7807_v22 = vld [vmem:[#allocation114_spill] sm:$0xff] }
 0x176   : > { %v1704_v12 = vadd.f32 %v1576_v63, %v1448_v9  ;;  %v1705_v37 = vadd.f32 %v1577_v62, %v1449_v6  ;;  %1828 = vst [vmem:[#allocation2 + $0x350] sm:$0xff] %v1700_v60  ;;  %1829 = vst [vmem:[#allocation2 + $0x188] sm:$0xff] %v1701_v25  ;;  %v6039_v30 = vsel %vm945_vm0, %v7798_v58, 0.0  ;;  %v1177_v46 = vmul.f32 %v5993_v5, %v5993_v5  ;;  %v7805_v63 = vld [vmem:[#allocation121_spill] sm:$0xff]  ;;  %v7809_v6 = vld [vmem:[#allocation122_spill] sm:$0xff] }
 0x177   : > { %1830 = vst [vmem:[#allocation2 + $0x1d8] sm:$0xff] %v1702_v1  ;;  %1831 = vst [vmem:[#allocation2 + $0x30] sm:$0xff] %v1703_v29  ;;  %v6046_v26 = vsel %vm945_vm0, %v7799_v7, 0.0  ;;  %v1304_v3 = vadd.f32 %v1303_v38, %v6005_v18  ;;  %v1317_v23 = vadd.f32 %v1316_v17, %v5979_v41  ;;  %v1332_v42 = vadd.f32 %v1331_v19, %v6010_v59  ;;  %v7813_v38 = vld [vmem:[#allocation115_spill] sm:$0xff]  ;;  %v7815_v7 = vld [vmem:[#allocation124_spill] sm:$0xff] }
 0x178   : > { %1832 = vst [vmem:[#allocation2 + $0x140] sm:$0xff] %v1704_v12  ;;  %1833 = vst [vmem:[#allocation2 + $0x2a8] sm:$0xff] %v1705_v37  ;;  %v6054_v50 = vsel %vm945_vm0, %v7801_v44, 0.0  ;;  %v1168_v13 = vmul.f32 %v5919_v36, %v5919_v36  ;;  %v1169_v21 = vmul.f32 %v5971_v20, %v5971_v20  ;;  %v6063_v0 = vsel %vm945_vm0, %v7803_v14, 0.0  ;;  %v7811_v12 = vld [vmem:[#allocation123_spill] sm:$0xff] }
 0x179   : > { %7800 = vst [vmem:[#allocation147_spill] sm:$0xff] %v6046_v26  ;;  %7802 = vst [vmem:[#allocation148_spill] sm:$0xff] %v6054_v50  ;;  %v1178_v41 = vmul.f32 %v5998_v11, %v5998_v11  ;;  %v1305_v18 = vrot.slane %v1304_v3, 1  ;;  %v1318_v59 = vadd.f32 %v1317_v23, %v5983_v40  ;;  %v1333_v45 = vadd.f32 %v1332_v42, %v1176_v16  ;;  %v7817_v23 = vld [vmem:[#allocation116_spill] sm:$0xff] }
 0x17a   : > { %7804 = vst [vmem:[#allocation145_spill] sm:$0xff] %v6063_v0  ;;  %v6071_v62 = vsel %vm945_vm0, %v7805_v63, 0.0  ;;  %v6076_v10 = vsel %vm945_vm0, %v7807_v22, 0.0  ;;  %v1179_v54 = vmul.f32 %v6039_v30, %v6039_v30  ;;  %v1186_v61 = vmul.f32 %v6046_v26, %v6046_v26 }
 0x17b   : > { %7806 = vst [vmem:[#allocation146_spill] sm:$0xff] %v6071_v62  ;;  %7808 = vst [vmem:[#allocation149_spill] sm:$0xff] %v6076_v10  ;;  %v1187_v40 = vmul.f32 %v6054_v50, %v6054_v50  ;;  %v1306_v52 = vadd.f32 %v1305_v18, %v1304_v3  ;;  %v1319_v9 = vadd.f32 %v1318_v59, %v1167_v49  ;;  %v6087_v53 = vsel %vm945_vm0, %v7809_v6, 0.0  ;;  %v7819_v18 = vld [vmem:[#allocation125_spill] sm:$0xff]  ;;  %v7825_v6 = vld [vmem:[#allocation118_spill] sm:$0xff] }
 0x17c   : > { %v1334_v48 = vadd.f32 %v1333_v45, %v1177_v46  ;;  %7810 = vst [vmem:[#allocation150_spill] sm:$0xff] %v6087_v53  ;;  %v1180_v8 = vmul.f32 %v6063_v0, %v6063_v0  ;;  %v1188_v60 = vmul.f32 %v6071_v62, %v6071_v62  ;;  %v6096_v37 = vsel %vm945_vm0, %v7811_v12, 0.0  ;;  %v7821_v45 = vld [vmem:[#allocation117_spill] sm:$0xff]  ;;  %v1590_v0 = vld [vmem:[#allocation2 + $0x248] sm:$0xff] }
 0x17d   : > { %v1374_v25 = vmax.f32 %v1306_v52, 1e-24  ;;  %v1320_v1 = vadd.f32 %v1319_v9, %v1168_v13  ;;  %7812 = vst [vmem:[#allocation151_spill] sm:$0xff] %v6096_v37  ;;  %v6101_v17 = vsel %vm945_vm0, %v7813_v38, 0.0  ;;  %v1181_v16 = vmul.f32 %v6076_v10, %v6076_v10  ;;  %v7823_v9 = vld [vmem:[#allocation126_spill] sm:$0xff]  ;;  %v7827_v38 = vld [vmem:[#allocation127_spill] sm:$0xff] }
 0x17e   : > { %v1335_v29 = vadd.f32 %v1334_v48, %v1178_v41  ;;  %7814 = vst [vmem:[#allocation152_spill] sm:$0xff] %v6101_v17  ;;  %v1189_v19 = vmul.f32 %v6087_v53, %v6087_v53  ;;  %v1349_v49 = vadd.f32 %v1187_v40, %v1186_v61  ;;  %v6110_v3 = vsel %vm945_vm0, %v7815_v7, 0.0  ;;  %v7841_v53 = vld [vmem:[#allocation185_spill] sm:$0xff]  ;;  %v1589_v10 = vld [vmem:[#allocation2 + $0x2b8] sm:$0xff] }
 0x17f   : > { %4130 = vrsqrt.f32 %v1374_v25  ;;  %v1321_v58 = vadd.f32 %v1320_v1, %v1169_v21  ;;  %7816 = vst [vmem:[#allocation153_spill] sm:$0xff] %v6110_v3  ;;  %v6115_v42 = vsel %vm945_vm0, %v7817_v23, 0.0  ;;  %v1190_v44 = vmul.f32 %v6096_v37, %v6096_v37  ;;  %v7829_v23 = vld [vmem:[#allocation128_spill] sm:$0xff] }
 0x180   : > { %v1336_v46 = vadd.f32 %v1335_v29, %v1179_v54  ;;  %7818 = vst [vmem:[#allocation154_spill] sm:$0xff] %v6115_v42  ;;  %v1350_v13 = vadd.f32 %v1349_v49, %v1188_v60  ;;  %v1182_v41 = vmul.f32 %v6101_v17, %v6101_v17  ;;  %v6124_v59 = vsel %vm945_vm0, %v7819_v18, 0.0  ;;  %v7831_v18 = vld [vmem:[#allocation129_spill] sm:$0xff]  ;;  %v1585_v37 = vld [vmem:[#allocation2 + $0x178] sm:$0xff] }
 0x181   : > { %v1322_v14 = vrot.slane %v1321_v58, 4  ;;  %7820 = vst [vmem:[#allocation155_spill] sm:$0xff] %v6124_v59  ;;  %v6129_v63 = vsel %vm945_vm0, %v7821_v45, 0.0  ;;  %v1191_v22 = vmul.f32 %v6110_v3, %v6110_v3  ;;  %v1183_v40 = vmul.f32 %v6115_v42, %v6115_v42  ;;  %v1584_v3 = vld [vmem:[#allocation2 + $0xe0] sm:$0xff]  ;;  %v1588_v17 = vld [vmem:[#allocation2 + $0x3b8] sm:$0xff] }
 0x182   : > { %v1337_v21 = vadd.f32 %v1336_v46, %v1180_v8  ;;  %7822 = vst [vmem:[#allocation156_spill] sm:$0xff] %v6129_v63  ;;  %v1351_v54 = vadd.f32 %v1350_v13, %v1189_v19  ;;  %v6138_v48 = vsel %vm945_vm0, %v7823_v9, 0.0  ;;  %v6143_v8 = vsel %vm945_vm0, %v7825_v6, 0.0  ;;  %v7834_v9 = vld [vmem:[#allocation131_spill] sm:$0xff] }
 0x183   : > { %v1323_v61 = vadd.f32 %v1322_v14, %v1321_v58  ;;  %7824 = vst [vmem:[#allocation157_spill] sm:$0xff] %v6138_v48  ;;  %7826 = vst [vmem:[#allocation158_spill] sm:$0xff] %v6143_v8  ;;  %v1192_v60 = vmul.f32 %v6124_v59, %v6124_v59  ;;  %v1184_v29 = vmul.f32 %v6129_v63, %v6129_v63  ;;  %v6168_v45 = vsel %vm945_vm0, %v7831_v18, 0.0  ;;  %v7836_v18 = vld [vmem:[#allocation177_spill] sm:$0xff] }
 0x184   : > { %v1338_v52 = vadd.f32 %v1337_v21, %v1181_v16  ;;  %v1352_v25 = vadd.f32 %v1351_v54, %v1190_v44  ;;  %v6152_v16 = vsel %vm945_vm0, %v7827_v38, 0.0  ;;  %v1193_v19 = vmul.f32 %v6138_v48, %v6138_v48  ;;  %7832 = vst [vmem:[#allocation163_spill] sm:$0xff] %v6168_v45  ;;  %v1578_v54 = vld [vmem:[#allocation2 + $0x130] sm:$0xff]  ;;  %v1583_v59 = vld [vmem:[#allocation2 + $0x300] sm:$0xff] }
 0x185   : > { %v1324_v1 = vrot.slane %v1323_v61, 2  ;;  %7828 = vst [vmem:[#allocation159_spill] sm:$0xff] %v6152_v16  ;;  %v1185_v7 = vmul.f32 %v6143_v8, %v6143_v8  ;;  %v6161_v44 = vsel %vm945_vm0, %v7829_v23, 0.0  ;;  %v1194_v13 = vmul.f32 %v6152_v16, %v6152_v16  ;;  %v7835_v23 = vld [vmem:[#allocation176_spill] sm:$0xff]  ;;  %v7838_v16 = vld [vmem:[#allocation181_spill] sm:$0xff] }
 0x186   : > { %v1339_v12 = vadd.f32 %v1338_v52, %v1182_v41  ;;  %v1353_v49 = vadd.f32 %v1352_v25, %v1191_v22  ;;  %7830 = vst [vmem:[#allocation162_spill] sm:$0xff] %v6161_v44  ;;  %v6178_v6 = vsel %vm945_vm0, %v7834_v9, 0.0  ;;  %v7837_v9 = vld [vmem:[#allocation180_spill] sm:$0xff]  ;;  %v1587_v8 = vld [vmem:[#allocation2 + $0x260] sm:$0xff] }
 0x187   : > { %v1325_v58 = vadd.f32 %v1324_v1, %v1323_v61  ;;  %v1579_v61 = vld [vmem:[#allocation2 + $0x200] sm:$0xff]  ;;  %v1580_v1 = vld [vmem:[#allocation2 + $0x318] sm:$0xff] }
 0x188   : > { %v1340_v46 = vadd.f32 %v1339_v12, %v1183_v40  ;;  %v1354_v14 = vadd.f32 %v1353_v49, %v1192_v60  ;;  %v7833_v40 = vld [vmem:[#allocation130_spill] sm:$0xff]  ;;  %v6182_v60 = vmul.f32 %v6161_v44, %v6161_v44  ;;  %v1582_v12 = vld [vmem:[#allocation2 + $0x70] sm:$0xff]  ;;  %v6190_v49 = vmul.f32 %v6168_v45, %v6168_v45 }
 0x189   : > { %v1326_v41 = vrot.slane %v1325_v58, 1  ;;  %v6173_v52 = vsel %vm945_vm0, %v7833_v40, 0.0  ;;  %v7842_v45 = vld [vmem:[#allocation186_spill] sm:$0xff] }
 0x18a   : > { %v1341_v21 = vadd.f32 %v1340_v46, %v1184_v29  ;;  %v1355_v22 = vadd.f32 %v1354_v14, %v1193_v19  ;;  %v1581_v29 = vld [vmem:[#allocation2 + $0x220] sm:$0xff] }
 0x18b   : > { %v6184_v38 = vadd.f32 %v1326_v41, %v1325_v58  ;;  %v7839_v58 = vld [vmem:[#allocation183_spill] sm:$0xff] }
 0x18c   : > { %v4131_v25 = vpop.eup %4130  ;;  %v6186_v19 = vadd.f32 %v1341_v21, %v1185_v7  ;;  %v1356_v46 = vadd.f32 %v1355_v22, %v1194_v13  ;;  %v7840_v7 = vld [vmem:[#allocation184_spill] sm:$0xff] }
 0x18d   : > { %v1450_v14 = vmul.f32 %v4131_v25, %v7835_v23  ;;  %v1451_v40 = vmul.f32 %v4131_v25, %v7836_v18  ;;  %v1452_v44 = vmul.f32 %v4131_v25, %v7837_v9  ;;  %v1453_v48 = vmul.f32 %v4131_v25, %v7838_v16  ;;  %v1586_v18 = vld [vmem:[#allocation2 + $0x328] sm:$0xff] }
 0x18e   : > { %v1454_v41 = vmul.f32 %v4131_v25, %v7839_v58  ;;  %v1455_v21 = vmul.f32 %v4131_v25, %v7840_v7  ;;  %v1456_v62 = vmul.f32 %v4131_v25, %v7841_v53  ;;  %v1457_v50 = vmul.f32 %v4131_v25, %v7842_v45  ;;  %v7843_v53 = vld [vmem:[#allocation187_spill] sm:$0xff]  ;;  %v7844_v45 = vld [vmem:[#allocation188_spill] sm:$0xff]  ;;  %v7847_v7 = vld [vmem:[#allocation134_spill] sm:$0xff] }
 0x18f   : > { %v1706_v13 = vadd.f32 %v1578_v54, %v1450_v14  ;;  %v1707_v22 = vadd.f32 %v1579_v61, %v1451_v40  ;;  %v1708_v23 = vadd.f32 %v1580_v1, %v1452_v44  ;;  %v1709_v26 = vadd.f32 %v1581_v29, %v1453_v48  ;;  %v1591_v61 = vld [vmem:[#allocation2 + $0x40] sm:$0xff] }
 0x190   : > { %v1710_v9 = vadd.f32 %v1582_v12, %v1454_v41  ;;  %v1711_v63 = vadd.f32 %v1583_v59, %v1455_v21  ;;  %v1712_v16 = vadd.f32 %v1584_v3, %v1456_v62  ;;  %v1713_v42 = vadd.f32 %v1585_v37, %v1457_v50  ;;  %v1592_v1 = vld [vmem:[#allocation2 + $0x20] sm:$0xff]  ;;  %v1593_v59 = vld [vmem:[#allocation2 + $0xe8] sm:$0xff] }
 0x191   : > { %1834 = vst [vmem:[#allocation2 + $0x130] sm:$0xff] %v1706_v13  ;;  %1835 = vst [vmem:[#allocation2 + $0x200] sm:$0xff] %v1707_v22  ;;  %v1458_v58 = vmul.f32 %v4131_v25, %v7843_v53  ;;  %v1459_v54 = vmul.f32 %v4131_v25, %v7844_v45  ;;  %v1460_v44 = vmul.f32 %v4131_v25, %v5692_v27  ;;  %v6232_v21 = vsel %vm945_vm0, %v7847_v7, 0.0  ;;  %v1594_v45 = vld [vmem:[#allocation2 + $0x288] sm:$0xff] }
 0x192   : > { %1836 = vst [vmem:[#allocation2 + $0x318] sm:$0xff] %v1708_v23  ;;  %1837 = vst [vmem:[#allocation2 + $0x220] sm:$0xff] %v1709_v26  ;;  %v1461_v48 = vmul.f32 %v4131_v25, %v5697_v34  ;;  %v1462_v50 = vmul.f32 %v4131_v25, %v5798_v15  ;;  %v1463_v62 = vmul.f32 %v4131_v25, %v5808_v32  ;;  %v1375_v15 = vmax.f32 %v6184_v38, 1e-24  ;;  %v1609_v7 = vld [vmem:[#allocation2 + $0x2e8] sm:$0xff] }
 0x193   : > { %1838 = vst [vmem:[#allocation2 + $0x70] sm:$0xff] %v1710_v9  ;;  %1839 = vst [vmem:[#allocation2 + $0x300] sm:$0xff] %v1711_v63  ;;  %v1464_v26 = vmul.f32 %v4131_v25, %v5824_v2  ;;  %v1465_v37 = vmul.f32 %v4131_v25, %v5843_v51  ;;  %v1714_v3 = vadd.f32 %v1586_v18, %v1458_v58  ;;  %v1343_v32 = vrot.slane %v6186_v19, 4 }
 0x194   : > { %1840 = vst [vmem:[#allocation2 + $0xe0] sm:$0xff] %v1712_v16  ;;  %1841 = vst [vmem:[#allocation2 + $0x178] sm:$0xff] %v1713_v42  ;;  %v1715_v29 = vadd.f32 %v1587_v8, %v1459_v54  ;;  %v1716_v27 = vadd.f32 %v1588_v17, %v1460_v44  ;;  %v1717_v12 = vadd.f32 %v1589_v10, %v1461_v48  ;;  %4132 = vrsqrt.f32 %v1375_v15  ;;  %v7846_v8 = vld [vmem:[#allocation133_spill] sm:$0xff]  ;;  %v1595_v54 = vld [vmem:[#allocation2 + $0x3a8] sm:$0xff] }
 0x195   : > { %v1718_v34 = vadd.f32 %v1590_v0, %v1462_v50  ;;  %v1719_v14 = vadd.f32 %v1591_v61, %v1463_v62  ;;  %v1720_v40 = vadd.f32 %v1592_v1, %v1464_v26  ;;  %v1721_v41 = vadd.f32 %v1593_v59, %v1465_v37  ;;  %1842 = vst [vmem:[#allocation2 + $0x328] sm:$0xff] %v1714_v3  ;;  %v7845_v0 = vld [vmem:[#allocation132_spill] sm:$0xff]  ;;  %v1596_v44 = vld [vmem:[#allocation2 + $0x3c8] sm:$0xff]  ;;  %v1597_v48 = vld [vmem:[#allocation2 + $0x160] sm:$0xff] }
 0x196   : > { %1843 = vst [vmem:[#allocation2 + $0x260] sm:$0xff] %v1715_v29  ;;  %1844 = vst [vmem:[#allocation2 + $0x3b8] sm:$0xff] %v1716_v27  ;;  %v1197_v2 = vmul.f32 %v6173_v52, %v6173_v52  ;;  %v1357_v51 = vadd.f32 %v1356_v46, %v6182_v60  ;;  %v6216_v10 = vsel %vm945_vm0, %v7845_v0, 0.0  ;;  %v1344_v17 = vadd.f32 %v1343_v32, %v6186_v19  ;;  %v1598_v61 = vld [vmem:[#allocation2 + $0x2c8] sm:$0xff]  ;;  %v1599_v37 = vld [vmem:[#allocation2 + $0x210] sm:$0xff] }
 0x197   : > { %1845 = vst [vmem:[#allocation2 + $0x2b8] sm:$0xff] %v1717_v12  ;;  %1846 = vst [vmem:[#allocation2 + $0x248] sm:$0xff] %v1718_v34  ;;  %v1198_v42 = vmul.f32 %v6178_v6, %v6178_v6  ;;  %v6225_v60 = vsel %vm945_vm0, %v7846_v8, 0.0  ;;  %v1199_v38 = vmul.f32 %v6216_v10, %v6216_v10  ;;  %v1201_v23 = vmul.f32 %v6232_v21, %v6232_v21  ;;  %v1600_v3 = vld [vmem:[#allocation2 + $0x3d8] sm:$0xff]  ;;  %v1601_v29 = vld [vmem:[#allocation2 + $0x1e8] sm:$0xff] }
 0x198   : > { %1847 = vst [vmem:[#allocation2 + $0x40] sm:$0xff] %v1719_v14  ;;  %1848 = vst [vmem:[#allocation2 + $0x20] sm:$0xff] %v1720_v40  ;;  %v1358_v63 = vadd.f32 %v1357_v51, %v6190_v49  ;;  %v1345_v25 = vrot.slane %v1344_v17, 2  ;;  %v1200_v13 = vmul.f32 %v6225_v60, %v6225_v60  ;;  %v1603_v32 = vld [vmem:[#allocation2 + $0x1c8] sm:$0xff]  ;;  %v1604_v0 = vld [vmem:[#allocation2 + $0x2d0] sm:$0xff] }
 0x199   : > { %1849 = vst [vmem:[#allocation2 + $0xe8] sm:$0xff] %v1721_v41  ;;  %v7850_v8 = vld [vmem:[#allocation141_spill] sm:$0xff] }
 0x19a   : > { %v1359_v46 = vadd.f32 %v1358_v63, %v1197_v2  ;;  %v1346_v19 = vadd.f32 %v1345_v25, %v1344_v17  ;;  %v1605_v17 = vld [vmem:[#allocation2 + $0x1d0] sm:$0xff] }
 0x19c   : > { %v1360_v49 = vadd.f32 %v1359_v46, %v1198_v42  ;;  %v1347_v22 = vrot.slane %v1346_v19, 1  ;;  %v1606_v42 = vld [vmem:[#allocation2 + $0x58] sm:$0xff] }
 0x19d   : > { %v1608_v46 = vld [vmem:[#allocation2 + $0x198] sm:$0xff] }
 0x19e   : > { %v1361_v18 = vadd.f32 %v1360_v49, %v1199_v38  ;;  %v1348_v9 = vadd.f32 %v1347_v22, %v1346_v19  ;;  %v1607_v38 = vld [vmem:[#allocation2 + $0x120] sm:$0xff]  ;;  %v7851_v19 = vld [vmem:[#allocation138_spill] sm:$0xff] }
 0x1a0   : > { %v1362_v16 = vadd.f32 %v1361_v18, %v1200_v13  ;;  %v1376_v53 = vmax.f32 %v1348_v9, 1e-24 }
 0x1a1   : > { %v4133_v55 = vpop.eup %4132 }
 0x1a2   : > { %v6238_v58 = vadd.f32 %v1362_v16, %v1201_v23  ;;  %4134 = vrsqrt.f32 %v1376_v53  ;;  %v1466_v59 = vmul.f32 %v4133_v55, %v5718_v39  ;;  %v1467_v50 = vmul.f32 %v4133_v55, %v5723_v4  ;;  %v1602_v4 = vld [vmem:[#allocation2 + $0x1b0] sm:$0xff] }
 0x1a3   : > { %v1468_v62 = vmul.f32 %v4133_v55, %v5728_v47  ;;  %v1469_v26 = vmul.f32 %v4133_v55, %v5739_v33  ;;  %v1470_v27 = vmul.f32 %v4133_v55, %v5815_v43  ;;  %v1471_v12 = vmul.f32 %v4133_v55, %v5831_v31  ;;  %v7848_v31 = vld [vmem:[#allocation139_spill] sm:$0xff] }
 0x1a4   : > { %v1364_v1 = vrot.slane %v6238_v58, 4  ;;  %v1472_v34 = vmul.f32 %v4133_v55, %v5836_v28  ;;  %v1473_v14 = vmul.f32 %v4133_v55, %v5854_v57  ;;  %v1722_v40 = vadd.f32 %v1594_v45, %v1466_v59  ;;  %v7849_v57 = vld [vmem:[#allocation140_spill] sm:$0xff]  ;;  %v1614_v59 = vld [vmem:[#allocation2 + $0x1a0] sm:$0xff] }
 0x1a5   : > { %v1723_v41 = vadd.f32 %v1595_v54, %v1467_v50  ;;  %v1724_v39 = vadd.f32 %v1596_v44, %v1468_v62  ;;  %v1725_v15 = vadd.f32 %v1597_v48, %v1469_v26  ;;  %v1726_v47 = vadd.f32 %v1598_v61, %v1470_v27  ;;  %v1613_v61 = vld [vmem:[#allocation2 + $0x390] sm:$0xff] }
 0x1a6   : > { %v1727_v2 = vadd.f32 %v1599_v37, %v1471_v12  ;;  %v1728_v33 = vadd.f32 %v1600_v3, %v1472_v34  ;;  %v1729_v51 = vadd.f32 %v1601_v29, %v1473_v14  ;;  %1850 = vst [vmem:[#allocation2 + $0x288] sm:$0xff] %v1722_v40  ;;  %v1474_v43 = vmul.f32 %v4133_v55, %v5873_v24  ;;  %v7852_v62 = vld [vmem:[#allocation135_spill] sm:$0xff]  ;;  %v7853_v37 = vld [vmem:[#allocation136_spill] sm:$0xff]  ;;  %v1615_v12 = vld [vmem:[#allocation2 + $0xa8] sm:$0xff] }
 0x1a7   : > { %1851 = vst [vmem:[#allocation2 + $0x3a8] sm:$0xff] %v1723_v41  ;;  %1852 = vst [vmem:[#allocation2 + $0x3c8] sm:$0xff] %v1724_v39  ;;  %v1475_v28 = vmul.f32 %v4133_v55, %v7848_v31  ;;  %v1476_v63 = vmul.f32 %v4133_v55, %v7849_v57  ;;  %v1477_v25 = vmul.f32 %v4133_v55, %v7850_v8  ;;  %v7854_v29 = vld [vmem:[#allocation143_spill] sm:$0xff]  ;;  %v1616_v34 = vld [vmem:[#allocation2 + $0x258] sm:$0xff] }
 0x1a8   : > { %1853 = vst [vmem:[#allocation2 + $0x160] sm:$0xff] %v1725_v15  ;;  %1854 = vst [vmem:[#allocation2 + $0x2c8] sm:$0xff] %v1726_v47  ;;  %v1478_v13 = vmul.f32 %v4133_v55, %v7851_v19  ;;  %v1479_v49 = vmul.f32 %v4133_v55, %v5914_v35  ;;  %v1480_v22 = vmul.f32 %v4133_v55, %v5919_v36  ;;  %v1610_v35 = vld [vmem:[#allocation2 + $0x1f8] sm:$0xff]  ;;  %v7856_v40 = vld [vmem:[#allocation142_spill] sm:$0xff] }
 0x1a9   : > { %1855 = vst [vmem:[#allocation2 + $0x210] sm:$0xff] %v1727_v2  ;;  %1856 = vst [vmem:[#allocation2 + $0x3d8] sm:$0xff] %v1728_v33  ;;  %v1481_v24 = vmul.f32 %v4133_v55, %v5971_v20  ;;  %v1730_v23 = vadd.f32 %v1602_v4, %v1474_v43  ;;  %v1731_v18 = vadd.f32 %v1603_v32, %v1475_v28  ;;  %v1611_v36 = vld [vmem:[#allocation2 + $0x238] sm:$0xff]  ;;  %v1620_v57 = vld [vmem:[#allocation2 + $0x170] sm:$0xff] }
 0x1aa   : > { %1857 = vst [vmem:[#allocation2 + $0x1e8] sm:$0xff] %v1729_v51  ;;  %v1732_v9 = vadd.f32 %v1604_v0, %v1476_v63  ;;  %v1733_v16 = vadd.f32 %v1605_v17, %v1477_v25  ;;  %v1734_v53 = vadd.f32 %v1606_v42, %v1478_v13  ;;  %v1735_v45 = vadd.f32 %v1607_v38, %v1479_v49  ;;  %v1612_v55 = vld [vmem:[#allocation2 + $0x398] sm:$0xff]  ;;  %v1618_v0 = vld [vmem:[#allocation2 + $0xf0] sm:$0xff]  ;;  %v1619_v17 = vld [vmem:[#allocation2 + $0x180] sm:$0xff] }
 0x1ab   : > { %v1736_v54 = vadd.f32 %v1608_v46, %v1480_v22  ;;  %v1737_v44 = vadd.f32 %v1609_v7, %v1481_v24  ;;  %1858 = vst [vmem:[#allocation2 + $0x1b0] sm:$0xff] %v1730_v23  ;;  %1859 = vst [vmem:[#allocation2 + $0x1c8] sm:$0xff] %v1731_v18  ;;  %v6258_v48 = vadd.f32 %v1364_v1, %v6238_v58  ;;  %v7855_v58 = vld [vmem:[#allocation137_spill] sm:$0xff]  ;;  %v1617_v14 = vld [vmem:[#allocation2 + $0x2d8] sm:$0xff] }
 0x1ac   : > { %1860 = vst [vmem:[#allocation2 + $0x2d0] sm:$0xff] %v1732_v9  ;;  %1861 = vst [vmem:[#allocation2 + $0x1d0] sm:$0xff] %v1733_v16  ;;  %v7857_v39 = vld [vmem:[#allocation144_spill] sm:$0xff]  ;;  %v1621_v63 = vld [vmem:[#allocation2 + $0x3d0] sm:$0xff] }
 0x1ad   : > { %1862 = vst [vmem:[#allocation2 + $0x58] sm:$0xff] %v1734_v53  ;;  %1863 = vst [vmem:[#allocation2 + $0x120] sm:$0xff] %v1735_v45  ;;  %v1366_v50 = vrot.slane %v6258_v48, 2  ;;  %v1622_v8 = vld [vmem:[#allocation2 + $0x250] sm:$0xff]  ;;  %v7858_v25 = vld [vmem:[#allocation145_spill] sm:$0xff] }
 0x1ae   : > { %1864 = vst [vmem:[#allocation2 + $0x198] sm:$0xff] %v1736_v54  ;;  %1865 = vst [vmem:[#allocation2 + $0x2e8] sm:$0xff] %v1737_v44  ;;  %v7859_v46 = vld [vmem:[#allocation149_spill] sm:$0xff]  ;;  %v1623_v19 = vld [vmem:[#allocation2 + $0x378] sm:$0xff] }
 0x1af   : > { %v4135_v20 = vpop.eup %4134  ;;  %v1624_v13 = vld [vmem:[#allocation2 + $0xb8] sm:$0xff]  ;;  %v7861_v23 = vld [vmem:[#allocation154_spill] sm:$0xff] }
 0x1b0   : > { %v1482_v26 = vmul.f32 %v4135_v20, %v7852_v62  ;;  %v1483_v3 = vmul.f32 %v4135_v20, %v7853_v37  ;;  %v1484_v27 = vmul.f32 %v4135_v20, %v7854_v29  ;;  %v1485_v1 = vmul.f32 %v4135_v20, %v7855_v58  ;;  %v1625_v49 = vld [vmem:[#allocation2 + $0x38] sm:$0xff]  ;;  %v1629_v58 = vld [vmem:[#allocation2 + $0xc8] sm:$0xff] }
 0x1b1   : > { %v1486_v41 = vmul.f32 %v4135_v20, %v7856_v40  ;;  %v1487_v15 = vmul.f32 %v4135_v20, %v7857_v39  ;;  %v1488_v4 = vmul.f32 %v4135_v20, %v5988_v56  ;;  %v1489_v32 = vmul.f32 %v4135_v20, %v5993_v5  ;;  %v7860_v22 = vld [vmem:[#allocation152_spill] sm:$0xff] }
 0x1b2   : > { %v1738_v47 = vadd.f32 %v1610_v35, %v1482_v26  ;;  %v1739_v2 = vadd.f32 %v1611_v36, %v1483_v3  ;;  %v1740_v33 = vadd.f32 %v1612_v55, %v1484_v27  ;;  %v1741_v51 = vadd.f32 %v1613_v61, %v1485_v1  ;;  %v7862_v9 = vld [vmem:[#allocation156_spill] sm:$0xff]  ;;  %v1627_v3 = vld [vmem:[#allocation2 + $0x308] sm:$0xff]  ;;  %v1628_v27 = vld [vmem:[#allocation2 + $0x370] sm:$0xff] }
 0x1b3   : > { %v1742_v42 = vadd.f32 %v1614_v59, %v1486_v41  ;;  %v1743_v43 = vadd.f32 %v1615_v12, %v1487_v15  ;;  %v1744_v31 = vadd.f32 %v1616_v34, %v1488_v4  ;;  %v1745_v28 = vadd.f32 %v1617_v14, %v1489_v32  ;;  %v1626_v37 = vld [vmem:[#allocation2 + $0x78] sm:$0xff]  ;;  %v7864_v12 = vld [vmem:[#allocation147_spill] sm:$0xff]  ;;  %v7866_v41 = vld [vmem:[#allocation146_spill] sm:$0xff] }
 0x1b4   : > { %1866 = vst [vmem:[#allocation2 + $0x1f8] sm:$0xff] %v1738_v47  ;;  %1867 = vst [vmem:[#allocation2 + $0x238] sm:$0xff] %v1739_v2  ;;  %v1490_v56 = vmul.f32 %v4135_v20, %v5998_v11  ;;  %v1491_v5 = vmul.f32 %v4135_v20, %v6039_v30  ;;  %v1492_v38 = vmul.f32 %v4135_v20, %v7858_v25  ;;  %v7863_v11 = vld [vmem:[#allocation158_spill] sm:$0xff]  ;;  %v1630_v1 = vld [vmem:[#allocation2 + $0x278] sm:$0xff] }
 0x1b5   : > { %1868 = vst [vmem:[#allocation2 + $0x398] sm:$0xff] %v1740_v33  ;;  %1869 = vst [vmem:[#allocation2 + $0x390] sm:$0xff] %v1741_v51  ;;  %v1493_v7 = vmul.f32 %v4135_v20, %v7859_v46  ;;  %v1494_v24 = vmul.f32 %v4135_v20, %v7860_v22  ;;  %v1495_v18 = vmul.f32 %v4135_v20, %v7861_v23  ;;  %v7865_v14 = vld [vmem:[#allocation148_spill] sm:$0xff]  ;;  %v1631_v15 = vld [vmem:[#allocation2 + $0x360] sm:$0xff] }
 0x1b6   : > { %1870 = vst [vmem:[#allocation2 + $0x1a0] sm:$0xff] %v1742_v42  ;;  %1871 = vst [vmem:[#allocation2 + $0xa8] sm:$0xff] %v1743_v43  ;;  %v1496_v16 = vmul.f32 %v4135_v20, %v7862_v9  ;;  %v1497_v53 = vmul.f32 %v4135_v20, %v7863_v11  ;;  %v1746_v30 = vadd.f32 %v1618_v0, %v1490_v56  ;;  %v1632_v4 = vld [vmem:[#allocation2 + $0x228] sm:$0xff]  ;;  %v7868_v47 = vld [vmem:[#allocation151_spill] sm:$0xff] }
 0x1b7   : > { %1872 = vst [vmem:[#allocation2 + $0x258] sm:$0xff] %v1744_v31  ;;  %1873 = vst [vmem:[#allocation2 + $0x2d8] sm:$0xff] %v1745_v28  ;;  %v1747_v45 = vadd.f32 %v1619_v17, %v1491_v5  ;;  %v1748_v54 = vadd.f32 %v1620_v57, %v1492_v38  ;;  %v1749_v44 = vadd.f32 %v1621_v63, %v1493_v7  ;;  %v1633_v32 = vld [vmem:[#allocation2 + $0x348] sm:$0xff]  ;;  %v7869_v33 = vld [vmem:[#allocation153_spill] sm:$0xff] }
 0x1b8   : > { %v1750_v35 = vadd.f32 %v1622_v8, %v1494_v24  ;;  %v1751_v36 = vadd.f32 %v1623_v19, %v1495_v18  ;;  %v1752_v55 = vadd.f32 %v1624_v13, %v1496_v16  ;;  %v1753_v61 = vadd.f32 %v1625_v49, %v1497_v53  ;;  %1874 = vst [vmem:[#allocation2 + $0xf0] sm:$0xff] %v1746_v30  ;;  %v7870_v0 = vld [vmem:[#allocation155_spill] sm:$0xff]  ;;  %v7871_v42 = vld [vmem:[#allocation157_spill] sm:$0xff]  ;;  %v1634_v8 = vld [vmem:[#allocation2 + $0x148] sm:$0xff] }
 0x1b9   : > { %1875 = vst [vmem:[#allocation2 + $0x180] sm:$0xff] %v1747_v45  ;;  %1876 = vst [vmem:[#allocation2 + $0x170] sm:$0xff] %v1748_v54  ;;  %v1367_v59 = vadd.f32 %v1366_v50, %v6258_v48  ;;  %v7867_v50 = vld [vmem:[#allocation150_spill] sm:$0xff]  ;;  %v1635_v56 = vld [vmem:[#allocation2 + $0xf8] sm:$0xff] }
 0x1ba   : > { %1877 = vst [vmem:[#allocation2 + $0x3d0] sm:$0xff] %v1749_v44  ;;  %1878 = vst [vmem:[#allocation2 + $0x250] sm:$0xff] %v1750_v35  ;;  %v1636_v7 = vld [vmem:[#allocation2 + $0x68] sm:$0xff]  ;;  %v1637_v19 = vld [vmem:[#allocation2] sm:$0xff] }
 0x1bb   : > { %1879 = vst [vmem:[#allocation2 + $0x378] sm:$0xff] %v1751_v36  ;;  %1880 = vst [vmem:[#allocation2 + $0xb8] sm:$0xff] %v1752_v55  ;;  %v1368_v62 = vrot.slane %v1367_v59, 1  ;;  %v1638_v13 = vld [vmem:[#allocation2 + $0x298] sm:$0xff]  ;;  %v7872_v49 = vld [vmem:[#allocation159_spill] sm:$0xff] }
 0x1bc   : > { %1881 = vst [vmem:[#allocation2 + $0x38] sm:$0xff] %v1753_v61  ;;  %v7873_v24 = vld [vmem:[#allocation162_spill] sm:$0xff]  ;;  %v7874_v18 = vld [vmem:[#allocation163_spill] sm:$0xff] }
 0x1bd   : > { %v1369_v20 = vadd.f32 %v1368_v62, %v1367_v59  ;;  %v1639_v11 = vld [vmem:[#allocation2 + $0x270] sm:$0xff] }
 0x1be   : > { %v1640_v53 = vld [vmem:[#allocation2 + $0x310] sm:$0xff] }
 0x1bf   : > { %v1377_v26 = vmax.f32 %v1369_v20, 1e-24  ;;  %v1641_v30 = vld [vmem:[#allocation2 + $0x190] sm:$0xff] }
 0x1c1   : > { %4136 = vrsqrt.f32 %v1377_v26 }
 0x1ce   : > { %v4137_v29 = vpop.eup %4136 }
 0x1cf   : > { %v1498_v34 = vmul.f32 %v4137_v29, %v7864_v12  ;;  %v1499_v40 = vmul.f32 %v4137_v29, %v7865_v14  ;;  %v1500_v48 = vmul.f32 %v4137_v29, %v7866_v41  ;;  %v1501_v39 = vmul.f32 %v4137_v29, %v7867_v50 }
 0x1d0   : > { %v1502_v2 = vmul.f32 %v4137_v29, %v7868_v47  ;;  %v1503_v51 = vmul.f32 %v4137_v29, %v7869_v33  ;;  %v1504_v17 = vmul.f32 %v4137_v29, %v7870_v0  ;;  %v1505_v43 = vmul.f32 %v4137_v29, %v7871_v42 }
 0x1d1   : > { %v1754_v31 = vadd.f32 %v1626_v37, %v1498_v34  ;;  %v1755_v28 = vadd.f32 %v1627_v3, %v1499_v40  ;;  %v1756_v57 = vadd.f32 %v1628_v27, %v1500_v48  ;;  %v1757_v63 = vadd.f32 %v1629_v58, %v1501_v39 }
 0x1d2   : > { %v1758_v5 = vadd.f32 %v1630_v1, %v1502_v2  ;;  %v1759_v25 = vadd.f32 %v1631_v15, %v1503_v51  ;;  %v1760_v38 = vadd.f32 %v1632_v4, %v1504_v17  ;;  %v1761_v46 = vadd.f32 %v1633_v32, %v1505_v43 }
 0x1d3   : > { %1882 = vst [vmem:[#allocation2 + $0x78] sm:$0xff] %v1754_v31  ;;  %1883 = vst [vmem:[#allocation2 + $0x308] sm:$0xff] %v1755_v28  ;;  %v1506_v22 = vmul.f32 %v4137_v29, %v7872_v49  ;;  %v1507_v23 = vmul.f32 %v4137_v29, %v7873_v24  ;;  %v1508_v9 = vmul.f32 %v4137_v29, %v7874_v18 }
 0x1d4   : > { %1884 = vst [vmem:[#allocation2 + $0x370] sm:$0xff] %v1756_v57  ;;  %1885 = vst [vmem:[#allocation2 + $0xc8] sm:$0xff] %v1757_v63  ;;  %v1509_v16 = vmul.f32 %v4137_v29, %v6173_v52  ;;  %v1510_v45 = vmul.f32 %v4137_v29, %v6178_v6  ;;  %v1511_v54 = vmul.f32 %v4137_v29, %v6216_v10 }
 0x1d5   : > { %1886 = vst [vmem:[#allocation2 + $0x278] sm:$0xff] %v1758_v5  ;;  %1887 = vst [vmem:[#allocation2 + $0x360] sm:$0xff] %v1759_v25  ;;  %v1512_v44 = vmul.f32 %v4137_v29, %v6225_v60  ;;  %v1513_v35 = vmul.f32 %v4137_v29, %v6232_v21  ;;  %v1762_v36 = vadd.f32 %v1634_v8, %v1506_v22 }
 0x1d6   : > { %1888 = vst [vmem:[#allocation2 + $0x228] sm:$0xff] %v1760_v38  ;;  %1889 = vst [vmem:[#allocation2 + $0x348] sm:$0xff] %v1761_v46  ;;  %v1763_v55 = vadd.f32 %v1635_v56, %v1507_v23  ;;  %v1764_v61 = vadd.f32 %v1636_v7, %v1508_v9  ;;  %v1765_v59 = vadd.f32 %v1637_v19, %v1509_v16 }
 0x1d7   : > { %v1766_v52 = vadd.f32 %v1638_v13, %v1510_v45  ;;  %v1767_v62 = vadd.f32 %v1639_v11, %v1511_v54  ;;  %v1768_v20 = vadd.f32 %v1640_v53, %v1512_v44  ;;  %v1769_v26 = vadd.f32 %v1641_v30, %v1513_v35  ;;  %1890 = vst [vmem:[#allocation2 + $0x148] sm:$0xff] %v1762_v36 }
 0x1d8   : > { %1891 = vst [vmem:[#allocation2 + $0xf8] sm:$0xff] %v1763_v55  ;;  %1892 = vst [vmem:[#allocation2 + $0x68] sm:$0xff] %v1764_v61 }
 0x1d9   : > { %1893 = vst [vmem:[#allocation2] sm:$0xff] %v1765_v59  ;;  %1894 = vst [vmem:[#allocation2 + $0x298] sm:$0xff] %v1766_v52 }
 0x1da   : > { %1895 = vst [vmem:[#allocation2 + $0x270] sm:$0xff] %v1767_v62  ;;  %1896 = vst [vmem:[#allocation2 + $0x310] sm:$0xff] %v1768_v20 }
 0x1db   : > { %1897 = vst [vmem:[#allocation2 + $0x190] sm:$0xff] %v1769_v26 }
 0x1dc PF: > { %p4027_p5 = scmp.eq.s32.totalorder %s4246_s11, 2 }
 0x1de   : > { %1901 = sbr.rel (%p4027_p5) target bundleno = 662 (0x296), region = 74 }
 0x1e3   : > { %v7875_v6 = vld [vmem:[#allocation7_spill] sm:$0xff]  ;;  %v7876_v60 = vld [vmem:[#allocation8_spill] sm:$0xff]  ;;  %v7877_v37 = vld [vmem:[#allocation9_spill] sm:$0xff] }
 0x1e4   : > { %v1902_v10 = vmul.f32 %v7875_v6, %v7875_v6  ;;  %v1903_v21 = vmul.f32 %v7876_v60, %v7876_v60  ;;  %v1904_v3 = vmul.f32 %v7877_v37, %v7877_v37  ;;  %v7878_v29 = vld [vmem:[#allocation10_spill] sm:$0xff]  ;;  %v7879_v1 = vld [vmem:[#allocation23_spill] sm:$0xff]  ;;  %v7880_v34 = vld [vmem:[#allocation24_spill] sm:$0xff] }
 0x1e5   : > { %v1905_v27 = vmul.f32 %v7878_v29, %v7878_v29  ;;  %v1918_v12 = vmul.f32 %v7879_v1, %v7879_v1  ;;  %v1919_v14 = vmul.f32 %v7880_v34, %v7880_v34  ;;  %v7881_v40 = vld [vmem:[#allocation11_spill] sm:$0xff]  ;;  %v7882_v50 = vld [vmem:[#allocation25_spill] sm:$0xff]  ;;  %v7883_v15 = vld [vmem:[#allocation12_spill] sm:$0xff] }
 0x1e6   : > { %v2030_v58 = vadd.f32 %v1903_v21, %v1902_v10  ;;  %v1906_v41 = vmul.f32 %v7881_v40, %v7881_v40  ;;  %v1920_v39 = vmul.f32 %v7882_v50, %v7882_v50  ;;  %v1907_v4 = vmul.f32 %v7883_v15, %v7883_v15  ;;  %v7884_v32 = vld [vmem:[#allocation13_spill] sm:$0xff]  ;;  %v7885_v2 = vld [vmem:[#allocation14_spill] sm:$0xff]  ;;  %v7886_v51 = vld [vmem:[#allocation15_spill] sm:$0xff] }
 0x1e7   : > { %v1908_v47 = vmul.f32 %v7884_v32, %v7884_v32  ;;  %v1909_v33 = vmul.f32 %v7885_v2, %v7885_v2  ;;  %v1910_v0 = vmul.f32 %v7886_v51, %v7886_v51  ;;  %v7887_v17 = vld [vmem:[#allocation16_spill] sm:$0xff]  ;;  %v7888_v31 = vld [vmem:[#allocation26_spill] sm:$0xff]  ;;  %v2051_v57 = vadd.f32 %v1919_v14, %v1918_v12  ;;  %v7889_v63 = vld [vmem:[#allocation17_spill] sm:$0xff] }
 0x1e8   : > { %v2031_v48 = vadd.f32 %v2030_v58, %v1904_v3  ;;  %v1911_v42 = vmul.f32 %v7887_v17, %v7887_v17  ;;  %v1921_v28 = vmul.f32 %v7888_v31, %v7888_v31  ;;  %v1912_v8 = vmul.f32 %v7889_v63, %v7889_v63  ;;  %v7890_v56 = vld [vmem:[#allocation18_spill] sm:$0xff]  ;;  %v7891_v25 = vld [vmem:[#allocation19_spill] sm:$0xff]  ;;  %v7894_v24 = vld [vmem:[#allocation40_spill] sm:$0xff] }
 0x1e9   : > { %v1913_v5 = vmul.f32 %v7890_v56, %v7890_v56  ;;  %v6329_v38 = vmul.f32 %v7891_v25, %v7891_v25  ;;  %v7892_v46 = vld [vmem:[#allocation27_spill] sm:$0xff]  ;;  %v2052_v13 = vadd.f32 %v2051_v57, %v1920_v39  ;;  %v1935_v23 = vmul.f32 %v7894_v24, %v7894_v24  ;;  %v7895_v18 = vld [vmem:[#allocation20_spill] sm:$0xff]  ;;  %v7896_v16 = vld [vmem:[#allocation21_spill] sm:$0xff] }
 0x1ea   : > { %v2032_v43 = vadd.f32 %v2031_v48, %v1905_v27  ;;  %v1922_v7 = vmul.f32 %v7892_v46, %v7892_v46  ;;  %v7893_v49 = vld [vmem:[#allocation39_spill] sm:$0xff]  ;;  %v6339_v9 = vmul.f32 %v7895_v18, %v7895_v18  ;;  %v6343_v11 = vmul.f32 %v7896_v16, %v7896_v16  ;;  %v7897_v53 = vld [vmem:[#allocation22_spill] sm:$0xff]  ;;  %v7898_v45 = vld [vmem:[#allocation28_spill] sm:$0xff] }
 0x1eb   : > { %v1934_v22 = vmul.f32 %v7893_v49, %v7893_v49  ;;  %v6347_v30 = vmul.f32 %v7897_v53, %v7897_v53  ;;  %v1923_v54 = vmul.f32 %v7898_v45, %v7898_v45  ;;  %v7899_v35 = vld [vmem:[#allocation29_spill] sm:$0xff]  ;;  %v2053_v55 = vadd.f32 %v2052_v13, %v1921_v28  ;;  %v7901_v52 = vld [vmem:[#allocation30_spill] sm:$0xff]  ;;  %v7902_v20 = vld [vmem:[#allocation31_spill] sm:$0xff] }
 0x1ec   : > { %v2033_v19 = vadd.f32 %v2032_v43, %v1906_v41  ;;  %v1924_v36 = vmul.f32 %v7899_v35, %v7899_v35  ;;  %v7900_v61 = vld [vmem:[#allocation41_spill] sm:$0xff]  ;;  %v1925_v62 = vmul.f32 %v7901_v52, %v7901_v52  ;;  %v1926_v26 = vmul.f32 %v7902_v20, %v7902_v20  ;;  %v7903_v10 = vld [vmem:[#allocation32_spill] sm:$0xff]  ;;  %v7905_v14 = vld [vmem:[#allocation42_spill] sm:$0xff] }
 0x1ed   : > { %v1936_v59 = vmul.f32 %v7900_v61, %v7900_v61  ;;  %v1927_v21 = vmul.f32 %v7903_v10, %v7903_v10  ;;  %v7904_v3 = vld [vmem:[#allocation33_spill] sm:$0xff]  ;;  %v2054_v12 = vadd.f32 %v2053_v55, %v1922_v7  ;;  %v1937_v41 = vmul.f32 %v7905_v14, %v7905_v14  ;;  %v7906_v39 = vld [vmem:[#allocation34_spill] sm:$0xff]  ;;  %v7907_v43 = vld [vmem:[#allocation35_spill] sm:$0xff] }
 0x1ee   : > { %v2034_v44 = vadd.f32 %v2033_v19, %v1907_v4  ;;  %v1928_v27 = vmul.f32 %v7904_v3, %v7904_v3  ;;  %v2072_v48 = vadd.f32 %v1935_v23, %v1934_v22  ;;  %v1929_v4 = vmul.f32 %v7906_v39, %v7906_v39  ;;  %v7908_v57 = vld [vmem:[#allocation36_spill] sm:$0xff]  ;;  %v7909_v13 = vld [vmem:[#allocation37_spill] sm:$0xff]  ;;  %v7911_v23 = vld [vmem:[#allocation38_spill] sm:$0xff] }
 0x1ef   : > { %v1930_v28 = vmul.f32 %v7907_v43, %v7907_v43  ;;  %v6371_v19 = vmul.f32 %v7908_v57, %v7908_v57  ;;  %v6375_v61 = vmul.f32 %v7909_v13, %v7909_v13  ;;  %v2055_v7 = vadd.f32 %v2054_v12, %v1923_v54  ;;  %v7912_v24 = vld [vmem:[#allocation44_spill] sm:$0xff]  ;;  %v7913_v43 = vld [vmem:[#allocation55_spill] sm:$0xff]  ;;  %v7915_v54 = vld [vmem:[#allocation45_spill] sm:$0xff] }
 0x1f0   : > { %v2035_v58 = vadd.f32 %v2034_v44, %v1908_v47  ;;  %v7910_v44 = vld [vmem:[#allocation43_spill] sm:$0xff]  ;;  %v2073_v22 = vadd.f32 %v2072_v48, %v1936_v59  ;;  %v6381_v14 = vmul.f32 %v7911_v23, %v7911_v23  ;;  %v1939_v49 = vmul.f32 %v7912_v24, %v7912_v24  ;;  %v7914_v39 = vld [vmem:[#allocation56_spill] sm:$0xff]  ;;  %v7916_v59 = vld [vmem:[#allocation46_spill] sm:$0xff] }
 0x1f1   : > { %v1938_v55 = vmul.f32 %v7910_v44, %v7910_v44  ;;  %v1950_v57 = vmul.f32 %v7913_v43, %v7913_v43  ;;  %v1951_v13 = vmul.f32 %v7914_v39, %v7914_v39  ;;  %v1941_v48 = vmul.f32 %v7916_v59, %v7916_v59  ;;  %v7917_v44 = vld [vmem:[#allocation47_spill] sm:$0xff]  ;;  %v7918_v10 = vld [vmem:[#allocation48_spill] sm:$0xff]  ;;  %v7919_v20 = vld [vmem:[#allocation57_spill] sm:$0xff] }
 0x1f2   : > { %v2036_v47 = vadd.f32 %v2035_v58, %v1909_v33  ;;  %v2056_v33 = vadd.f32 %v2055_v7, %v1924_v36  ;;  %v1940_v58 = vmul.f32 %v7915_v54, %v7915_v54  ;;  %v2074_v12 = vadd.f32 %v2073_v22, %v1937_v41  ;;  %v7921_v7 = vld [vmem:[#allocation50_spill] sm:$0xff]  ;;  %v7922_v22 = vld [vmem:[#allocation51_spill] sm:$0xff]  ;;  %v7924_v46 = vld [vmem:[#allocation52_spill] sm:$0xff] }
 0x1f3   : > { %v1942_v23 = vmul.f32 %v7917_v44, %v7917_v44  ;;  %v1943_v24 = vmul.f32 %v7918_v10, %v7918_v10  ;;  %v1952_v43 = vmul.f32 %v7919_v20, %v7919_v20  ;;  %v1945_v41 = vmul.f32 %v7921_v7, %v7921_v7  ;;  %v7923_v54 = vld [vmem:[#allocation58_spill] sm:$0xff]  ;;  %v7927_v20 = vld [vmem:[#allocation59_spill] sm:$0xff]  ;;  %v7931_v7 = vld [vmem:[#allocation72_spill] sm:$0xff] }
 0x1f4   : > { %v2037_v3 = vadd.f32 %v2036_v47, %v1910_v0  ;;  %v2057_v39 = vadd.f32 %v2056_v33, %v1925_v62  ;;  %v7920_v0 = vld [vmem:[#allocation49_spill] sm:$0xff]  ;;  %v2075_v47 = vadd.f32 %v2074_v12, %v1938_v55  ;;  %v1946_v59 = vmul.f32 %v7922_v22, %v7922_v22  ;;  %v7926_v33 = vld [vmem:[#allocation54_spill] sm:$0xff] }
 0x1f5   : > { %v1944_v36 = vmul.f32 %v7920_v0, %v7920_v0  ;;  %v1953_v44 = vmul.f32 %v7923_v54, %v7923_v54  ;;  %v2093_v35 = vadd.f32 %v1951_v13, %v1950_v57  ;;  %v6417_v12 = vmul.f32 %v7926_v33, %v7926_v33  ;;  %v7929_v13 = vld [vmem:[#allocation61_spill] sm:$0xff] }
 0x1f6   : > { %v2038_v52 = vadd.f32 %v2037_v3, %v1911_v42  ;;  %v2058_v45 = vadd.f32 %v2057_v39, %v1926_v26  ;;  %v6409_v42 = vmul.f32 %v7924_v46, %v7924_v46  ;;  %v2076_v62 = vadd.f32 %v2075_v47, %v1939_v49  ;;  %v7925_v3 = vld [vmem:[#allocation53_spill] sm:$0xff]  ;;  %v7928_v26 = vld [vmem:[#allocation60_spill] sm:$0xff] }
 0x1f7   : > { %v6413_v55 = vmul.f32 %v7925_v3, %v7925_v3  ;;  %v1954_v22 = vmul.f32 %v7927_v20, %v7927_v20  ;;  %v2094_v54 = vadd.f32 %v2093_v35, %v1952_v43  ;;  %v1955_v39 = vmul.f32 %v7928_v26, %v7928_v26  ;;  %v7930_v3 = vld [vmem:[#allocation71_spill] sm:$0xff]  ;;  %v7934_v43 = vld [vmem:[#allocation64_spill] sm:$0xff] }
 0x1f8   : > { %v2039_v10 = vadd.f32 %v2038_v52, %v1912_v8  ;;  %v2059_v8 = vadd.f32 %v2058_v45, %v1927_v21  ;;  %v2077_v52 = vadd.f32 %v2076_v62, %v1940_v58  ;;  %v1956_v49 = vmul.f32 %v7929_v13, %v7929_v13 }
 0x1f9   : > { %v2095_v47 = vadd.f32 %v2094_v54, %v1953_v44  ;;  %v1966_v46 = vmul.f32 %v7930_v3, %v7930_v3  ;;  %v1967_v33 = vmul.f32 %v7931_v7, %v7931_v7  ;;  %v1959_v58 = vmul.f32 %v7934_v43, %v7934_v43  ;;  %v7935_v54 = vld [vmem:[#allocation73_spill] sm:$0xff] }
 0x1fa   : > { %v2040_v57 = vadd.f32 %v2039_v10, %v1913_v5  ;;  %v2060_v20 = vadd.f32 %v2059_v8, %v1928_v27  ;;  %v2078_v35 = vadd.f32 %v2077_v52, %v1941_v48  ;;  %v7932_v5 = vld [vmem:[#allocation62_spill] sm:$0xff]  ;;  %v7933_v10 = vld [vmem:[#allocation63_spill] sm:$0xff]  ;;  %v1968_v62 = vmul.f32 %v7935_v54, %v7935_v54 }
 0x1fb   : > { %v1957_v45 = vmul.f32 %v7932_v5, %v7932_v5  ;;  %v1958_v21 = vmul.f32 %v7933_v10, %v7933_v10  ;;  %v2096_v44 = vadd.f32 %v2095_v47, %v1954_v22  ;;  %v7937_v48 = vld [vmem:[#allocation66_spill] sm:$0xff]  ;;  %v2114_v5 = vadd.f32 %v1967_v33, %v1966_v46  ;;  %v7939_v54 = vld [vmem:[#allocation67_spill] sm:$0xff]  ;;  %v7942_v33 = vld [vmem:[#allocation69_spill] sm:$0xff] }
 0x1fc   : > { %v2041_v0 = vadd.f32 %v2040_v57, %v6329_v38  ;;  %v2061_v7 = vadd.f32 %v2060_v20, %v1929_v4  ;;  %v2079_v13 = vadd.f32 %v2078_v35, %v1942_v23  ;;  %v7936_v38 = vld [vmem:[#allocation65_spill] sm:$0xff]  ;;  %v1961_v57 = vmul.f32 %v7937_v48, %v7937_v48  ;;  %v7938_v52 = vld [vmem:[#allocation74_spill] sm:$0xff]  ;;  %v7940_v20 = vld [vmem:[#allocation68_spill] sm:$0xff] }
 0x1fd   : > { %v1960_v27 = vmul.f32 %v7936_v38, %v7936_v38  ;;  %v2097_v8 = vadd.f32 %v2096_v44, %v1955_v39  ;;  %v1969_v10 = vmul.f32 %v7938_v52, %v7938_v52  ;;  %v1963_v4 = vmul.f32 %v7940_v20, %v7940_v20 }
 0x1fe   : > { %v2042_v3 = vadd.f32 %v2041_v0, %v6339_v9  ;;  %v2062_v47 = vadd.f32 %v2061_v7, %v1930_v28  ;;  %v2080_v43 = vadd.f32 %v2079_v13, %v1943_v24  ;;  %v1962_v9 = vmul.f32 %v7939_v54, %v7939_v54  ;;  %v7941_v0 = vld [vmem:[#allocation75_spill] sm:$0xff]  ;;  %v7943_v24 = vld [vmem:[#allocation70_spill] sm:$0xff] }
 0x1ff   : > { %v2098_v23 = vadd.f32 %v2097_v8, %v1956_v49  ;;  %v1970_v35 = vmul.f32 %v7941_v0, %v7941_v0  ;;  %v2115_v48 = vadd.f32 %v2114_v5, %v1968_v62  ;;  %v6458_v28 = vmul.f32 %v7943_v24, %v7943_v24  ;;  %v7947_v0 = vld [vmem:[#allocation88_spill] sm:$0xff]  ;;  %v2354_v24 = vld [vmem:[#allocation2 + $0x320] sm:$0xff] }
 0x200   : > { %v2043_v22 = vadd.f32 %v2042_v3, %v6343_v11  ;;  %v2063_v44 = vadd.f32 %v2062_v47, %v6371_v19  ;;  %v2081_v46 = vadd.f32 %v2080_v43, %v1944_v36  ;;  %v1964_v11 = vmul.f32 %v7942_v33, %v7942_v33  ;;  %v7944_v3 = vld [vmem:[#allocation76_spill] sm:$0xff] }
 0x201   : > { %v2099_v7 = vadd.f32 %v2098_v23, %v1957_v45  ;;  %v1971_v13 = vmul.f32 %v7944_v3, %v7944_v3  ;;  %v2116_v49 = vadd.f32 %v2115_v48, %v1969_v10  ;;  %v1983_v52 = vmul.f32 %v7947_v0, %v7947_v0  ;;  %v7948_v10 = vld [vmem:[#allocation78_spill] sm:$0xff]  ;;  %v7951_v0 = vld [vmem:[#allocation80_spill] sm:$0xff] }
 0x202   : > { %v2044_v39 = vadd.f32 %v2043_v22, %v6347_v30  ;;  %v2064_v5 = vadd.f32 %v2063_v44, %v6375_v61  ;;  %v2082_v62 = vadd.f32 %v2081_v46, %v1945_v41  ;;  %v7945_v30 = vld [vmem:[#allocation77_spill] sm:$0xff]  ;;  %v7946_v22 = vld [vmem:[#allocation87_spill] sm:$0xff]  ;;  %v1973_v48 = vmul.f32 %v7948_v10, %v7948_v10 }
 0x203   : > { %v1972_v19 = vmul.f32 %v7945_v30, %v7945_v30  ;;  %v2100_v36 = vadd.f32 %v2099_v7, %v1958_v21  ;;  %v2117_v43 = vadd.f32 %v2116_v49, %v1970_v35  ;;  %v1982_v47 = vmul.f32 %v7946_v22, %v7946_v22  ;;  %v7949_v41 = vld [vmem:[#allocation79_spill] sm:$0xff]  ;;  %v7950_v21 = vld [vmem:[#allocation89_spill] sm:$0xff] }
 0x204   : > { %v2045_v8 = vrot.slane %v2044_v39, 4  ;;  %v2065_v23 = vadd.f32 %v2064_v5, %v6381_v14  ;;  %v2083_v3 = vadd.f32 %v2082_v62, %v1946_v59  ;;  %v1974_v44 = vmul.f32 %v7949_v41, %v7949_v41  ;;  %v7954_v30 = vld [vmem:[#allocation91_spill] sm:$0xff] }
 0x205   : > { %v2101_v61 = vadd.f32 %v2100_v36, %v1959_v58  ;;  %v2118_v46 = vadd.f32 %v2117_v43, %v1971_v13  ;;  %v1984_v35 = vmul.f32 %v7950_v21, %v7950_v21  ;;  %v2135_v58 = vadd.f32 %v1983_v52, %v1982_v47  ;;  %v7953_v43 = vld [vmem:[#allocation81_spill] sm:$0xff] }
 0x206   : > { %v2046_v45 = vadd.f32 %v2045_v8, %v2044_v39  ;;  %v2066_v49 = vrot.slane %v2065_v23, 4  ;;  %v2084_v22 = vadd.f32 %v2083_v3, %v6409_v42  ;;  %v1975_v39 = vmul.f32 %v7951_v0, %v7951_v0  ;;  %v7952_v8 = vld [vmem:[#allocation90_spill] sm:$0xff] }
 0x207   : > { %v2102_v14 = vadd.f32 %v2101_v61, %v1960_v27  ;;  %v2119_v59 = vadd.f32 %v2118_v46, %v1972_v19  ;;  %v1985_v5 = vmul.f32 %v7952_v8, %v7952_v8  ;;  %v1976_v21 = vmul.f32 %v7953_v43, %v7953_v43  ;;  %v7955_v61 = vld [vmem:[#allocation82_spill] sm:$0xff]  ;;  %v2353_v43 = vld [vmem:[#allocation2 + $0x98] sm:$0xff] }
 0x208   : > { %v2047_v7 = vrot.slane %v2046_v45, 2  ;;  %v2067_v36 = vadd.f32 %v2066_v49, %v2065_v23  ;;  %v2085_v13 = vadd.f32 %v2084_v22, %v6413_v55  ;;  %v1986_v42 = vmul.f32 %v7954_v30, %v7954_v30  ;;  %v7956_v23 = vld [vmem:[#allocation92_spill] sm:$0xff] }
 0x209   : > { %v2103_v41 = vadd.f32 %v2102_v14, %v1961_v57  ;;  %v2120_v10 = vadd.f32 %v2119_v59, %v1973_v48  ;;  %v2136_v3 = vadd.f32 %v2135_v58, %v1984_v35  ;;  %v1977_v52 = vmul.f32 %v7955_v61, %v7955_v61  ;;  %v7958_v59 = vld [vmem:[#allocation93_spill] sm:$0xff]  ;;  %v2352_v61 = vld [vmem:[#allocation2 + $0x118] sm:$0xff] }
 0x20a   : > { %v2048_v62 = vadd.f32 %v2047_v7, %v2046_v45  ;;  %v2068_v27 = vrot.slane %v2067_v36, 2  ;;  %v2086_v19 = vadd.f32 %v2085_v13, %v6417_v12  ;;  %v1987_v55 = vmul.f32 %v7956_v23, %v7956_v23  ;;  %v7957_v7 = vld [vmem:[#allocation83_spill] sm:$0xff] }
 0x20b   : > { %v2104_v47 = vadd.f32 %v2103_v41, %v1962_v9  ;;  %v2121_v45 = vadd.f32 %v2120_v10, %v1974_v44  ;;  %v2137_v22 = vadd.f32 %v2136_v3, %v1985_v5  ;;  %v1978_v49 = vmul.f32 %v7957_v7, %v7957_v7  ;;  %v7959_v10 = vld [vmem:[#allocation84_spill] sm:$0xff] }
 0x20c   : > { %v2049_v0 = vrot.slane %v2048_v62, 1  ;;  %v2069_v57 = vadd.f32 %v2068_v27, %v2067_v36  ;;  %v2087_v48 = vrot.slane %v2086_v19, 4  ;;  %v1988_v12 = vmul.f32 %v7958_v59, %v7958_v59  ;;  %v7971_v59 = vld [vmem:[#allocation99_spill] sm:$0xff] }
 0x20d   : > { %v2105_v35 = vadd.f32 %v2104_v47, %v1963_v4  ;;  %v2122_v14 = vadd.f32 %v2121_v45, %v1975_v39  ;;  %v2138_v58 = vadd.f32 %v2137_v22, %v1986_v42  ;;  %v1979_v41 = vmul.f32 %v7959_v10, %v7959_v10  ;;  %v7961_v39 = vld [vmem:[#allocation85_spill] sm:$0xff]  ;;  %v7962_v45 = vld [vmem:[#allocation95_spill] sm:$0xff] }
 0x20e   : > { %v2050_v46 = vadd.f32 %v2049_v0, %v2048_v62  ;;  %v2070_v30 = vrot.slane %v2069_v57, 1  ;;  %v2088_v9 = vadd.f32 %v2087_v48, %v2086_v19  ;;  %v7960_v0 = vld [vmem:[#allocation94_spill] sm:$0xff]  ;;  %v1980_v27 = vmul.f32 %v7961_v39, %v7961_v39 }
 0x20f   : > { %v2106_v44 = vadd.f32 %v2105_v35, %v1964_v11  ;;  %v2123_v5 = vadd.f32 %v2122_v14, %v1976_v21  ;;  %v1989_v62 = vmul.f32 %v7960_v0, %v7960_v0  ;;  %v2139_v36 = vadd.f32 %v2138_v58, %v1987_v55  ;;  %v7963_v21 = vld [vmem:[#allocation103_spill] sm:$0xff]  ;;  %v7964_v35 = vld [vmem:[#allocation104_spill] sm:$0xff]  ;;  %v2349_v39 = vld [vmem:[#allocation2 + $0x48] sm:$0xff] }
 0x210   : > { %v2198_v13 = vmax.f32 %v2050_v46, 1e-24  ;;  %v2071_v3 = vadd.f32 %v2070_v30, %v2069_v57  ;;  %v2089_v4 = vrot.slane %v2088_v9, 2  ;;  %v1990_v19 = vmul.f32 %v7962_v45, %v7962_v45  ;;  %v7965_v14 = vld [vmem:[#allocation96_spill] sm:$0xff] }
 0x211   : > { %v2107_v42 = vadd.f32 %v2106_v44, %v6458_v28  ;;  %v2124_v47 = vadd.f32 %v2123_v5, %v1977_v52  ;;  %v2140_v22 = vadd.f32 %v2139_v36, %v1988_v12  ;;  %v1998_v48 = vmul.f32 %v7963_v21, %v7963_v21  ;;  %v7966_v52 = vld [vmem:[#allocation86_spill] sm:$0xff]  ;;  %v7967_v5 = vld [vmem:[#allocation97_spill] sm:$0xff] }
 0x212   : > { %4138 = vrsqrt.f32 %v2198_v13  ;;  %v2199_v46 = vmax.f32 %v2071_v3, 1e-24  ;;  %v2090_v11 = vadd.f32 %v2089_v4, %v2088_v9  ;;  %v1999_v55 = vmul.f32 %v7964_v35, %v7964_v35  ;;  %v7968_v9 = vld [vmem:[#allocation105_spill] sm:$0xff]  ;;  %v7969_v21 = vld [vmem:[#allocation98_spill] sm:$0xff] }
 0x213   : > { %v2108_v30 = vrot.slane %v2107_v42, 4  ;;  %v2125_v57 = vadd.f32 %v2124_v47, %v1978_v49  ;;  %v1991_v58 = vmul.f32 %v7965_v14, %v7965_v14  ;;  %v2141_v13 = vadd.f32 %v2140_v22, %v1989_v62  ;;  %v7970_v14 = vld [vmem:[#allocation106_spill] sm:$0xff] }
 0x214   : > { %v2091_v28 = vrot.slane %v2090_v11, 1  ;;  %v1981_v44 = vmul.f32 %v7966_v52, %v7966_v52  ;;  %v1992_v12 = vmul.f32 %v7967_v5, %v7967_v5  ;;  %v2000_v36 = vmul.f32 %v7968_v9, %v7968_v9  ;;  %v7972_v9 = vld [vmem:[#allocation100_spill] sm:$0xff]  ;;  %v2348_v52 = vld [vmem:[#allocation2 + $0x330] sm:$0xff] }
 0x215   : > { %v2109_v3 = vadd.f32 %v2108_v30, %v2107_v42  ;;  %v2126_v4 = vadd.f32 %v2125_v57, %v1979_v41  ;;  %v1993_v35 = vmul.f32 %v7969_v21, %v7969_v21  ;;  %v2142_v49 = vadd.f32 %v2141_v13, %v1990_v19  ;;  %v7973_v42 = vld [vmem:[#allocation101_spill] sm:$0xff]  ;;  %v2347_v21 = vld [vmem:[#allocation2 + $0x368] sm:$0xff] }
 0x216   : > { %4140 = vrsqrt.f32 %v2199_v46  ;;  %v2092_v47 = vadd.f32 %v2091_v28, %v2090_v11  ;;  %v2001_v62 = vmul.f32 %v7970_v14, %v7970_v14  ;;  %v2156_v22 = vadd.f32 %v1999_v55, %v1998_v48  ;;  %v7974_v48 = vld [vmem:[#allocation107_spill] sm:$0xff]  ;;  %v7975_v55 = vld [vmem:[#allocation102_spill] sm:$0xff] }
 0x217   : > { %v2110_v45 = vrot.slane %v2109_v3, 2  ;;  %v2127_v0 = vadd.f32 %v2126_v4, %v1980_v27  ;;  %v1994_v5 = vmul.f32 %v7971_v59, %v7971_v59  ;;  %v2143_v23 = vadd.f32 %v2142_v49, %v1991_v58  ;;  %v7976_v58 = vld [vmem:[#allocation108_spill] sm:$0xff]  ;;  %v7977_v4 = vld [vmem:[#allocation109_spill] sm:$0xff] }
 0x218   : > { %v2200_v8 = vmax.f32 %v2092_v47, 1e-24  ;;  %v6524_v41 = vmul.f32 %v7972_v9, %v7972_v9  ;;  %v6528_v19 = vmul.f32 %v7973_v42, %v7973_v42  ;;  %v2157_v46 = vadd.f32 %v2156_v22, %v2000_v36  ;;  %v7979_v22 = vld [vmem:[#allocation119_spill] sm:$0xff] }
 0x219   : > { %v2111_v11 = vadd.f32 %v2110_v45, %v2109_v3  ;;  %v2128_v30 = vadd.f32 %v2127_v0, %v1981_v44  ;;  %v2144_v57 = vadd.f32 %v2143_v23, %v1992_v12  ;;  %v2002_v27 = vmul.f32 %v7974_v48, %v7974_v48  ;;  %v7978_v23 = vld [vmem:[#allocation110_spill] sm:$0xff]  ;;  %v2342_v12 = vld [vmem:[#allocation2 + $0x2b0] sm:$0xff] }
 0x21a   : > { %v6534_v13 = vmul.f32 %v7975_v55, %v7975_v55  ;;  %v6538_v28 = vmul.f32 %v7976_v58, %v7976_v58  ;;  %v6542_v49 = vmul.f32 %v7977_v4, %v7977_v4  ;;  %v2158_v47 = vadd.f32 %v2157_v46, %v2001_v62  ;;  %v2343_v3 = vld [vmem:[#allocation2 + $0x3b0] sm:$0xff]  ;;  %v7980_v58 = vld [vmem:[#allocation120_spill] sm:$0xff]  ;;  %v7981_v4 = vld [vmem:[#allocation121_spill] sm:$0xff] }
 0x21b   : > { %v2112_v36 = vrot.slane %v2111_v11, 1  ;;  %v2129_v45 = vrot.slane %v2128_v30, 4  ;;  %v2145_v0 = vadd.f32 %v2144_v57, %v1993_v35  ;;  %v6546_v44 = vmul.f32 %v7978_v23, %v7978_v23  ;;  %v2344_v46 = vld [vmem:[#allocation2 + $0xd8] sm:$0xff]  ;;  %v2346_v23 = vld [vmem:[#allocation2 + $0x50] sm:$0xff] }
 0x21c   : > { %4142 = vrsqrt.f32 %v2200_v8  ;;  %v6550_v48 = vmul.f32 %v7979_v22, %v7979_v22  ;;  %v6554_v14 = vmul.f32 %v7980_v58, %v7980_v58  ;;  %v6558_v62 = vmul.f32 %v7981_v4, %v7981_v4  ;;  %v2345_v57 = vld [vmem:[#allocation2 + $0x18] sm:$0xff] }
 0x21d   : > { %v6560_v55 = vadd.f32 %v2112_v36, %v2111_v11  ;;  %v6562_v42 = vadd.f32 %v2129_v45, %v2128_v30  ;;  %v6564_v8 = vadd.f32 %v2145_v0, %v1994_v5  ;;  %v6566_v22 = vadd.f32 %v2158_v47, %v2002_v27  ;;  %v2351_v0 = vld [vmem:[#allocation2 + $0x110] sm:$0xff] }
 0x21f   : > { %v4139_v35 = vpop.eup %4138 }
 0x220   : > { %v2214_v9 = vmul.f32 %v4139_v35, %v7875_v6  ;;  %v2215_v58 = vmul.f32 %v4139_v35, %v7876_v60  ;;  %v2216_v59 = vmul.f32 %v4139_v35, %v7877_v37  ;;  %v2217_v4 = vmul.f32 %v4139_v35, %v7878_v29  ;;  %v2350_v60 = vld [vmem:[#allocation2 + $0x380] sm:$0xff] }
 0x221   : > { %v2218_v11 = vmul.f32 %v4139_v35, %v7881_v40  ;;  %v2219_v30 = vmul.f32 %v4139_v35, %v7883_v15  ;;  %v2220_v5 = vmul.f32 %v4139_v35, %v7884_v32  ;;  %v2221_v27 = vmul.f32 %v4139_v35, %v7885_v2 }
 0x222   : > { %v2470_v47 = vadd.f32 %v2342_v12, %v2214_v9  ;;  %v2471_v36 = vadd.f32 %v2343_v3, %v2215_v58  ;;  %v2472_v6 = vadd.f32 %v2344_v46, %v2216_v59  ;;  %v2473_v45 = vadd.f32 %v2345_v57, %v2217_v4  ;;  %v2355_v59 = vld [vmem:[#allocation2 + $0x150] sm:$0xff]  ;;  %v2356_v9 = vld [vmem:[#allocation2 + $0x108] sm:$0xff]  ;;  %v2358_v12 = vld [vmem:[#allocation2 + $0x2e0] sm:$0xff] }
 0x223   : > { %v2474_v37 = vadd.f32 %v2346_v23, %v2218_v11  ;;  %v2475_v10 = vadd.f32 %v2347_v21, %v2219_v30  ;;  %v2476_v29 = vadd.f32 %v2348_v52, %v2220_v5  ;;  %v2477_v7 = vadd.f32 %v2349_v39, %v2221_v27  ;;  %v2357_v21 = vld [vmem:[#allocation2 + $0x60] sm:$0xff]  ;;  %v6580_v52 = vpop.eup %4140  ;;  %v2359_v3 = vld [vmem:[#allocation2 + $0x388] sm:$0xff]  ;;  %v2360_v30 = vld [vmem:[#allocation2 + $0x338] sm:$0xff] }
 0x224   : > { %2598 = vst [vmem:[#allocation2 + $0x2b0] sm:$0xff] %v2470_v47  ;;  %2599 = vst [vmem:[#allocation2 + $0x3b0] sm:$0xff] %v2471_v36  ;;  %v2222_v40 = vmul.f32 %v4139_v35, %v7886_v51  ;;  %v2223_v15 = vmul.f32 %v4139_v35, %v7887_v17  ;;  %v2224_v32 = vmul.f32 %v4139_v35, %v7889_v63  ;;  %v2362_v5 = vld [vmem:[#allocation2 + $0x80] sm:$0xff] }
 0x225   : > { %2600 = vst [vmem:[#allocation2 + $0xd8] sm:$0xff] %v2472_v6  ;;  %2601 = vst [vmem:[#allocation2 + $0x18] sm:$0xff] %v2473_v45  ;;  %v2225_v2 = vmul.f32 %v4139_v35, %v7890_v56  ;;  %v2226_v39 = vmul.f32 %v4139_v35, %v7891_v25  ;;  %v2227_v58 = vmul.f32 %v4139_v35, %v7895_v18 }
 0x226   : > { %2602 = vst [vmem:[#allocation2 + $0x50] sm:$0xff] %v2474_v37  ;;  %2603 = vst [vmem:[#allocation2 + $0x368] sm:$0xff] %v2475_v10  ;;  %v2228_v51 = vmul.f32 %v4139_v35, %v7896_v16  ;;  %v2229_v17 = vmul.f32 %v4139_v35, %v7897_v53  ;;  %v2478_v63 = vadd.f32 %v2350_v60, %v2222_v40  ;;  %v7982_v35 = vld [vmem:[#allocation27_spill] sm:$0xff]  ;;  %v2366_v37 = vld [vmem:[#allocation2 + $0x3e8] sm:$0xff] }
 0x227   : > { %2604 = vst [vmem:[#allocation2 + $0x330] sm:$0xff] %v2476_v29  ;;  %2605 = vst [vmem:[#allocation2 + $0x48] sm:$0xff] %v2477_v7  ;;  %v2479_v4 = vadd.f32 %v2351_v0, %v2223_v15  ;;  %v2480_v56 = vadd.f32 %v2352_v61, %v2224_v32  ;;  %v2481_v23 = vadd.f32 %v2353_v43, %v2225_v2  ;;  %v2361_v7 = vld [vmem:[#allocation2 + $0x340] sm:$0xff]  ;;  %v2364_v43 = vld [vmem:[#allocation2 + $0x1b8] sm:$0xff] }
 0x228   : > { %v2482_v46 = vadd.f32 %v2354_v24, %v2226_v39  ;;  %v2483_v57 = vadd.f32 %v2355_v59, %v2227_v58  ;;  %v2484_v11 = vadd.f32 %v2356_v9, %v2228_v51  ;;  %v2485_v10 = vadd.f32 %v2357_v21, %v2229_v17  ;;  %2606 = vst [vmem:[#allocation2 + $0x380] sm:$0xff] %v2478_v63  ;;  %v2363_v24 = vld [vmem:[#allocation2 + $0x1a8] sm:$0xff]  ;;  %v2367_v29 = vld [vmem:[#allocation2 + $0x2f8] sm:$0xff]  ;;  %v2368_v9 = vld [vmem:[#allocation2 + $0x290] sm:$0xff] }
 0x229   : > { %2607 = vst [vmem:[#allocation2 + $0x110] sm:$0xff] %v2479_v4  ;;  %2608 = vst [vmem:[#allocation2 + $0x118] sm:$0xff] %v2480_v56  ;;  %v2230_v25 = vmul.f32 %v6580_v52, %v7879_v1  ;;  %v2231_v18 = vmul.f32 %v6580_v52, %v7880_v34  ;;  %v2232_v16 = vmul.f32 %v6580_v52, %v7882_v50  ;;  %v2365_v61 = vld [vmem:[#allocation2 + $0x168] sm:$0xff]  ;;  %v7983_v1 = vld [vmem:[#allocation28_spill] sm:$0xff]  ;;  %v6602_v40 = vpop.eup %4142 }
 0x22a   : > { %2609 = vst [vmem:[#allocation2 + $0x98] sm:$0xff] %v2481_v23  ;;  %v2233_v53 = vmul.f32 %v6580_v52, %v7888_v31  ;;  %2610 = vst [vmem:[#allocation2 + $0x320] sm:$0xff] %v2482_v46  ;;  %v2234_v27 = vmul.f32 %v6580_v52, %v7982_v35  ;;  %v2235_v47 = vmul.f32 %v6580_v52, %v7983_v1  ;;  %v7984_v34 = vld [vmem:[#allocation29_spill] sm:$0xff]  ;;  %v7985_v50 = vld [vmem:[#allocation30_spill] sm:$0xff] }
 0x22b   : > { %2611 = vst [vmem:[#allocation2 + $0x150] sm:$0xff] %v2483_v57  ;;  %2612 = vst [vmem:[#allocation2 + $0x108] sm:$0xff] %v2484_v11  ;;  %v2236_v36 = vmul.f32 %v6580_v52, %v7984_v34  ;;  %v2237_v6 = vmul.f32 %v6580_v52, %v7985_v50  ;;  %v2486_v31 = vadd.f32 %v2358_v12, %v2230_v25  ;;  %v2369_v21 = vld [vmem:[#allocation2 + $0x28] sm:$0xff]  ;;  %v2370_v39 = vld [vmem:[#allocation2 + $0x138] sm:$0xff] }
 0x22c   : > { %2613 = vst [vmem:[#allocation2 + $0x60] sm:$0xff] %v2485_v10  ;;  %v2487_v45 = vadd.f32 %v2359_v3, %v2231_v18  ;;  %v2488_v60 = vadd.f32 %v2360_v30, %v2232_v16  ;;  %v2489_v0 = vadd.f32 %v2361_v7, %v2233_v53  ;;  %v2490_v15 = vadd.f32 %v2362_v5, %v2234_v27  ;;  %v7986_v58 = vld [vmem:[#allocation31_spill] sm:$0xff]  ;;  %v7987_v17 = vld [vmem:[#allocation32_spill] sm:$0xff]  ;;  %v7988_v4 = vld [vmem:[#allocation33_spill] sm:$0xff] }
 0x22d   : > { %v2491_v32 = vadd.f32 %v2363_v24, %v2235_v47  ;;  %v2492_v2 = vadd.f32 %v2364_v43, %v2236_v36  ;;  %v2493_v59 = vadd.f32 %v2365_v61, %v2237_v6  ;;  %2614 = vst [vmem:[#allocation2 + $0x2e0] sm:$0xff] %v2486_v31  ;;  %v2238_v51 = vmul.f32 %v6580_v52, %v7986_v58  ;;  %v7989_v23 = vld [vmem:[#allocation34_spill] sm:$0xff]  ;;  %v2371_v3 = vld [vmem:[#allocation2 + $0xc0] sm:$0xff]  ;;  %v7990_v11 = vld [vmem:[#allocation35_spill] sm:$0xff] }
 0x22e   : > { %2615 = vst [vmem:[#allocation2 + $0x388] sm:$0xff] %v2487_v45  ;;  %2616 = vst [vmem:[#allocation2 + $0x338] sm:$0xff] %v2488_v60  ;;  %v2239_v63 = vmul.f32 %v6580_v52, %v7987_v17  ;;  %v2240_v56 = vmul.f32 %v6580_v52, %v7988_v4  ;;  %v2241_v12 = vmul.f32 %v6580_v52, %v7989_v23  ;;  %v2372_v46 = vld [vmem:[#allocation2 + $0x1c0] sm:$0xff]  ;;  %v7991_v30 = vld [vmem:[#allocation36_spill] sm:$0xff] }
 0x22f   : > { %2617 = vst [vmem:[#allocation2 + $0x340] sm:$0xff] %v2489_v0  ;;  %v2373_v57 = vld [vmem:[#allocation2 + $0x280] sm:$0xff]  ;;  %2618 = vst [vmem:[#allocation2 + $0x80] sm:$0xff] %v2490_v15  ;;  %v2242_v10 = vmul.f32 %v6580_v52, %v7990_v11  ;;  %v2243_v7 = vmul.f32 %v6580_v52, %v7991_v30  ;;  %v7993_v18 = vld [vmem:[#allocation38_spill] sm:$0xff]  ;;  %v2494_v53 = vadd.f32 %v2366_v37, %v2238_v51 }
 0x230   : > { %2619 = vst [vmem:[#allocation2 + $0x1a8] sm:$0xff] %v2491_v32  ;;  %2620 = vst [vmem:[#allocation2 + $0x1b8] sm:$0xff] %v2492_v2  ;;  %v7992_v5 = vld [vmem:[#allocation37_spill] sm:$0xff]  ;;  %v2245_v16 = vmul.f32 %v6580_v52, %v7993_v18  ;;  %v2495_v24 = vadd.f32 %v2367_v29, %v2239_v63  ;;  %v2496_v43 = vadd.f32 %v2368_v9, %v2240_v56  ;;  %v2376_v50 = vld [vmem:[#allocation2 + $0x158] sm:$0xff] }
 0x231   : > { %2621 = vst [vmem:[#allocation2 + $0x168] sm:$0xff] %v2493_v59  ;;  %v2244_v25 = vmul.f32 %v6580_v52, %v7992_v5  ;;  %v2497_v61 = vadd.f32 %v2369_v21, %v2241_v12  ;;  %v2374_v35 = vld [vmem:[#allocation2 + $0x100] sm:$0xff]  ;;  %v2498_v1 = vadd.f32 %v2370_v39, %v2242_v10  ;;  %v2499_v47 = vadd.f32 %v2371_v3, %v2243_v7  ;;  %v2378_v31 = vld [vmem:[#allocation2 + $0x218] sm:$0xff]  ;;  %v7994_v45 = vld [vmem:[#allocation39_spill] sm:$0xff] }
 0x232   : > { %v2375_v27 = vld [vmem:[#allocation2 + $0x3c0] sm:$0xff]  ;;  %v2501_v36 = vadd.f32 %v2373_v57, %v2245_v16  ;;  %2622 = vst [vmem:[#allocation2 + $0x3e8] sm:$0xff] %v2494_v53  ;;  %2623 = vst [vmem:[#allocation2 + $0x2f8] sm:$0xff] %v2495_v24  ;;  %v2246_v52 = vmul.f32 %v6602_v40, %v7994_v45  ;;  %v7995_v60 = vld [vmem:[#allocation40_spill] sm:$0xff] }
 0x233   : > { %v2500_v34 = vadd.f32 %v2372_v46, %v2244_v25  ;;  %v2377_v6 = vld [vmem:[#allocation2 + $0x3e0] sm:$0xff]  ;;  %2624 = vst [vmem:[#allocation2 + $0x290] sm:$0xff] %v2496_v43  ;;  %2625 = vst [vmem:[#allocation2 + $0x28] sm:$0xff] %v2497_v61  ;;  %v2247_v0 = vmul.f32 %v6602_v40, %v7995_v60  ;;  %v7997_v15 = vld [vmem:[#allocation42_spill] sm:$0xff] }
 0x234   : > { %v7996_v37 = vld [vmem:[#allocation41_spill] sm:$0xff]  ;;  %v2249_v32 = vmul.f32 %v6602_v40, %v7997_v15  ;;  %v2379_v2 = vld [vmem:[#allocation2 + $0x3f8] sm:$0xff]  ;;  %v2380_v59 = vld [vmem:[#allocation2 + $0x8] sm:$0xff]  ;;  %2626 = vst [vmem:[#allocation2 + $0x138] sm:$0xff] %v2498_v1  ;;  %v2502_v23 = vadd.f32 %v2374_v35, %v2246_v52 }
 0x235   : > { %v2248_v29 = vmul.f32 %v6602_v40, %v7996_v37  ;;  %v2381_v9 = vld [vmem:[#allocation2 + $0x128] sm:$0xff]  ;;  %2627 = vst [vmem:[#allocation2 + $0xc0] sm:$0xff] %v2499_v47  ;;  %2628 = vst [vmem:[#allocation2 + $0x1c0] sm:$0xff] %v2500_v34  ;;  %v7998_v21 = vld [vmem:[#allocation43_spill] sm:$0xff]  ;;  %v2503_v12 = vadd.f32 %v2375_v27, %v2247_v0 }
 0x236   : > { %2629 = vst [vmem:[#allocation2 + $0x280] sm:$0xff] %v2501_v36  ;;  %v2250_v39 = vmul.f32 %v6602_v40, %v7998_v21  ;;  %v7999_v58 = vld [vmem:[#allocation44_spill] sm:$0xff]  ;;  %v8000_v17 = vld [vmem:[#allocation45_spill] sm:$0xff]  ;;  %v8001_v4 = vld [vmem:[#allocation46_spill] sm:$0xff]  ;;  %v2505_v46 = vadd.f32 %v2377_v6, %v2249_v32 }
 0x237   : > { %v2251_v51 = vmul.f32 %v6602_v40, %v7999_v58  ;;  %v2252_v63 = vmul.f32 %v6602_v40, %v8000_v17  ;;  %v2253_v56 = vmul.f32 %v6602_v40, %v8001_v4  ;;  %v2504_v3 = vadd.f32 %v2376_v50, %v2248_v29  ;;  %v2382_v57 = vld [vmem:[#allocation2 + $0x2a0] sm:$0xff]  ;;  %v2383_v11 = vld [vmem:[#allocation2 + $0x3f0] sm:$0xff]  ;;  %2630 = vst [vmem:[#allocation2 + $0x100] sm:$0xff] %v2502_v23  ;;  %v8003_v43 = vld [vmem:[#allocation48_spill] sm:$0xff] }
 0x238   : > { %v2506_v10 = vadd.f32 %v2378_v31, %v2250_v39  ;;  %v2384_v25 = vld [vmem:[#allocation2 + $0xa0] sm:$0xff]  ;;  %v2386_v16 = vld [vmem:[#allocation2 + $0xb0] sm:$0xff]  ;;  %2631 = vst [vmem:[#allocation2 + $0x3c0] sm:$0xff] %v2503_v12  ;;  %2633 = vst [vmem:[#allocation2 + $0x3e0] sm:$0xff] %v2505_v46  ;;  %v2255_v61 = vmul.f32 %v6602_v40, %v8003_v43  ;;  %v2131_v17 = vrot.slane %v6562_v42, 2 }
 0x239   : > { %v2507_v30 = vadd.f32 %v2379_v2, %v2251_v51  ;;  %v2508_v7 = vadd.f32 %v2380_v59, %v2252_v63  ;;  %v2509_v5 = vadd.f32 %v2381_v9, %v2253_v56  ;;  %v2385_v18 = vld [vmem:[#allocation2 + $0x2c0] sm:$0xff]  ;;  %2632 = vst [vmem:[#allocation2 + $0x158] sm:$0xff] %v2504_v3  ;;  %v8002_v53 = vld [vmem:[#allocation47_spill] sm:$0xff]  ;;  %v8005_v1 = vld [vmem:[#allocation50_spill] sm:$0xff]  ;;  %v2201_v51 = vmax.f32 %v6560_v55, 1e-24 }
 0x23a   : > { %v2254_v24 = vmul.f32 %v6602_v40, %v8002_v53  ;;  %v8004_v35 = vld [vmem:[#allocation49_spill] sm:$0xff]  ;;  %v2257_v47 = vmul.f32 %v6602_v40, %v8005_v1  ;;  %v2388_v36 = vld [vmem:[#allocation2 + $0x1f0] sm:$0xff]  ;;  %2634 = vst [vmem:[#allocation2 + $0x218] sm:$0xff] %v2506_v10  ;;  %v8007_v45 = vld [vmem:[#allocation52_spill] sm:$0xff]  ;;  %v2511_v32 = vadd.f32 %v2383_v11, %v2255_v61  ;;  %v2147_v63 = vadd.f32 %v6564_v8, %v6524_v41 }
 0x23b   : > { %v2256_v27 = vmul.f32 %v6602_v40, %v8004_v35  ;;  %v2387_v34 = vld [vmem:[#allocation2 + $0x1e0] sm:$0xff]  ;;  %v2389_v50 = vld [vmem:[#allocation2 + $0x10] sm:$0xff]  ;;  %2635 = vst [vmem:[#allocation2 + $0x3f8] sm:$0xff] %v2507_v30  ;;  %2636 = vst [vmem:[#allocation2 + $0x8] sm:$0xff] %v2508_v7  ;;  %v2259_v52 = vmul.f32 %v6602_v40, %v8007_v45  ;;  %v2177_v55 = vadd.f32 %v6554_v14, %v6550_v48  ;;  %4144 = vrsqrt.f32 %v2201_v51 }
 0x23c   : > { %2637 = vst [vmem:[#allocation2 + $0x128] sm:$0xff] %v2509_v5  ;;  %v8006_v6 = vld [vmem:[#allocation51_spill] sm:$0xff]  ;;  %v8008_v60 = vld [vmem:[#allocation53_spill] sm:$0xff]  ;;  %v8009_v37 = vld [vmem:[#allocation54_spill] sm:$0xff]  ;;  %v2510_v15 = vadd.f32 %v2382_v57, %v2254_v24  ;;  %v2513_v59 = vadd.f32 %v2385_v18, %v2257_v47  ;;  %v2132_v3 = vadd.f32 %v2131_v17, %v6562_v42  ;;  %v2148_v41 = vadd.f32 %v2147_v63, %v6528_v19 }
 0x23d   : > { %v2258_v31 = vmul.f32 %v6602_v40, %v8006_v6  ;;  %v2260_v0 = vmul.f32 %v6602_v40, %v8008_v60  ;;  %v2261_v29 = vmul.f32 %v6602_v40, %v8009_v37  ;;  %v2512_v2 = vadd.f32 %v2384_v25, %v2256_v27  ;;  %2639 = vst [vmem:[#allocation2 + $0x3f0] sm:$0xff] %v2511_v32  ;;  %v8010_v4 = vld [vmem:[#allocation111_spill] sm:$0xff]  ;;  %v8011_v23 = vld [vmem:[#allocation122_spill] sm:$0xff]  ;;  %v8013_v10 = vld [vmem:[#allocation112_spill] sm:$0xff] }
 0x23e   : > { %v2515_v21 = vadd.f32 %v2387_v34, %v2259_v52  ;;  %2638 = vst [vmem:[#allocation2 + $0x2a0] sm:$0xff] %v2510_v15  ;;  %2641 = vst [vmem:[#allocation2 + $0x2c0] sm:$0xff] %v2513_v59  ;;  %v2160_v40 = vadd.f32 %v6566_v22, %v6538_v28  ;;  %v2006_v56 = vmul.f32 %v8010_v4, %v8010_v4  ;;  %v8012_v22 = vld [vmem:[#allocation123_spill] sm:$0xff]  ;;  %v2133_v57 = vrot.slane %v2132_v3, 1  ;;  %v8014_v48 = vld [vmem:[#allocation124_spill] sm:$0xff] }
 0x23f   : > { %v2514_v9 = vadd.f32 %v2386_v16, %v2258_v31  ;;  %v2516_v39 = vadd.f32 %v2388_v36, %v2260_v0  ;;  %v2517_v58 = vadd.f32 %v2389_v50, %v2261_v29  ;;  %2640 = vst [vmem:[#allocation2 + $0xa0] sm:$0xff] %v2512_v2  ;;  %v2017_v12 = vmul.f32 %v8011_v23, %v8011_v23  ;;  %v8016_v16 = vld [vmem:[#allocation125_spill] sm:$0xff]  ;;  %v8017_v43 = vld [vmem:[#allocation114_spill] sm:$0xff]  ;;  %v8019_v36 = vld [vmem:[#allocation115_spill] sm:$0xff] }
 0x240   : > { %2643 = vst [vmem:[#allocation2 + $0x1e0] sm:$0xff] %v2515_v21  ;;  %v2161_v28 = vadd.f32 %v2160_v40, %v6542_v49  ;;  %v2018_v8 = vmul.f32 %v8012_v22, %v8012_v22  ;;  %v2178_v46 = vadd.f32 %v2177_v55, %v6558_v62  ;;  %v2149_v11 = vadd.f32 %v2148_v41, %v6534_v13  ;;  %v8015_v49 = vld [vmem:[#allocation113_spill] sm:$0xff]  ;;  %v8018_v35 = vld [vmem:[#allocation126_spill] sm:$0xff]  ;;  %v8020_v6 = vld [vmem:[#allocation127_spill] sm:$0xff] }
 0x241   : > { %2642 = vst [vmem:[#allocation2 + $0xb0] sm:$0xff] %v2514_v9  ;;  %2644 = vst [vmem:[#allocation2 + $0x1f0] sm:$0xff] %v2516_v39  ;;  %v2007_v30 = vmul.f32 %v8013_v10, %v8013_v10  ;;  %v2019_v42 = vmul.f32 %v8014_v48, %v8014_v48  ;;  %v2134_v19 = vadd.f32 %v2133_v57, %v2132_v3  ;;  %v2390_v37 = vld [vmem:[#allocation2 + $0x230] sm:$0xff]  ;;  %v2391_v29 = vld [vmem:[#allocation2 + $0x240] sm:$0xff] }
 0x242   : > { %2645 = vst [vmem:[#allocation2 + $0x10] sm:$0xff] %v2517_v58  ;;  %v2162_v14 = vadd.f32 %v2161_v28, %v6546_v44  ;;  %v2179_v7 = vadd.f32 %v2178_v46, %v2017_v12  ;;  %v2150_v5 = vrot.slane %v2149_v11, 4  ;;  %v2008_v25 = vmul.f32 %v8015_v49, %v8015_v49  ;;  %v8021_v15 = vld [vmem:[#allocation116_spill] sm:$0xff]  ;;  %v8022_v2 = vld [vmem:[#allocation117_spill] sm:$0xff]  ;;  %v8023_v9 = vld [vmem:[#allocation118_spill] sm:$0xff] }
 0x243   : > { %v2020_v62 = vmul.f32 %v8016_v16, %v8016_v16  ;;  %v2202_v13 = vmax.f32 %v2134_v19, 1e-24  ;;  %v2009_v61 = vmul.f32 %v8017_v43, %v8017_v43  ;;  %v2021_v27 = vmul.f32 %v8018_v35, %v8018_v35  ;;  %v8024_v39 = vld [vmem:[#allocation128_spill] sm:$0xff]  ;;  %v2392_v17 = vld [vmem:[#allocation2 + $0x90] sm:$0xff]  ;;  %v2393_v63 = vld [vmem:[#allocation2 + $0x3a0] sm:$0xff] }
 0x244   : > { %v2163_v18 = vadd.f32 %v2162_v14, %v2006_v56  ;;  %v2180_v53 = vadd.f32 %v2179_v7, %v2018_v8  ;;  %v2151_v24 = vadd.f32 %v2150_v5, %v2149_v11  ;;  %v2010_v50 = vmul.f32 %v8019_v36, %v8019_v36  ;;  %v2394_v40 = vld [vmem:[#allocation2 + $0x208] sm:$0xff]  ;;  %v8025_v55 = vld [vmem:[#allocation129_spill] sm:$0xff]  ;;  %v8026_v28 = vld [vmem:[#allocation55_spill] sm:$0xff] }
 0x245   : > { %4146 = vrsqrt.f32 %v2202_v13  ;;  %v2022_v31 = vmul.f32 %v8020_v6, %v8020_v6  ;;  %v6692_v32 = vmul.f32 %v8021_v15, %v8021_v15  ;;  %v6696_v59 = vmul.f32 %v8022_v2, %v8022_v2  ;;  %v8027_v46 = vld [vmem:[#allocation56_spill] sm:$0xff]  ;;  %v8028_v11 = vld [vmem:[#allocation57_spill] sm:$0xff]  ;;  %v8029_v14 = vld [vmem:[#allocation58_spill] sm:$0xff] }
 0x246   : > { %v2164_v44 = vadd.f32 %v2163_v18, %v2007_v30  ;;  %v2181_v1 = vadd.f32 %v2180_v53, %v2019_v42  ;;  %v2152_v47 = vrot.slane %v2151_v24, 2  ;;  %v6700_v21 = vmul.f32 %v8023_v9, %v8023_v9  ;;  %v2395_v7 = vld [vmem:[#allocation2 + $0xd0] sm:$0xff]  ;;  %v2396_v19 = vld [vmem:[#allocation2 + $0x88] sm:$0xff]  ;;  %v8031_v53 = vld [vmem:[#allocation61_spill] sm:$0xff] }
 0x247   : > { %v6704_v58 = vmul.f32 %v8024_v39, %v8024_v39  ;;  %v6711_v3 = vmul.f32 %v8025_v55, %v8025_v55  ;;  %v2397_v5 = vld [vmem:[#allocation2 + $0x2f0] sm:$0xff] }
 0x248   : > { %v2165_v34 = vadd.f32 %v2164_v44, %v2008_v25  ;;  %v2182_v45 = vadd.f32 %v2181_v1, %v2020_v62  ;;  %v6688_v52 = vadd.f32 %v2152_v47, %v2151_v24  ;;  %v4145_v51 = vpop.eup %4144  ;;  %v8030_v25 = vld [vmem:[#allocation59_spill] sm:$0xff]  ;;  %v8032_v24 = vld [vmem:[#allocation62_spill] sm:$0xff] }
 0x249   : > { %v2262_v8 = vmul.f32 %v4145_v51, %v8026_v28  ;;  %v2263_v57 = vmul.f32 %v4145_v51, %v8027_v46  ;;  %v2264_v30 = vmul.f32 %v4145_v51, %v8028_v11  ;;  %v2265_v42 = vmul.f32 %v4145_v51, %v8029_v14  ;;  %v2400_v28 = vld [vmem:[#allocation2 + $0x350] sm:$0xff]  ;;  %v2401_v46 = vld [vmem:[#allocation2 + $0x188] sm:$0xff]  ;;  %v2402_v11 = vld [vmem:[#allocation2 + $0x1d8] sm:$0xff] }
 0x24a   : > { %v2166_v60 = vadd.f32 %v2165_v34, %v2009_v61  ;;  %v2183_v0 = vadd.f32 %v2182_v45, %v2021_v27  ;;  %v2154_v56 = vrot.slane %v6688_v52, 1  ;;  %v2266_v18 = vmul.f32 %v4145_v51, %v8030_v25  ;;  %v2398_v34 = vld [vmem:[#allocation2 + $0x358] sm:$0xff] }
 0x24b   : > { %v2267_v62 = vmul.f32 %v4145_v51, %v7928_v26  ;;  %v2268_v13 = vmul.f32 %v4145_v51, %v8031_v53  ;;  %v2269_v61 = vmul.f32 %v4145_v51, %v8032_v24  ;;  %v2518_v44 = vadd.f32 %v2390_v37, %v2262_v8  ;;  %v8033_v26 = vld [vmem:[#allocation63_spill] sm:$0xff]  ;;  %v8034_v25 = vld [vmem:[#allocation64_spill] sm:$0xff]  ;;  %v2407_v24 = vld [vmem:[#allocation2 + $0x200] sm:$0xff] }
 0x24c   : > { %v6707_v12 = vadd.f32 %v2166_v60, %v2010_v50  ;;  %v6713_v41 = vadd.f32 %v2183_v0, %v2022_v31  ;;  %v2519_v27 = vadd.f32 %v2391_v29, %v2263_v57  ;;  %v2520_v1 = vadd.f32 %v2392_v17, %v2264_v30  ;;  %v2399_v50 = vld [vmem:[#allocation2 + $0x268] sm:$0xff]  ;;  %v2403_v8 = vld [vmem:[#allocation2 + $0x30] sm:$0xff] }
 0x24d   : > { %v2521_v47 = vadd.f32 %v2393_v63, %v2265_v42  ;;  %v2522_v31 = vadd.f32 %v2394_v40, %v2266_v18  ;;  %v2523_v45 = vadd.f32 %v2395_v7, %v2267_v62  ;;  %v2524_v60 = vadd.f32 %v2396_v19, %v2268_v13  ;;  %2646 = vst [vmem:[#allocation2 + $0x230] sm:$0xff] %v2518_v44  ;;  %v8035_v17 = vld [vmem:[#allocation66_spill] sm:$0xff]  ;;  %v2404_v40 = vld [vmem:[#allocation2 + $0x140] sm:$0xff]  ;;  %v2406_v13 = vld [vmem:[#allocation2 + $0x130] sm:$0xff] }
 0x24e   : > { %v2525_v0 = vadd.f32 %v2397_v5, %v2269_v61  ;;  %2647 = vst [vmem:[#allocation2 + $0x240] sm:$0xff] %v2519_v27  ;;  %2648 = vst [vmem:[#allocation2 + $0x90] sm:$0xff] %v2520_v1  ;;  %v2270_v14 = vmul.f32 %v4145_v51, %v8033_v26  ;;  %v2271_v37 = vmul.f32 %v4145_v51, %v8034_v25  ;;  %v2405_v57 = vld [vmem:[#allocation2 + $0x2a8] sm:$0xff]  ;;  %v2413_v26 = vld [vmem:[#allocation2 + $0x178] sm:$0xff] }
 0x24f   : > { %2649 = vst [vmem:[#allocation2 + $0x3a0] sm:$0xff] %v2521_v47  ;;  %v2272_v29 = vmul.f32 %v4145_v51, %v7936_v38  ;;  %v2273_v63 = vmul.f32 %v4145_v51, %v8035_v17  ;;  %2650 = vst [vmem:[#allocation2 + $0x208] sm:$0xff] %v2522_v31  ;;  %v2274_v30 = vmul.f32 %v4145_v51, %v7939_v54  ;;  %v8036_v19 = vld [vmem:[#allocation70_spill] sm:$0xff]  ;;  %v2408_v31 = vld [vmem:[#allocation2 + $0x318] sm:$0xff] }
 0x250   : > { %2651 = vst [vmem:[#allocation2 + $0xd0] sm:$0xff] %v2523_v45  ;;  %2652 = vst [vmem:[#allocation2 + $0x88] sm:$0xff] %v2524_v60  ;;  %v2275_v42 = vmul.f32 %v4145_v51, %v7940_v20  ;;  %v2276_v7 = vmul.f32 %v4145_v51, %v7942_v33  ;;  %v2277_v5 = vmul.f32 %v4145_v51, %v8036_v19  ;;  %v2409_v45 = vld [vmem:[#allocation2 + $0x220] sm:$0xff]  ;;  %v2410_v54 = vld [vmem:[#allocation2 + $0x70] sm:$0xff] }
 0x251   : > { %2653 = vst [vmem:[#allocation2 + $0x2f0] sm:$0xff] %v2525_v0  ;;  %v2526_v18 = vadd.f32 %v2398_v34, %v2270_v14  ;;  %v2527_v62 = vadd.f32 %v2399_v50, %v2271_v37  ;;  %v2528_v38 = vadd.f32 %v2400_v28, %v2272_v29  ;;  %v2529_v53 = vadd.f32 %v2401_v46, %v2273_v63  ;;  %v8037_v20 = vld [vmem:[#allocation71_spill] sm:$0xff]  ;;  %v8038_v51 = vld [vmem:[#allocation72_spill] sm:$0xff]  ;;  %v8039_v50 = vld [vmem:[#allocation73_spill] sm:$0xff] }
 0x252   : > { %v4147_v61 = vpop.eup %4146  ;;  %v2530_v44 = vadd.f32 %v2402_v11, %v2274_v30  ;;  %v2531_v27 = vadd.f32 %v2403_v8, %v2275_v42  ;;  %v2532_v1 = vadd.f32 %v2404_v40, %v2276_v7  ;;  %v2533_v47 = vadd.f32 %v2405_v57, %v2277_v5  ;;  %v8040_v0 = vld [vmem:[#allocation74_spill] sm:$0xff]  ;;  %v2411_v46 = vld [vmem:[#allocation2 + $0x300] sm:$0xff]  ;;  %v8041_v14 = vld [vmem:[#allocation75_spill] sm:$0xff] }
 0x253   : > { %2654 = vst [vmem:[#allocation2 + $0x358] sm:$0xff] %v2526_v18  ;;  %2655 = vst [vmem:[#allocation2 + $0x268] sm:$0xff] %v2527_v62  ;;  %v2278_v33 = vmul.f32 %v4147_v61, %v8037_v20  ;;  %v2279_v34 = vmul.f32 %v4147_v61, %v8038_v51  ;;  %v2280_v60 = vmul.f32 %v4147_v61, %v8039_v50  ;;  %v2412_v11 = vld [vmem:[#allocation2 + $0xe0] sm:$0xff]  ;;  %v8042_v37 = vld [vmem:[#allocation76_spill] sm:$0xff] }
 0x254   : > { %2656 = vst [vmem:[#allocation2 + $0x350] sm:$0xff] %v2528_v38  ;;  %2657 = vst [vmem:[#allocation2 + $0x188] sm:$0xff] %v2529_v53  ;;  %v2281_v28 = vmul.f32 %v4147_v61, %v8040_v0  ;;  %v2282_v25 = vmul.f32 %v4147_v61, %v8041_v14  ;;  %v2283_v29 = vmul.f32 %v4147_v61, %v8042_v37  ;;  %v8043_v17 = vld [vmem:[#allocation77_spill] sm:$0xff]  ;;  %v8044_v8 = vld [vmem:[#allocation78_spill] sm:$0xff] }
 0x255   : > { %2658 = vst [vmem:[#allocation2 + $0x1d8] sm:$0xff] %v2530_v44  ;;  %2659 = vst [vmem:[#allocation2 + $0x30] sm:$0xff] %v2531_v27  ;;  %v2284_v63 = vmul.f32 %v4147_v61, %v8043_v17  ;;  %v2285_v40 = vmul.f32 %v4147_v61, %v8044_v8  ;;  %v2534_v57 = vadd.f32 %v2406_v13, %v2278_v33  ;;  %v2414_v19 = vld [vmem:[#allocation2 + $0x328] sm:$0xff]  ;;  %v2415_v5 = vld [vmem:[#allocation2 + $0x260] sm:$0xff] }
 0x256   : > { %2660 = vst [vmem:[#allocation2 + $0x140] sm:$0xff] %v2532_v1  ;;  %2661 = vst [vmem:[#allocation2 + $0x2a8] sm:$0xff] %v2533_v47  ;;  %v2535_v30 = vadd.f32 %v2407_v24, %v2279_v34  ;;  %v2536_v42 = vadd.f32 %v2408_v31, %v2280_v60  ;;  %v2537_v7 = vadd.f32 %v2409_v45, %v2281_v28  ;;  %v2416_v44 = vld [vmem:[#allocation2 + $0x3b8] sm:$0xff]  ;;  %v2418_v1 = vld [vmem:[#allocation2 + $0x248] sm:$0xff] }
 0x257   : > { %v2538_v18 = vadd.f32 %v2410_v54, %v2282_v25  ;;  %v2539_v62 = vadd.f32 %v2411_v46, %v2283_v29  ;;  %v2540_v38 = vadd.f32 %v2412_v11, %v2284_v63  ;;  %v2541_v53 = vadd.f32 %v2413_v26, %v2285_v40  ;;  %v2417_v27 = vld [vmem:[#allocation2 + $0x2b8] sm:$0xff]  ;;  %2662 = vst [vmem:[#allocation2 + $0x130] sm:$0xff] %v2534_v57  ;;  %v8045_v47 = vld [vmem:[#allocation79_spill] sm:$0xff]  ;;  %v8047_v24 = vld [vmem:[#allocation81_spill] sm:$0xff] }
 0x258   : > { %2663 = vst [vmem:[#allocation2 + $0x200] sm:$0xff] %v2535_v30  ;;  %2664 = vst [vmem:[#allocation2 + $0x318] sm:$0xff] %v2536_v42  ;;  %v2286_v20 = vmul.f32 %v4147_v61, %v8045_v47  ;;  %v8046_v51 = vld [vmem:[#allocation80_spill] sm:$0xff]  ;;  %v2288_v31 = vmul.f32 %v4147_v61, %v8047_v24  ;;  %v8048_v45 = vld [vmem:[#allocation82_spill] sm:$0xff]  ;;  %v2155_v42 = vadd.f32 %v2154_v56, %v6688_v52 }
 0x259   : > { %2665 = vst [vmem:[#allocation2 + $0x220] sm:$0xff] %v2537_v7  ;;  %v2287_v13 = vmul.f32 %v4147_v61, %v8046_v51  ;;  %v2289_v33 = vmul.f32 %v4147_v61, %v8048_v45  ;;  %v2419_v34 = vld [vmem:[#allocation2 + $0x40] sm:$0xff]  ;;  %v2421_v50 = vld [vmem:[#allocation2 + $0xe8] sm:$0xff]  ;;  %2666 = vst [vmem:[#allocation2 + $0x70] sm:$0xff] %v2538_v18  ;;  %v2168_v7 = vadd.f32 %v6707_v12, %v6692_v32 }
 0x25a   : > { %v2420_v54 = vld [vmem:[#allocation2 + $0x20] sm:$0xff]  ;;  %2667 = vst [vmem:[#allocation2 + $0x300] sm:$0xff] %v2539_v62  ;;  %2668 = vst [vmem:[#allocation2 + $0xe0] sm:$0xff] %v2540_v38  ;;  %v8049_v60 = vld [vmem:[#allocation83_spill] sm:$0xff]  ;;  %v2542_v37 = vadd.f32 %v2414_v19, %v2286_v20  ;;  %v2544_v17 = vadd.f32 %v2416_v44, %v2288_v31  ;;  %v2203_v18 = vmax.f32 %v2155_v42, 1e-24 }
 0x25b   : > { %2669 = vst [vmem:[#allocation2 + $0x178] sm:$0xff] %v2541_v53  ;;  %v2290_v0 = vmul.f32 %v4147_v61, %v8049_v60  ;;  %v8050_v28 = vld [vmem:[#allocation84_spill] sm:$0xff]  ;;  %v8051_v11 = vld [vmem:[#allocation85_spill] sm:$0xff]  ;;  %v8052_v14 = vld [vmem:[#allocation86_spill] sm:$0xff]  ;;  %v2543_v29 = vadd.f32 %v2415_v5, %v2287_v13  ;;  %v2545_v63 = vadd.f32 %v2417_v27, %v2289_v33  ;;  %v2185_v5 = vadd.f32 %v6713_v41, %v6704_v58 }
 0x25c   : > { %v2291_v46 = vmul.f32 %v4147_v61, %v8050_v28  ;;  %v2292_v26 = vmul.f32 %v4147_v61, %v8051_v11  ;;  %v2293_v25 = vmul.f32 %v4147_v61, %v8052_v14  ;;  %2670 = vst [vmem:[#allocation2 + $0x328] sm:$0xff] %v2542_v37  ;;  %2672 = vst [vmem:[#allocation2 + $0x3b8] sm:$0xff] %v2544_v17  ;;  %v8053_v61 = vld [vmem:[#allocation130_spill] sm:$0xff]  ;;  %v8054_v38 = vld [vmem:[#allocation131_spill] sm:$0xff]  ;;  %4148 = vrsqrt.f32 %v2203_v18 }
 0x25d   : > { %v2546_v8 = vadd.f32 %v2418_v1, %v2290_v0  ;;  %2671 = vst [vmem:[#allocation2 + $0x260] sm:$0xff] %v2543_v29  ;;  %2673 = vst [vmem:[#allocation2 + $0x2b8] sm:$0xff] %v2545_v63  ;;  %v2025_v19 = vmul.f32 %v8053_v61, %v8053_v61  ;;  %v2169_v62 = vadd.f32 %v2168_v7, %v6696_v59  ;;  %v8055_v56 = vld [vmem:[#allocation132_spill] sm:$0xff]  ;;  %v8056_v41 = vld [vmem:[#allocation133_spill] sm:$0xff] }
 0x25e   : > { %v2547_v40 = vadd.f32 %v2419_v34, %v2291_v46  ;;  %v2548_v57 = vadd.f32 %v2420_v54, %v2292_v26  ;;  %v2549_v30 = vadd.f32 %v2421_v50, %v2293_v25  ;;  %v2026_v53 = vmul.f32 %v8054_v38, %v8054_v38  ;;  %v8057_v20 = vld [vmem:[#allocation134_spill] sm:$0xff]  ;;  %v2425_v60 = vld [vmem:[#allocation2 + $0x160] sm:$0xff]  ;;  %v8058_v11 = vld [vmem:[#allocation87_spill] sm:$0xff] }
 0x25f   : > { %2674 = vst [vmem:[#allocation2 + $0x248] sm:$0xff] %v2546_v8  ;;  %v2186_v52 = vadd.f32 %v2185_v5, %v6711_v3  ;;  %v2170_v32 = vadd.f32 %v2169_v62, %v6700_v21  ;;  %v2027_v12 = vmul.f32 %v8055_v56, %v8055_v56  ;;  %v2028_v27 = vmul.f32 %v8056_v41, %v8056_v41  ;;  %v2422_v33 = vld [vmem:[#allocation2 + $0x288] sm:$0xff]  ;;  %v8059_v14 = vld [vmem:[#allocation88_spill] sm:$0xff]  ;;  %v8060_v37 = vld [vmem:[#allocation89_spill] sm:$0xff] }
 0x260   : > { %2675 = vst [vmem:[#allocation2 + $0x40] sm:$0xff] %v2547_v40  ;;  %2676 = vst [vmem:[#allocation2 + $0x20] sm:$0xff] %v2548_v57  ;;  %v2029_v59 = vmul.f32 %v8057_v20, %v8057_v20  ;;  %v2423_v34 = vld [vmem:[#allocation2 + $0x3a8] sm:$0xff]  ;;  %v2427_v8 = vld [vmem:[#allocation2 + $0x210] sm:$0xff] }
 0x261   : > { %2677 = vst [vmem:[#allocation2 + $0xe8] sm:$0xff] %v2549_v30  ;;  %v2187_v44 = vadd.f32 %v2186_v52, %v2025_v19  ;;  %v2171_v58 = vrot.slane %v2170_v32, 4  ;;  %v2424_v50 = vld [vmem:[#allocation2 + $0x3c8] sm:$0xff]  ;;  %v2428_v40 = vld [vmem:[#allocation2 + $0x3d8] sm:$0xff]  ;;  %v8062_v30 = vld [vmem:[#allocation91_spill] sm:$0xff] }
 0x262   : > { %v2426_v0 = vld [vmem:[#allocation2 + $0x2c8] sm:$0xff]  ;;  %v8063_v7 = vld [vmem:[#allocation92_spill] sm:$0xff]  ;;  %v8064_v5 = vld [vmem:[#allocation93_spill] sm:$0xff] }
 0x263   : > { %v2188_v1 = vadd.f32 %v2187_v44, %v2026_v53  ;;  %v2172_v47 = vadd.f32 %v2171_v58, %v2170_v32  ;;  %v8061_v17 = vld [vmem:[#allocation90_spill] sm:$0xff]  ;;  %v2430_v58 = vld [vmem:[#allocation2 + $0x1b0] sm:$0xff] }
 0x264   : > { %v2429_v57 = vld [vmem:[#allocation2 + $0x1e8] sm:$0xff] }
 0x265   : > { %v2189_v51 = vadd.f32 %v2188_v1, %v2027_v12  ;;  %v2173_v13 = vrot.slane %v2172_v47, 2  ;;  %v8065_v62 = vld [vmem:[#allocation94_spill] sm:$0xff] }
 0x267   : > { %v2190_v24 = vadd.f32 %v2189_v51, %v2028_v27  ;;  %v2174_v3 = vadd.f32 %v2173_v13, %v2172_v47  ;;  %v2431_v27 = vld [vmem:[#allocation2 + $0x1c8] sm:$0xff]  ;;  %v2432_v13 = vld [vmem:[#allocation2 + $0x2d0] sm:$0xff] }
 0x269   : > { %v2191_v31 = vadd.f32 %v2190_v24, %v2029_v59  ;;  %v2175_v45 = vrot.slane %v2174_v3, 1  ;;  %v4149_v54 = vpop.eup %4148  ;;  %v2433_v24 = vld [vmem:[#allocation2 + $0x1d0] sm:$0xff] }
 0x26a   : > { %v2294_v26 = vmul.f32 %v4149_v54, %v8058_v11  ;;  %v2295_v25 = vmul.f32 %v4149_v54, %v8059_v14  ;;  %v2296_v29 = vmul.f32 %v4149_v54, %v8060_v37  ;;  %v2297_v63 = vmul.f32 %v4149_v54, %v8061_v17  ;;  %v2437_v14 = vld [vmem:[#allocation2 + $0x2e8] sm:$0xff] }
 0x26b   : > { %v2192_v21 = vrot.slane %v2191_v31, 4  ;;  %v6767_v28 = vadd.f32 %v2175_v45, %v2174_v3  ;;  %v2298_v42 = vmul.f32 %v4149_v54, %v8062_v30  ;;  %v2299_v19 = vmul.f32 %v4149_v54, %v8063_v7  ;;  %v2434_v3 = vld [vmem:[#allocation2 + $0x58] sm:$0xff] }
 0x26c   : > { %v2300_v18 = vmul.f32 %v4149_v54, %v8064_v5  ;;  %v2301_v53 = vmul.f32 %v4149_v54, %v8065_v62  ;;  %v2550_v52 = vadd.f32 %v2422_v33, %v2294_v26  ;;  %v2551_v32 = vadd.f32 %v2423_v34, %v2295_v25  ;;  %v8068_v34 = vld [vmem:[#allocation97_spill] sm:$0xff]  ;;  %v8070_v25 = vld [vmem:[#allocation99_spill] sm:$0xff] }
 0x26d   : > { %v6769_v46 = vadd.f32 %v2192_v21, %v2191_v31  ;;  %v2552_v12 = vadd.f32 %v2424_v50, %v2296_v29  ;;  %v2553_v44 = vadd.f32 %v2425_v60, %v2297_v63  ;;  %v2554_v1 = vadd.f32 %v2426_v0, %v2298_v42  ;;  %v8066_v31 = vld [vmem:[#allocation95_spill] sm:$0xff]  ;;  %v8067_v21 = vld [vmem:[#allocation96_spill] sm:$0xff]  ;;  %v8069_v60 = vld [vmem:[#allocation98_spill] sm:$0xff] }
 0x26e   : > { %v2555_v47 = vadd.f32 %v2427_v8, %v2299_v19  ;;  %v2556_v59 = vadd.f32 %v2428_v40, %v2300_v18  ;;  %v2557_v51 = vadd.f32 %v2429_v57, %v2301_v53  ;;  %2678 = vst [vmem:[#allocation2 + $0x288] sm:$0xff] %v2550_v52  ;;  %2679 = vst [vmem:[#allocation2 + $0x3a8] sm:$0xff] %v2551_v32  ;;  %v2435_v26 = vld [vmem:[#allocation2 + $0x120] sm:$0xff]  ;;  %v2436_v0 = vld [vmem:[#allocation2 + $0x198] sm:$0xff]  ;;  %v2204_v52 = vmax.f32 %v6767_v28, 1e-24 }
 0x26f   : > { %2680 = vst [vmem:[#allocation2 + $0x3c8] sm:$0xff] %v2552_v12  ;;  %2681 = vst [vmem:[#allocation2 + $0x160] sm:$0xff] %v2553_v44  ;;  %v2302_v45 = vmul.f32 %v4149_v54, %v8066_v31  ;;  %v2303_v33 = vmul.f32 %v4149_v54, %v8067_v21  ;;  %v2304_v50 = vmul.f32 %v4149_v54, %v8068_v34  ;;  %v8071_v29 = vld [vmem:[#allocation100_spill] sm:$0xff]  ;;  %v8072_v63 = vld [vmem:[#allocation101_spill] sm:$0xff]  ;;  %v2194_v32 = vrot.slane %v6769_v46, 2 }
 0x270   : > { %v2305_v11 = vmul.f32 %v4149_v54, %v8069_v60  ;;  %2682 = vst [vmem:[#allocation2 + $0x2c8] sm:$0xff] %v2554_v1  ;;  %2683 = vst [vmem:[#allocation2 + $0x210] sm:$0xff] %v2555_v47  ;;  %v2306_v37 = vmul.f32 %v4149_v54, %v8070_v25  ;;  %v2307_v17 = vmul.f32 %v4149_v54, %v8071_v29  ;;  %v8073_v40 = vld [vmem:[#allocation102_spill] sm:$0xff]  ;;  %4150 = vrsqrt.f32 %v2204_v52  ;;  %v2439_v1 = vld [vmem:[#allocation2 + $0x238] sm:$0xff] }
 0x271   : > { %2684 = vst [vmem:[#allocation2 + $0x3d8] sm:$0xff] %v2556_v59  ;;  %2685 = vst [vmem:[#allocation2 + $0x1e8] sm:$0xff] %v2557_v51  ;;  %v2308_v8 = vmul.f32 %v4149_v54, %v8072_v63  ;;  %v2309_v57 = vmul.f32 %v4149_v54, %v8073_v40  ;;  %v2558_v30 = vadd.f32 %v2430_v58, %v2302_v45  ;;  %v2440_v59 = vld [vmem:[#allocation2 + $0x398] sm:$0xff]  ;;  %v2441_v51 = vld [vmem:[#allocation2 + $0x390] sm:$0xff] }
 0x272   : > { %v2559_v42 = vadd.f32 %v2431_v27, %v2303_v33  ;;  %v2560_v7 = vadd.f32 %v2432_v13, %v2304_v50  ;;  %v2561_v19 = vadd.f32 %v2433_v24, %v2305_v11  ;;  %v2562_v5 = vadd.f32 %v2434_v3, %v2306_v37  ;;  %v2438_v27 = vld [vmem:[#allocation2 + $0x1f8] sm:$0xff]  ;;  %v2442_v13 = vld [vmem:[#allocation2 + $0x1a0] sm:$0xff]  ;;  %v8074_v28 = vld [vmem:[#allocation103_spill] sm:$0xff] }
 0x273   : > { %v2563_v18 = vadd.f32 %v2435_v26, %v2307_v17  ;;  %v2564_v62 = vadd.f32 %v2436_v0, %v2308_v8  ;;  %v2565_v53 = vadd.f32 %v2437_v14, %v2309_v57  ;;  %2686 = vst [vmem:[#allocation2 + $0x1b0] sm:$0xff] %v2558_v30  ;;  %v2195_v54 = vadd.f32 %v2194_v32, %v6769_v46  ;;  %v8075_v3 = vld [vmem:[#allocation104_spill] sm:$0xff]  ;;  %v8076_v45 = vld [vmem:[#allocation105_spill] sm:$0xff]  ;;  %v8077_v33 = vld [vmem:[#allocation106_spill] sm:$0xff] }
 0x274   : > { %2687 = vst [vmem:[#allocation2 + $0x1c8] sm:$0xff] %v2559_v42  ;;  %2688 = vst [vmem:[#allocation2 + $0x2d0] sm:$0xff] %v2560_v7  ;;  %v2443_v50 = vld [vmem:[#allocation2 + $0xa8] sm:$0xff]  ;;  %v2444_v46 = vld [vmem:[#allocation2 + $0x258] sm:$0xff] }
 0x275   : > { %2689 = vst [vmem:[#allocation2 + $0x1d0] sm:$0xff] %v2561_v19  ;;  %2690 = vst [vmem:[#allocation2 + $0x58] sm:$0xff] %v2562_v5  ;;  %v2196_v12 = vrot.slane %v2195_v54, 1  ;;  %v2445_v60 = vld [vmem:[#allocation2 + $0x2d8] sm:$0xff]  ;;  %v8078_v11 = vld [vmem:[#allocation107_spill] sm:$0xff] }
 0x276   : > { %2691 = vst [vmem:[#allocation2 + $0x120] sm:$0xff] %v2563_v18  ;;  %2692 = vst [vmem:[#allocation2 + $0x198] sm:$0xff] %v2564_v62  ;;  %v8079_v0 = vld [vmem:[#allocation108_spill] sm:$0xff]  ;;  %v8080_v25 = vld [vmem:[#allocation109_spill] sm:$0xff] }
 0x277   : > { %2693 = vst [vmem:[#allocation2 + $0x2e8] sm:$0xff] %v2565_v53  ;;  %v2197_v44 = vadd.f32 %v2196_v12, %v2195_v54  ;;  %v8081_v29 = vld [vmem:[#allocation110_spill] sm:$0xff]  ;;  %v2446_v30 = vld [vmem:[#allocation2 + $0xf0] sm:$0xff]  ;;  %v2447_v42 = vld [vmem:[#allocation2 + $0x180] sm:$0xff] }
 0x278   : > { %v2448_v62 = vld [vmem:[#allocation2 + $0x170] sm:$0xff] }
 0x279   : > { %v2205_v58 = vmax.f32 %v2197_v44, 1e-24  ;;  %v2449_v53 = vld [vmem:[#allocation2 + $0x3d0] sm:$0xff] }
 0x27a   : > { %v2450_v52 = vld [vmem:[#allocation2 + $0x250] sm:$0xff] }
 0x27b   : > { %4152 = vrsqrt.f32 %v2205_v58  ;;  %v2451_v58 = vld [vmem:[#allocation2 + $0x378] sm:$0xff] }
 0x27d   : > { %v4151_v47 = vpop.eup %4150 }
 0x27e   : > { %v2310_v24 = vmul.f32 %v4151_v47, %v8074_v28  ;;  %v2311_v31 = vmul.f32 %v4151_v47, %v8075_v3  ;;  %v2312_v21 = vmul.f32 %v4151_v47, %v8076_v45  ;;  %v2313_v34 = vmul.f32 %v4151_v47, %v8077_v33  ;;  %v2455_v3 = vld [vmem:[#allocation2 + $0x308] sm:$0xff] }
 0x27f   : > { %v2314_v26 = vmul.f32 %v4151_v47, %v8078_v11  ;;  %v2315_v14 = vmul.f32 %v4151_v47, %v8079_v0  ;;  %v2316_v37 = vmul.f32 %v4151_v47, %v8080_v25  ;;  %v2317_v17 = vmul.f32 %v4151_v47, %v8081_v29  ;;  %v2459_v0 = vld [vmem:[#allocation2 + $0x360] sm:$0xff]  ;;  %v2461_v25 = vld [vmem:[#allocation2 + $0x348] sm:$0xff] }
 0x280   : > { %v2566_v63 = vadd.f32 %v2438_v27, %v2310_v24  ;;  %v2567_v8 = vadd.f32 %v2439_v1, %v2311_v31  ;;  %v2568_v40 = vadd.f32 %v2440_v59, %v2312_v21  ;;  %v2569_v57 = vadd.f32 %v2441_v51, %v2313_v34  ;;  %v2452_v27 = vld [vmem:[#allocation2 + $0xb8] sm:$0xff] }
 0x281   : > { %v2570_v7 = vadd.f32 %v2442_v13, %v2314_v26  ;;  %v2571_v19 = vadd.f32 %v2443_v50, %v2315_v14  ;;  %v2572_v5 = vadd.f32 %v2444_v46, %v2316_v37  ;;  %v2573_v18 = vadd.f32 %v2445_v60, %v2317_v17  ;;  %v2453_v1 = vld [vmem:[#allocation2 + $0x38] sm:$0xff]  ;;  %v2456_v50 = vld [vmem:[#allocation2 + $0x370] sm:$0xff]  ;;  %v2457_v46 = vld [vmem:[#allocation2 + $0xc8] sm:$0xff] }
 0x282   : > { %2694 = vst [vmem:[#allocation2 + $0x1f8] sm:$0xff] %v2566_v63  ;;  %2695 = vst [vmem:[#allocation2 + $0x238] sm:$0xff] %v2567_v8  ;;  %v2318_v32 = vmul.f32 %v4151_v47, %v8010_v4  ;;  %v2319_v54 = vmul.f32 %v4151_v47, %v8013_v10  ;;  %v2320_v12 = vmul.f32 %v4151_v47, %v8015_v49  ;;  %v8084_v60 = vld [vmem:[#allocation121_spill] sm:$0xff]  ;;  %v2460_v14 = vld [vmem:[#allocation2 + $0x228] sm:$0xff] }
 0x283   : > { %2696 = vst [vmem:[#allocation2 + $0x398] sm:$0xff] %v2568_v40  ;;  %2697 = vst [vmem:[#allocation2 + $0x390] sm:$0xff] %v2569_v57  ;;  %v2321_v44 = vmul.f32 %v4151_v47, %v8017_v43  ;;  %v2322_v59 = vmul.f32 %v4151_v47, %v8019_v36  ;;  %v2323_v51 = vmul.f32 %v4151_v47, %v8021_v15  ;;  %v2454_v43 = vld [vmem:[#allocation2 + $0x78] sm:$0xff]  ;;  %v8082_v15 = vld [vmem:[#allocation119_spill] sm:$0xff] }
 0x284   : > { %2698 = vst [vmem:[#allocation2 + $0x1a0] sm:$0xff] %v2570_v7  ;;  %2699 = vst [vmem:[#allocation2 + $0xa8] sm:$0xff] %v2571_v19  ;;  %v2324_v13 = vmul.f32 %v4151_v47, %v8022_v2  ;;  %v2325_v4 = vmul.f32 %v4151_v47, %v8023_v9  ;;  %v2574_v10 = vadd.f32 %v2446_v30, %v2318_v32  ;;  %v2458_v36 = vld [vmem:[#allocation2 + $0x278] sm:$0xff]  ;;  %v2467_v32 = vld [vmem:[#allocation2 + $0x270] sm:$0xff] }
 0x285   : > { %2700 = vst [vmem:[#allocation2 + $0x258] sm:$0xff] %v2572_v5  ;;  %2701 = vst [vmem:[#allocation2 + $0x2d8] sm:$0xff] %v2573_v18  ;;  %v2575_v28 = vadd.f32 %v2447_v42, %v2319_v54  ;;  %v2576_v49 = vadd.f32 %v2448_v62, %v2320_v12  ;;  %v2577_v24 = vadd.f32 %v2449_v53, %v2321_v44  ;;  %v8083_v9 = vld [vmem:[#allocation120_spill] sm:$0xff]  ;;  %v2464_v62 = vld [vmem:[#allocation2 + $0x68] sm:$0xff] }
 0x286   : > { %v2578_v45 = vadd.f32 %v2450_v52, %v2322_v59  ;;  %v2579_v21 = vadd.f32 %v2451_v58, %v2323_v51  ;;  %v2580_v33 = vadd.f32 %v2452_v27, %v2324_v13  ;;  %v2581_v34 = vadd.f32 %v2453_v1, %v2325_v4  ;;  %2702 = vst [vmem:[#allocation2 + $0xf0] sm:$0xff] %v2574_v10  ;;  %v2463_v42 = vld [vmem:[#allocation2 + $0xf8] sm:$0xff]  ;;  %v2465_v53 = vld [vmem:[#allocation2] sm:$0xff]  ;;  %v2468_v54 = vld [vmem:[#allocation2 + $0x310] sm:$0xff] }
 0x287   : > { %2703 = vst [vmem:[#allocation2 + $0x180] sm:$0xff] %v2575_v28  ;;  %2704 = vst [vmem:[#allocation2 + $0x170] sm:$0xff] %v2576_v49  ;;  %v2466_v52 = vld [vmem:[#allocation2 + $0x298] sm:$0xff]  ;;  %v2469_v12 = vld [vmem:[#allocation2 + $0x190] sm:$0xff] }
 0x288   : > { %v4153_v31 = vpop.eup %4152  ;;  %2705 = vst [vmem:[#allocation2 + $0x3d0] sm:$0xff] %v2577_v24  ;;  %2706 = vst [vmem:[#allocation2 + $0x250] sm:$0xff] %v2578_v45 }
 0x289   : > { %v2326_v2 = vmul.f32 %v4153_v31, %v8082_v15  ;;  %v2327_v47 = vmul.f32 %v4153_v31, %v8083_v9  ;;  %v2328_v11 = vmul.f32 %v4153_v31, %v8084_v60  ;;  %v2329_v26 = vmul.f32 %v4153_v31, %v8011_v23  ;;  %2707 = vst [vmem:[#allocation2 + $0x378] sm:$0xff] %v2579_v21  ;;  %v2462_v23 = vld [vmem:[#allocation2 + $0x148] sm:$0xff] }
 0x28a   : > { %2708 = vst [vmem:[#allocation2 + $0xb8] sm:$0xff] %v2580_v33  ;;  %2709 = vst [vmem:[#allocation2 + $0x38] sm:$0xff] %v2581_v34  ;;  %v2330_v37 = vmul.f32 %v4153_v31, %v8012_v22  ;;  %v2331_v29 = vmul.f32 %v4153_v31, %v8014_v48  ;;  %v2332_v17 = vmul.f32 %v4153_v31, %v8016_v16 }
 0x28b   : > { %v2333_v63 = vmul.f32 %v4153_v31, %v8018_v35  ;;  %v2582_v8 = vadd.f32 %v2454_v43, %v2326_v2  ;;  %v2583_v40 = vadd.f32 %v2455_v3, %v2327_v47  ;;  %v2584_v57 = vadd.f32 %v2456_v50, %v2328_v11 }
 0x28c   : > { %v2585_v30 = vadd.f32 %v2457_v46, %v2329_v26  ;;  %v2586_v7 = vadd.f32 %v2458_v36, %v2330_v37  ;;  %v2587_v19 = vadd.f32 %v2459_v0, %v2331_v29  ;;  %v2588_v5 = vadd.f32 %v2460_v14, %v2332_v17 }
 0x28d   : > { %v2589_v18 = vadd.f32 %v2461_v25, %v2333_v63  ;;  %2710 = vst [vmem:[#allocation2 + $0x78] sm:$0xff] %v2582_v8  ;;  %2711 = vst [vmem:[#allocation2 + $0x308] sm:$0xff] %v2583_v40  ;;  %v2334_v22 = vmul.f32 %v4153_v31, %v8020_v6  ;;  %v2335_v48 = vmul.f32 %v4153_v31, %v8024_v39 }
 0x28e   : > { %2712 = vst [vmem:[#allocation2 + $0x370] sm:$0xff] %v2584_v57  ;;  %2713 = vst [vmem:[#allocation2 + $0xc8] sm:$0xff] %v2585_v30  ;;  %v2336_v16 = vmul.f32 %v4153_v31, %v8025_v55  ;;  %v2337_v35 = vmul.f32 %v4153_v31, %v8053_v61  ;;  %v2338_v44 = vmul.f32 %v4153_v31, %v8054_v38 }
 0x28f   : > { %2714 = vst [vmem:[#allocation2 + $0x278] sm:$0xff] %v2586_v7  ;;  %2715 = vst [vmem:[#allocation2 + $0x360] sm:$0xff] %v2587_v19  ;;  %v2339_v58 = vmul.f32 %v4153_v31, %v8055_v56  ;;  %v2340_v27 = vmul.f32 %v4153_v31, %v8056_v41  ;;  %v2341_v6 = vmul.f32 %v4153_v31, %v8057_v20 }
 0x290   : > { %2716 = vst [vmem:[#allocation2 + $0x228] sm:$0xff] %v2588_v5  ;;  %2717 = vst [vmem:[#allocation2 + $0x348] sm:$0xff] %v2589_v18  ;;  %v2590_v39 = vadd.f32 %v2462_v23, %v2334_v22  ;;  %v2591_v1 = vadd.f32 %v2463_v42, %v2335_v48  ;;  %v2592_v55 = vadd.f32 %v2464_v62, %v2336_v16 }
 0x291   : > { %v2593_v59 = vadd.f32 %v2465_v53, %v2337_v35  ;;  %v2594_v61 = vadd.f32 %v2466_v52, %v2338_v44  ;;  %v2595_v51 = vadd.f32 %v2467_v32, %v2339_v58  ;;  %v2596_v13 = vadd.f32 %v2468_v54, %v2340_v27 }
 0x292   : > { %v2597_v4 = vadd.f32 %v2469_v12, %v2341_v6  ;;  %2718 = vst [vmem:[#allocation2 + $0x148] sm:$0xff] %v2590_v39  ;;  %2719 = vst [vmem:[#allocation2 + $0xf8] sm:$0xff] %v2591_v1 }
 0x293   : > { %2720 = vst [vmem:[#allocation2 + $0x68] sm:$0xff] %v2592_v55  ;;  %2721 = vst [vmem:[#allocation2] sm:$0xff] %v2593_v59 }
 0x294   : > { %2722 = vst [vmem:[#allocation2 + $0x298] sm:$0xff] %v2594_v61  ;;  %2723 = vst [vmem:[#allocation2 + $0x270] sm:$0xff] %v2595_v51 }
 0x295   : > { %2724 = vst [vmem:[#allocation2 + $0x310] sm:$0xff] %v2596_v13  ;;  %2725 = vst [vmem:[#allocation2 + $0x190] sm:$0xff] %v2597_v4 }
 0x296 PF: > { %2728 = sbr.rel (%p4025_p4) target bundleno = 1064 (0x428), region = 78 }
 0x29b   : > { %v2731_v38 = vld [vmem:[#allocation2 + $0xd8] sm:$0xff]  ;;  %v2729_v56 = vld [vmem:[#allocation2 + $0x2b0] sm:$0xff]  ;;  %v2734_v10 = vld [vmem:[#allocation2 + $0x368] sm:$0xff]  ;;  %vm3252_vm1 = vcmask 130112   ;;  %vm3259_vm2 = vcmask 195712   ;;  %vm3266_vm3 = vcmask 261312  }
 0x29c   : > { %2861 = vadd.xlane.f32.xlu1 %v2731_v38  ;;  %2857 = vadd.xlane.f32.xlu0 %v2729_v56  ;;  %v2732_v41 = vld [vmem:[#allocation2 + $0x18] sm:$0xff]  ;;  %v2730_v20 = vld [vmem:[#allocation2 + $0x3b0] sm:$0xff]  ;;  %v2736_v49 = vld [vmem:[#allocation2 + $0x48] sm:$0xff]  ;;  %vm3273_vm4 = vcmask 326912   ;;  %vm3280_vm5 = vcmask 392512   ;;  %vm3287_vm6 = vcmask 458112  }
 0x29d   : > { %v2733_v28 = vld [vmem:[#allocation2 + $0x50] sm:$0xff]  ;;  %v2737_v3 = vld [vmem:[#allocation2 + $0x380] sm:$0xff]  ;;  %v2740_v31 = vld [vmem:[#allocation2 + $0x98] sm:$0xff]  ;;  %vm3294_vm7 = vcmask 523712   ;;  %vm3301_vm8 = vcmask 589312   ;;  %vm3308_vm9 = vcmask 654912  }
 0x29e   : > { %v2735_v24 = vld [vmem:[#allocation2 + $0x330] sm:$0xff]  ;;  %v2739_v45 = vld [vmem:[#allocation2 + $0x118] sm:$0xff]  ;;  %v2741_v33 = vld [vmem:[#allocation2 + $0x320] sm:$0xff]  ;;  %vm3315_vm10 = vcmask 720512   ;;  %vm3322_vm11 = vcmask 786112   ;;  %vm3329_vm12 = vcmask 851712  }
 0x29f   : > { %v2738_v43 = vld [vmem:[#allocation2 + $0x110] sm:$0xff]  ;;  %v2744_v34 = vld [vmem:[#allocation2 + $0x60] sm:$0xff]  ;;  %v2743_v50 = vld [vmem:[#allocation2 + $0x108] sm:$0xff]  ;;  %vm3336_vm13 = vcmask 917312   ;;  %vm3343_vm14 = vcmask 982912   ;;  %vm3350_vm15 = vcmask 1048512  }
 0x2a0   : > { %2863 = vadd.xlane.f32.xlu1 %v2732_v41  ;;  %2859 = vadd.xlane.f32.xlu0 %v2730_v20  ;;  %v2742_v21 = vld [vmem:[#allocation2 + $0x150] sm:$0xff]  ;;  %v2746_v46 = vld [vmem:[#allocation2 + $0x388] sm:$0xff]  ;;  %v2745_v36 = vld [vmem:[#allocation2 + $0x2e0] sm:$0xff]  ;;  %v3241_v41 = vlaneseq  ;;  %vm3905_vm0 = vcmask 1041409  }
 0x2a1   : > { %v2748_v15 = vld [vmem:[#allocation2 + $0x340] sm:$0xff]  ;;  %v2747_v2 = vld [vmem:[#allocation2 + $0x338] sm:$0xff]  ;;  %v2750_v9 = vld [vmem:[#allocation2 + $0x1a8] sm:$0xff] }
 0x2a2   : > { %v2749_v47 = vld [vmem:[#allocation2 + $0x80] sm:$0xff]  ;;  %v2752_v60 = vld [vmem:[#allocation2 + $0x168] sm:$0xff]  ;;  %v2751_v11 = vld [vmem:[#allocation2 + $0x1b8] sm:$0xff] }
 0x2a3   : > { %v2754_v26 = vld [vmem:[#allocation2 + $0x2f8] sm:$0xff]  ;;  %v2753_v0 = vld [vmem:[#allocation2 + $0x3e8] sm:$0xff]  ;;  %v2755_v25 = vld [vmem:[#allocation2 + $0x290] sm:$0xff] }
 0x2a4   : > { %2867 = vadd.xlane.f32.xlu1 %v2734_v10  ;;  %2865 = vadd.xlane.f32.xlu0 %v2733_v28  ;;  %v2756_v14 = vld [vmem:[#allocation2 + $0x28] sm:$0xff]  ;;  %v2758_v37 = vld [vmem:[#allocation2 + $0xc0] sm:$0xff]  ;;  %v2757_v29 = vld [vmem:[#allocation2 + $0x138] sm:$0xff]  ;;  %v6824_v28 = vand.u32 127, %v3241_v41 }
 0x2a5   : > { %v2760_v17 = vld [vmem:[#allocation2 + $0x280] sm:$0xff]  ;;  %v2763_v30 = vld [vmem:[#allocation2 + $0x158] sm:$0xff]  ;;  %v2768_v7 = vld [vmem:[#allocation2 + $0x128] sm:$0xff] }
 0x2a6   : > { %v2759_v63 = vld [vmem:[#allocation2 + $0x1c0] sm:$0xff]  ;;  %v2766_v23 = vld [vmem:[#allocation2 + $0x3f8] sm:$0xff]  ;;  %v2767_v19 = vld [vmem:[#allocation2 + $0x8] sm:$0xff] }
 0x2a7   : > { %v2762_v8 = vld [vmem:[#allocation2 + $0x3c0] sm:$0xff]  ;;  %v2765_v42 = vld [vmem:[#allocation2 + $0x218] sm:$0xff]  ;;  %v2770_v5 = vld [vmem:[#allocation2 + $0x3f0] sm:$0xff] }
 0x2a8   : > { %2871 = vadd.xlane.f32.xlu1 %v2736_v49  ;;  %2869 = vadd.xlane.f32.xlu0 %v2735_v24  ;;  %v2761_v40 = vld [vmem:[#allocation2 + $0x100] sm:$0xff]  ;;  %v2773_v22 = vld [vmem:[#allocation2 + $0xb0] sm:$0xff]  ;;  %v2781_v58 = vld [vmem:[#allocation2 + $0x208] sm:$0xff] }
 0x2a9   : > { %v2764_v57 = vld [vmem:[#allocation2 + $0x3e0] sm:$0xff]  ;;  %v2776_v48 = vld [vmem:[#allocation2 + $0x10] sm:$0xff]  ;;  %v2783_v6 = vld [vmem:[#allocation2 + $0x88] sm:$0xff] }
 0x2aa   : > { %v2769_v18 = vld [vmem:[#allocation2 + $0x2a0] sm:$0xff]  ;;  %v2775_v16 = vld [vmem:[#allocation2 + $0x1f0] sm:$0xff]  ;;  %v2786_v39 = vld [vmem:[#allocation2 + $0x268] sm:$0xff] }
 0x2ab   : > { %v2772_v62 = vld [vmem:[#allocation2 + $0x2c0] sm:$0xff]  ;;  %v2777_v32 = vld [vmem:[#allocation2 + $0x230] sm:$0xff]  ;;  %v2785_v1 = vld [vmem:[#allocation2 + $0x358] sm:$0xff] }
 0x2ac   : > { %2875 = vadd.xlane.f32.xlu1 %v2738_v43  ;;  %2873 = vadd.xlane.f32.xlu0 %v2737_v3  ;;  %v2771_v53 = vld [vmem:[#allocation2 + $0xa0] sm:$0xff]  ;;  %v2779_v12 = vld [vmem:[#allocation2 + $0x90] sm:$0xff]  ;;  %v2788_v55 = vld [vmem:[#allocation2 + $0x188] sm:$0xff]  ;;  %v6826_v43 = vshrl.u32 %v3241_v41, 7  ;;  %v3261_v3 = vadd.s32 4294967272, %v6824_v28  ;;  %v3324_v41 = vadd.s32 4294967200, %v6824_v28 }
 0x2ad   : > { %v2774_v52 = vld [vmem:[#allocation2 + $0x1e0] sm:$0xff]  ;;  %v2782_v44 = vld [vmem:[#allocation2 + $0xd0] sm:$0xff]  ;;  %v2789_v51 = vld [vmem:[#allocation2 + $0x1d8] sm:$0xff] }
 0x2ae   : > { %v2778_v35 = vld [vmem:[#allocation2 + $0x240] sm:$0xff]  ;;  %v2784_v27 = vld [vmem:[#allocation2 + $0x2f0] sm:$0xff]  ;;  %v2792_v13 = vld [vmem:[#allocation2 + $0x2a8] sm:$0xff] }
 0x2af   : > { %v2780_v54 = vld [vmem:[#allocation2 + $0x3a0] sm:$0xff]  ;;  %v2787_v59 = vld [vmem:[#allocation2 + $0x350] sm:$0xff]  ;;  %v2795_v10 = vld [vmem:[#allocation2 + $0x318] sm:$0xff] }
 0x2b0   : > { %2879 = vadd.xlane.f32.xlu1 %v2740_v31  ;;  %2877 = vadd.xlane.f32.xlu0 %v2739_v45  ;;  %v2790_v61 = vld [vmem:[#allocation2 + $0x30] sm:$0xff]  ;;  %v2791_v4 = vld [vmem:[#allocation2 + $0x140] sm:$0xff]  ;;  %v3247_v31 = vadd.s32 4294967288, %v6824_v28  ;;  %v3254_v45 = vadd.s32 4294967280, %v6824_v28 }
 0x2b1   : > { %v2794_v38 = vld [vmem:[#allocation2 + $0x200] sm:$0xff]  ;;  %v2793_v56 = vld [vmem:[#allocation2 + $0x130] sm:$0xff] }
 0x2b2   : > { %v2796_v20 = vld [vmem:[#allocation2 + $0x220] sm:$0xff]  ;;  %v2797_v24 = vld [vmem:[#allocation2 + $0x70] sm:$0xff] }
 0x2b3   : > { %v2798_v49 = vld [vmem:[#allocation2 + $0x300] sm:$0xff] }
 0x2b4   : > { %2883 = vadd.xlane.f32.xlu1 %v2742_v21  ;;  %2881 = vadd.xlane.f32.xlu0 %v2741_v33 }
 0x2b8   : > { %2887 = vadd.xlane.f32.xlu1 %v2744_v34  ;;  %2885 = vadd.xlane.f32.xlu0 %v2743_v50  ;;  %v2800_v34 = vld [vmem:[#allocation2 + $0x178] sm:$0xff]  ;;  %v2799_v50 = vld [vmem:[#allocation2 + $0xe0] sm:$0xff] }
 0x2bc   : > { %2891 = vadd.xlane.f32.xlu1 %v2746_v46  ;;  %2889 = vadd.xlane.f32.xlu0 %v2745_v36  ;;  %v3275_v46 = vadd.s32 4294967256, %v6824_v28  ;;  %v3268_v36 = vadd.s32 4294967264, %v6824_v28 }
 0x2c0   : > { %2895 = vadd.xlane.f32.xlu1 %v2748_v15  ;;  %2893 = vadd.xlane.f32.xlu0 %v2747_v2  ;;  %v6835_v15 = vsub.s32 %v6824_v28, %v6826_v43  ;;  %v6838_v2 = vsub.s32 %v3261_v3, %v6826_v43 }
 0x2c4   : > { %2899 = vadd.xlane.f32.xlu1 %v2750_v9  ;;  %2897 = vadd.xlane.f32.xlu0 %v2749_v47  ;;  %v6841_v9 = vsub.s32 %v3247_v31, %v6826_v43  ;;  %v6844_v47 = vsub.s32 %v3254_v45, %v6826_v43 }
 0x2c8   : > { %2903 = vadd.xlane.f32.xlu1 %v2752_v60  ;;  %2901 = vadd.xlane.f32.xlu0 %v2751_v11 }
 0x2cc   : > { %2907 = vadd.xlane.f32.xlu1 %v2754_v26  ;;  %2905 = vadd.xlane.f32.xlu0 %v2753_v0  ;;  %v2802_v26 = vld [vmem:[#allocation2 + $0x260] sm:$0xff]  ;;  %v2801_v0 = vld [vmem:[#allocation2 + $0x328] sm:$0xff] }
 0x2d0   : > { %2911 = vadd.xlane.f32.xlu1 %v2756_v14  ;;  %2909 = vadd.xlane.f32.xlu0 %v2755_v25  ;;  %v6847_v14 = vsub.s32 %v3275_v46, %v6826_v43  ;;  %v6850_v25 = vsub.s32 %v3268_v36, %v6826_v43  ;;  %v6901_v46 = vsub.s32 %v3324_v41, %v6826_v43  ;;  %v2843_v41 = vld [vmem:[#allocation2 + $0x370] sm:$0xff] }
 0x2d4   : > { %2915 = vadd.xlane.f32.xlu1 %v2758_v37  ;;  %2913 = vadd.xlane.f32.xlu0 %v2757_v29  ;;  %v3282_v37 = vadd.s32 4294967248, %v6824_v28 }
 0x2d8   : > { %2919 = vadd.xlane.f32.xlu1 %v2760_v17  ;;  %2917 = vadd.xlane.f32.xlu0 %v2759_v63 }
 0x2dc   : > { %2923 = vadd.xlane.f32.xlu1 %v2762_v8  ;;  %2921 = vadd.xlane.f32.xlu0 %v2761_v40  ;;  %v3289_v8 = vadd.s32 4294967240, %v6824_v28 }
 0x2e0   : > { %2927 = vadd.xlane.f32.xlu1 %v2764_v57  ;;  %2925 = vadd.xlane.f32.xlu0 %v2763_v30 }
 0x2e4   : > { %2931 = vadd.xlane.f32.xlu1 %v2766_v23  ;;  %2929 = vadd.xlane.f32.xlu0 %v2765_v42 }
 0x2e8   : > { %2935 = vadd.xlane.f32.xlu1 %v2768_v7  ;;  %2933 = vadd.xlane.f32.xlu0 %v2767_v19  ;;  %v2804_v7 = vld [vmem:[#allocation2 + $0x2b8] sm:$0xff] }
 0x2e9   : > { %v2803_v19 = vld [vmem:[#allocation2 + $0x3b8] sm:$0xff] }
 0x2ec   : > { %2939 = vadd.xlane.f32.xlu1 %v2770_v5  ;;  %2937 = vadd.xlane.f32.xlu0 %v2769_v18  ;;  %v6861_v5 = vsub.s32 %v3282_v37, %v6826_v43  ;;  %v3303_v18 = vadd.s32 4294967224, %v6824_v28 }
 0x2f0   : > { %2943 = vadd.xlane.f32.xlu1 %v2772_v62  ;;  %2941 = vadd.xlane.f32.xlu0 %v2771_v53  ;;  %v3296_v62 = vadd.s32 4294967232, %v6824_v28 }
 0x2f4   : > { %2947 = vadd.xlane.f32.xlu1 %v2774_v52  ;;  %2945 = vadd.xlane.f32.xlu0 %v2773_v22 }
 0x2f8   : > { %2951 = vadd.xlane.f32.xlu1 %v2776_v48  ;;  %2949 = vadd.xlane.f32.xlu0 %v2775_v16  ;;  %v6869_v48 = vsub.s32 %v3289_v8, %v6826_v43  ;;  %v2811_v8 = vld [vmem:[#allocation2 + $0x3c8] sm:$0xff] }
 0x2fc   : > { %2955 = vadd.xlane.f32.xlu1 %v2778_v35  ;;  %2953 = vadd.xlane.f32.xlu0 %v2777_v32 }
 0x300   : > { %2959 = vadd.xlane.f32.xlu1 %v2780_v54  ;;  %2957 = vadd.xlane.f32.xlu0 %v2779_v12  ;;  %v2806_v12 = vld [vmem:[#allocation2 + $0x40] sm:$0xff] }
 0x304   : > { %2963 = vadd.xlane.f32.xlu1 %v2782_v44  ;;  %2961 = vadd.xlane.f32.xlu0 %v2781_v58  ;;  %v2805_v44 = vld [vmem:[#allocation2 + $0x248] sm:$0xff]  ;;  %v6874_v58 = vsub.s32 %v3303_v18, %v6826_v43  ;;  %v2826_v18 = vld [vmem:[#allocation2 + $0x238] sm:$0xff] }
 0x308   : > { %2967 = vadd.xlane.f32.xlu1 %v2784_v27  ;;  %2965 = vadd.xlane.f32.xlu0 %v2783_v6  ;;  %v6877_v27 = vsub.s32 %v3296_v62, %v6826_v43  ;;  %v2825_v62 = vld [vmem:[#allocation2 + $0x1f8] sm:$0xff] }
 0x30c   : > { %2971 = vadd.xlane.f32.xlu1 %v2786_v39  ;;  %2969 = vadd.xlane.f32.xlu0 %v2785_v1  ;;  %v3317_v1 = vadd.s32 4294967208, %v6824_v28 }
 0x310   : > { %2975 = vadd.xlane.f32.xlu1 %v2788_v55  ;;  %2973 = vadd.xlane.f32.xlu0 %v2787_v59  ;;  %v3310_v55 = vadd.s32 4294967216, %v6824_v28 }
 0x314   : > { %2979 = vadd.xlane.f32.xlu1 %v2790_v61  ;;  %2977 = vadd.xlane.f32.xlu0 %v2789_v51 }
 0x318   : > { %2983 = vadd.xlane.f32.xlu1 %v2792_v13  ;;  %2981 = vadd.xlane.f32.xlu0 %v2791_v4  ;;  %v2808_v4 = vld [vmem:[#allocation2 + $0xe8] sm:$0xff] }
 0x31c   : > { %2987 = vadd.xlane.f32.xlu1 %v2794_v38  ;;  %2985 = vadd.xlane.f32.xlu0 %v2793_v56  ;;  %v2807_v38 = vld [vmem:[#allocation2 + $0x20] sm:$0xff]  ;;  %v3331_v56 = vadd.s32 4294967192, %v6824_v28 }
 0x320   : > { %2991 = vadd.xlane.f32.xlu1 %v2796_v20  ;;  %2989 = vadd.xlane.f32.xlu0 %v2795_v10 }
 0x324   : > { %2995 = vadd.xlane.f32.xlu1 %v2798_v49  ;;  %2993 = vadd.xlane.f32.xlu0 %v2797_v24  ;;  %v6890_v49 = vsub.s32 %v3317_v1, %v6826_v43  ;;  %v6893_v24 = vsub.s32 %v3310_v55, %v6826_v43  ;;  %v2813_v55 = vld [vmem:[#allocation2 + $0x2c8] sm:$0xff] }
 0x325   : > { %v2862_v21 = vpop.xlane.xlu1 %2861  ;;  %v2858_v33 = vpop.xlane.xlu0 %2857 }
 0x326   : > { %v3246_v29 = vrot.slane %v2858_v33, %v6835_v15  ;;  %v3258_v40 = vrot.slane %v2862_v21, %v6844_v47  ;;  %v2810_v33 = vld [vmem:[#allocation2 + $0x3a8] sm:$0xff] }
 0x328   : > { %2999 = vadd.xlane.f32.xlu1 %v2800_v34  ;;  %2997 = vadd.xlane.f32.xlu0 %v2799_v50  ;;  %v2809_v34 = vld [vmem:[#allocation2 + $0x288] sm:$0xff]  ;;  %v6898_v50 = vsub.s32 %v3331_v56, %v6826_v43 }
 0x329   : > { %v2864_v60 = vpop.xlane.xlu1 %2863  ;;  %v2860_v11 = vpop.xlane.xlu0 %2859 }
 0x32a   : > { %v3265_v17 = vrot.slane %v2864_v60, %v6838_v2  ;;  %v3251_v63 = vrot.slane %v2860_v11, %v6841_v9  ;;  %v3345_v11 = vadd.s32 4294967176, %v6824_v28 }
 0x32c   : > { %v3253_v57 = vsel %vm3252_vm1, %v3251_v63, %v3246_v29  ;;  %3003 = vadd.xlane.f32.xlu1 %v2802_v26  ;;  %3001 = vadd.xlane.f32.xlu0 %v2801_v0  ;;  %v3338_v26 = vadd.s32 4294967184, %v6824_v28  ;;  %v2812_v63 = vld [vmem:[#allocation2 + $0x160] sm:$0xff] }
 0x32d   : > { %v3260_v30 = vsel %vm3259_vm2, %v3258_v40, %v3253_v57  ;;  %v2868_v23 = vpop.xlane.xlu1 %2867  ;;  %v2866_v42 = vpop.xlane.xlu0 %2865 }
 0x32e   : > { %v3279_v53 = vrot.slane %v2868_v23, %v6847_v14  ;;  %v3267_v52 = vsel %vm3266_vm3, %v3265_v17, %v3260_v30  ;;  %v3272_v22 = vrot.slane %v2866_v42, %v6850_v25  ;;  %v6912_v30 = vsub.s32 %v3345_v11, %v6826_v43 }
 0x32f   : > { %v6915_v28 = vsub.s32 %v3338_v26, %v6826_v43 }
 0x330   : > { %v3274_v16 = vsel %vm3273_vm4, %v3272_v22, %v3267_v52  ;;  %3007 = vadd.xlane.f32.xlu1 %v2804_v7  ;;  %3005 = vadd.xlane.f32.xlu0 %v2803_v19 }
 0x331   : > { %v2872_v35 = vpop.xlane.xlu1 %2871  ;;  %v3281_v32 = vsel %vm3280_vm5, %v3279_v53, %v3274_v16  ;;  %v2870_v54 = vpop.xlane.xlu0 %2869 }
 0x332   : > { %v3293_v6 = vrot.slane %v2872_v35, %v6869_v48  ;;  %v3286_v39 = vrot.slane %v2870_v54, %v6861_v5  ;;  %v2827_v54 = vld [vmem:[#allocation2 + $0x398] sm:$0xff] }
 0x334   : > { %v3288_v59 = vsel %vm3287_vm6, %v3286_v39, %v3281_v32  ;;  %3011 = vadd.xlane.f32.xlu1 %v2806_v12  ;;  %3009 = vadd.xlane.f32.xlu0 %v2805_v44  ;;  %v2841_v32 = vld [vmem:[#allocation2 + $0x78] sm:$0xff] }
 0x335   : > { %v2876_v61 = vpop.xlane.xlu1 %2875  ;;  %v3295_v51 = vsel %vm3294_vm7, %v3293_v6, %v3288_v59  ;;  %v2874_v13 = vpop.xlane.xlu0 %2873  ;;  %v2842_v59 = vld [vmem:[#allocation2 + $0x308] sm:$0xff] }
 0x336   : > { %v3307_v20 = vrot.slane %v2876_v61, %v6874_v58  ;;  %v3300_v10 = vrot.slane %v2874_v13, %v6877_v27 }
 0x338   : > { %v3302_v3 = vsel %vm3301_vm8, %v3300_v10, %v3295_v51  ;;  %3015 = vadd.xlane.f32.xlu1 %v2808_v4  ;;  %3013 = vadd.xlane.f32.xlu0 %v2807_v38 }
 0x339   : > { %v2880_v31 = vpop.xlane.xlu1 %2879  ;;  %v3309_v45 = vsel %vm3308_vm9, %v3307_v20, %v3302_v3  ;;  %v2878_v21 = vpop.xlane.xlu0 %2877  ;;  %v2828_v20 = vld [vmem:[#allocation2 + $0x390] sm:$0xff] }
 0x33a   : > { %v3321_v36 = vrot.slane %v2880_v31, %v6890_v49  ;;  %v3314_v60 = vrot.slane %v2878_v21, %v6893_v24 }
 0x33c   : > { %v3316_v0 = vsel %vm3315_vm10, %v3314_v60, %v3309_v45  ;;  %3019 = vadd.xlane.f32.xlu1 %v2810_v33  ;;  %3017 = vadd.xlane.f32.xlu0 %v2809_v34  ;;  %v2829_v34 = vld [vmem:[#allocation2 + $0x1a0] sm:$0xff] }
 0x33d   : > { %v2884_v37 = vpop.xlane.xlu1 %2883  ;;  %v3323_v29 = vsel %vm3322_vm11, %v3321_v36, %v3316_v0  ;;  %v2882_v17 = vpop.xlane.xlu0 %2881  ;;  %v2814_v36 = vld [vmem:[#allocation2 + $0x210] sm:$0xff] }
 0x33e   : > { %v3335_v40 = vrot.slane %v2884_v37, %v6898_v50  ;;  %v3328_v57 = vrot.slane %v2882_v17, %v6901_v46  ;;  %v2815_v17 = vld [vmem:[#allocation2 + $0x3d8] sm:$0xff] }
 0x340   : > { %v3330_v23 = vsel %vm3329_vm12, %v3328_v57, %v3323_v29  ;;  %3023 = vadd.xlane.f32.xlu1 %v2812_v63  ;;  %3021 = vadd.xlane.f32.xlu0 %v2811_v8  ;;  %v2844_v63 = vld [vmem:[#allocation2 + $0xc8] sm:$0xff] }
 0x341   : > { %v2888_v42 = vpop.xlane.xlu1 %2887  ;;  %v3337_v7 = vsel %vm3336_vm13, %v3335_v40, %v3330_v23  ;;  %v2886_v19 = vpop.xlane.xlu0 %2885 }
 0x342   : > { %v3349_v53 = vrot.slane %v2888_v42, %v6912_v30  ;;  %v3342_v52 = vrot.slane %v2886_v19, %v6915_v28  ;;  %v2845_v19 = vld [vmem:[#allocation2 + $0x278] sm:$0xff] }
 0x344   : > { %v3344_v22 = vsel %vm3343_vm14, %v3342_v52, %v3337_v7  ;;  %3051 = vadd.xlane.f32.xlu1 %v2826_v18  ;;  %3049 = vadd.xlane.f32.xlu0 %v2825_v62  ;;  %v2830_v18 = vld [vmem:[#allocation2 + $0xa8] sm:$0xff] }
 0x345   : > { %v6923_v43 = vsel %vm3350_vm15, %v3349_v53, %v3344_v22  ;;  %v2892_v16 = vpop.xlane.xlu1 %2891  ;;  %v2890_v35 = vpop.xlane.xlu0 %2889 }
 0x346   : > { %v3359_v12 = vrot.slane %v2892_v16, %v6841_v9  ;;  %v3355_v44 = vrot.slane %v2890_v35, %v6835_v15 }
 0x348   : > { %v3360_v6 = vsel %vm3252_vm1, %v3359_v12, %v3355_v44  ;;  %3081 = vadd.xlane.f32.xlu1 %v2841_v32  ;;  %3053 = vadd.xlane.f32.xlu0 %v2827_v54  ;;  %v2831_v32 = vld [vmem:[#allocation2 + $0x258] sm:$0xff]  ;;  %v2816_v54 = vld [vmem:[#allocation2 + $0x1e8] sm:$0xff] }
 0x349   : > { %v2896_v39 = vpop.xlane.xlu1 %2895  ;;  %v2894_v1 = vpop.xlane.xlu0 %2893 }
 0x34a   : > { %v3369_v61 = vrot.slane %v2896_v39, %v6838_v2  ;;  %v3364_v51 = vrot.slane %v2894_v1, %v6844_v47 }
 0x34c   : > { %v3365_v13 = vsel %vm3259_vm2, %v3364_v51, %v3360_v6  ;;  %3025 = vadd.xlane.f32.xlu1 %v2813_v55  ;;  %3083 = vadd.xlane.f32.xlu0 %v2842_v59  ;;  %v2817_v59 = vld [vmem:[#allocation2 + $0x1b0] sm:$0xff] }
 0x34d   : > { %v2900_v4 = vpop.xlane.xlu1 %2899  ;;  %v3370_v38 = vsel %vm3266_vm3, %v3369_v61, %v3365_v13  ;;  %v2898_v56 = vpop.xlane.xlu0 %2897  ;;  %v2846_v61 = vld [vmem:[#allocation2 + $0x360] sm:$0xff] }
 0x34e   : > { %v3379_v10 = vrot.slane %v2900_v4, %v6847_v14  ;;  %v3374_v3 = vrot.slane %v2898_v56, %v6850_v25 }
 0x350   : > { %v3375_v31 = vsel %vm3273_vm4, %v3374_v3, %v3370_v38  ;;  %3085 = vadd.xlane.f32.xlu1 %v2843_v41  ;;  %3055 = vadd.xlane.f32.xlu0 %v2828_v20  ;;  %v2847_v20 = vld [vmem:[#allocation2 + $0x228] sm:$0xff] }
 0x351   : > { %v2904_v45 = vpop.xlane.xlu1 %2903  ;;  %v3380_v21 = vsel %vm3280_vm5, %v3379_v10, %v3375_v31  ;;  %v2902_v33 = vpop.xlane.xlu0 %2901  ;;  %v2832_v10 = vld [vmem:[#allocation2 + $0x2d8] sm:$0xff] }
 0x352   : > { %v3389_v60 = vrot.slane %v2904_v45, %v6869_v48  ;;  %v3384_v11 = vrot.slane %v2902_v33, %v6861_v5 }
 0x354   : > { %v3385_v26 = vsel %vm3287_vm6, %v3384_v11, %v3380_v21  ;;  %3057 = vadd.xlane.f32.xlu1 %v2829_v34  ;;  %3027 = vadd.xlane.f32.xlu0 %v2814_v36  ;;  %v2833_v36 = vld [vmem:[#allocation2 + $0xf0] sm:$0xff] }
 0x355   : > { %v2908_v0 = vpop.xlane.xlu1 %2907  ;;  %v3390_v37 = vsel %vm3294_vm7, %v3389_v60, %v3385_v26  ;;  %v2906_v29 = vpop.xlane.xlu0 %2905  ;;  %v2818_v60 = vld [vmem:[#allocation2 + $0x1c8] sm:$0xff] }
 0x356   : > { %v3399_v8 = vrot.slane %v2908_v0, %v6874_v58  ;;  %v3394_v40 = vrot.slane %v2906_v29, %v6877_v27 }
 0x358   : > { %v3395_v57 = vsel %vm3301_vm8, %v3394_v40, %v3390_v37  ;;  %3029 = vadd.xlane.f32.xlu1 %v2815_v17  ;;  %3087 = vadd.xlane.f32.xlu0 %v2844_v63  ;;  %v2819_v17 = vld [vmem:[#allocation2 + $0x2d0] sm:$0xff]  ;;  %v2848_v63 = vld [vmem:[#allocation2 + $0x348] sm:$0xff] }
 0x359   : > { %v2912_v23 = vpop.xlane.xlu1 %2911  ;;  %v3400_v42 = vsel %vm3308_vm9, %v3399_v8, %v3395_v57  ;;  %v2910_v7 = vpop.xlane.xlu0 %2909 }
 0x35a   : > { %v3409_v62 = vrot.slane %v2912_v23, %v6890_v49  ;;  %v3404_v53 = vrot.slane %v2910_v7, %v6893_v24 }
 0x35c   : > { %v3405_v52 = vsel %vm3315_vm10, %v3404_v53, %v3400_v42  ;;  %3089 = vadd.xlane.f32.xlu1 %v2845_v19  ;;  %3059 = vadd.xlane.f32.xlu0 %v2830_v18  ;;  %v2849_v19 = vld [vmem:[#allocation2 + $0x148] sm:$0xff]  ;;  %v2834_v18 = vld [vmem:[#allocation2 + $0x180] sm:$0xff] }
 0x35d   : > { %v2916_v22 = vpop.xlane.xlu1 %2915  ;;  %v3410_v16 = vsel %vm3322_vm11, %v3409_v62, %v3405_v52  ;;  %v2914_v35 = vpop.xlane.xlu0 %2913 }
 0x35e   : > { %v3419_v12 = vrot.slane %v2916_v22, %v6898_v50  ;;  %v3414_v44 = vrot.slane %v2914_v35, %v6901_v46 }
 0x360   : > { %v3415_v6 = vsel %vm3329_vm12, %v3414_v44, %v3410_v16  ;;  %3061 = vadd.xlane.f32.xlu1 %v2831_v32  ;;  %3031 = vadd.xlane.f32.xlu0 %v2816_v54  ;;  %v2835_v32 = vld [vmem:[#allocation2 + $0x170] sm:$0xff] }
 0x361   : > { %v2920_v39 = vpop.xlane.xlu1 %2919  ;;  %v3420_v1 = vsel %vm3336_vm13, %v3419_v12, %v3415_v6  ;;  %v2918_v55 = vpop.xlane.xlu0 %2917  ;;  %v2820_v54 = vld [vmem:[#allocation2 + $0x1d0] sm:$0xff] }
 0x362   : > { %v3429_v51 = vrot.slane %v2920_v39, %v6912_v30  ;;  %v3424_v13 = vrot.slane %v2918_v55, %v6915_v28 }
 0x364   : > { %v3425_v4 = vsel %vm3343_vm14, %v3424_v13, %v3420_v1  ;;  %3033 = vadd.xlane.f32.xlu1 %v2817_v59  ;;  %3091 = vadd.xlane.f32.xlu0 %v2846_v61  ;;  %v2821_v59 = vld [vmem:[#allocation2 + $0x58] sm:$0xff] }
 0x365   : > { %v3430_v38 = vsel %vm3350_vm15, %v3429_v51, %v3425_v4  ;;  %v2924_v56 = vpop.xlane.xlu1 %2923  ;;  %v2922_v41 = vpop.xlane.xlu0 %2921  ;;  %v2850_v61 = vld [vmem:[#allocation2 + $0xf8] sm:$0xff] }
 0x366   : > { %v6957_v3 = vsel %vm3905_vm0, %v3430_v38, %v6923_v43  ;;  %v3438_v31 = vrot.slane %v2924_v56, %v6841_v9  ;;  %v3434_v45 = vrot.slane %v2922_v41, %v6835_v15  ;;  %vm3907_vm0 = vcmask 1042434  }
 0x368   : > { %v3439_v21 = vsel %vm3252_vm1, %v3438_v31, %v3434_v45  ;;  %3093 = vadd.xlane.f32.xlu1 %v2847_v20  ;;  %3063 = vadd.xlane.f32.xlu0 %v2832_v10  ;;  %v2851_v20 = vld [vmem:[#allocation2 + $0x68] sm:$0xff]  ;;  %v2836_v10 = vld [vmem:[#allocation2 + $0x3d0] sm:$0xff] }
 0x369   : > { %v2928_v33 = vpop.xlane.xlu1 %2927  ;;  %v2926_v34 = vpop.xlane.xlu0 %2925 }
 0x36a   : > { %v3448_v11 = vrot.slane %v2928_v33, %v6838_v2  ;;  %v3443_v26 = vrot.slane %v2926_v34, %v6844_v47 }
 0x36c   : > { %v3444_v0 = vsel %vm3259_vm2, %v3443_v26, %v3439_v21  ;;  %3065 = vadd.xlane.f32.xlu1 %v2833_v36  ;;  %3035 = vadd.xlane.f32.xlu0 %v2818_v60  ;;  %v2837_v60 = vld [vmem:[#allocation2 + $0x250] sm:$0xff] }
 0x36d   : > { %v2932_v43 = vpop.xlane.xlu1 %2931  ;;  %v3449_v37 = vsel %vm3266_vm3, %v3448_v11, %v3444_v0  ;;  %v2930_v29 = vpop.xlane.xlu0 %2929  ;;  %v2822_v11 = vld [vmem:[#allocation2 + $0x120] sm:$0xff] }
 0x36e   : > { %v3458_v8 = vrot.slane %v2932_v43, %v6847_v14  ;;  %v3453_v40 = vrot.slane %v2930_v29, %v6850_v25 }
 0x370   : > { %v3454_v57 = vsel %vm3273_vm4, %v3453_v40, %v3449_v37  ;;  %3037 = vadd.xlane.f32.xlu1 %v2819_v17  ;;  %3095 = vadd.xlane.f32.xlu0 %v2848_v63  ;;  %v2823_v63 = vld [vmem:[#allocation2 + $0x198] sm:$0xff] }
 0x371   : > { %v2936_v23 = vpop.xlane.xlu1 %2935  ;;  %v3459_v42 = vsel %vm3280_vm5, %v3458_v8, %v3454_v57  ;;  %v2934_v7 = vpop.xlane.xlu0 %2933  ;;  %v2852_v8 = vld [vmem:[#allocation2] sm:$0xff] }
 0x372   : > { %v3468_v62 = vrot.slane %v2936_v23, %v6869_v48  ;;  %v3463_v53 = vrot.slane %v2934_v7, %v6861_v5 }
 0x374   : > { %v3464_v52 = vsel %vm3287_vm6, %v3463_v53, %v3459_v42  ;;  %3097 = vadd.xlane.f32.xlu1 %v2849_v19  ;;  %3067 = vadd.xlane.f32.xlu0 %v2834_v18  ;;  %v2853_v18 = vld [vmem:[#allocation2 + $0x298] sm:$0xff] }
 0x375   : > { %v2940_v22 = vpop.xlane.xlu1 %2939  ;;  %v3469_v16 = vsel %vm3294_vm7, %v3468_v62, %v3464_v52  ;;  %v2938_v35 = vpop.xlane.xlu0 %2937  ;;  %v2838_v62 = vld [vmem:[#allocation2 + $0x378] sm:$0xff] }
 0x376   : > { %v3478_v12 = vrot.slane %v2940_v22, %v6874_v58  ;;  %v3473_v44 = vrot.slane %v2938_v35, %v6877_v27 }
 0x378   : > { %v3474_v6 = vsel %vm3301_vm8, %v3473_v44, %v3469_v16  ;;  %3069 = vadd.xlane.f32.xlu1 %v2835_v32  ;;  %3039 = vadd.xlane.f32.xlu0 %v2820_v54  ;;  %v2839_v32 = vld [vmem:[#allocation2 + $0xb8] sm:$0xff]  ;;  %v2824_v54 = vld [vmem:[#allocation2 + $0x2e8] sm:$0xff] }
 0x379   : > { %v2944_v39 = vpop.xlane.xlu1 %2943  ;;  %v3479_v1 = vsel %vm3308_vm9, %v3478_v12, %v3474_v6  ;;  %v2942_v55 = vpop.xlane.xlu0 %2941 }
 0x37a   : > { %v3488_v51 = vrot.slane %v2944_v39, %v6890_v49  ;;  %v3483_v13 = vrot.slane %v2942_v55, %v6893_v24 }
 0x37c   : > { %v3484_v4 = vsel %vm3315_vm10, %v3483_v13, %v3479_v1  ;;  %3041 = vadd.xlane.f32.xlu1 %v2821_v59  ;;  %3099 = vadd.xlane.f32.xlu0 %v2850_v61  ;;  %v2840_v59 = vld [vmem:[#allocation2 + $0x38] sm:$0xff]  ;;  %v2854_v61 = vld [vmem:[#allocation2 + $0x270] sm:$0xff] }
 0x37d   : > { %v2948_v38 = vpop.xlane.xlu1 %2947  ;;  %v3489_v56 = vsel %vm3322_vm11, %v3488_v51, %v3484_v4  ;;  %v2946_v41 = vpop.xlane.xlu0 %2945 }
 0x37e   : > { %v3498_v31 = vrot.slane %v2948_v38, %v6898_v50  ;;  %v3493_v45 = vrot.slane %v2946_v41, %v6901_v46 }
 0x380   : > { %v3494_v21 = vsel %vm3329_vm12, %v3493_v45, %v3489_v56  ;;  %3101 = vadd.xlane.f32.xlu1 %v2851_v20  ;;  %3071 = vadd.xlane.f32.xlu0 %v2836_v10  ;;  %v2855_v20 = vld [vmem:[#allocation2 + $0x310] sm:$0xff] }
 0x381   : > { %v2952_v33 = vpop.xlane.xlu1 %2951  ;;  %v3499_v34 = vsel %vm3336_vm13, %v3498_v31, %v3494_v21  ;;  %v2950_v36 = vpop.xlane.xlu0 %2949  ;;  %v2856_v10 = vld [vmem:[#allocation2 + $0x190] sm:$0xff] }
 0x382   : > { %v3508_v26 = vrot.slane %v2952_v33, %v6912_v30  ;;  %v3503_v0 = vrot.slane %v2950_v36, %v6915_v28 }
 0x384   : > { %v3504_v43 = vsel %vm3343_vm14, %v3503_v0, %v3499_v34  ;;  %3073 = vadd.xlane.f32.xlu1 %v2837_v60  ;;  %3043 = vadd.xlane.f32.xlu0 %v2822_v11 }
 0x385   : > { %v3509_v37 = vsel %vm3350_vm15, %v3508_v26, %v3504_v43  ;;  %v2956_v29 = vpop.xlane.xlu1 %2955  ;;  %v2954_v17 = vpop.xlane.xlu0 %2953 }
 0x386   : > { %v6991_v40 = vsel %vm3907_vm0, %v3509_v37, %v6957_v3  ;;  %v3517_v57 = vrot.slane %v2956_v29, %v6841_v9  ;;  %v3513_v23 = vrot.slane %v2954_v17, %v6835_v15  ;;  %vm3909_vm0 = vcmask 1043459  }
 0x388   : > { %v3518_v42 = vsel %vm3252_vm1, %v3517_v57, %v3513_v23  ;;  %3045 = vadd.xlane.f32.xlu1 %v2823_v63  ;;  %3103 = vadd.xlane.f32.xlu0 %v2852_v8 }
 0x389   : > { %v2960_v7 = vpop.xlane.xlu1 %2959  ;;  %v2958_v19 = vpop.xlane.xlu0 %2957 }
 0x38a   : > { %v3527_v53 = vrot.slane %v2960_v7, %v6838_v2  ;;  %v3522_v52 = vrot.slane %v2958_v19, %v6844_v47 }
 0x38c   : > { %v3523_v22 = vsel %vm3259_vm2, %v3522_v52, %v3518_v42  ;;  %3105 = vadd.xlane.f32.xlu1 %v2853_v18  ;;  %3075 = vadd.xlane.f32.xlu0 %v2838_v62 }
 0x38d   : > { %v2964_v3 = vpop.xlane.xlu1 %2963  ;;  %v3528_v16 = vsel %vm3266_vm3, %v3527_v53, %v3523_v22  ;;  %v2962_v35 = vpop.xlane.xlu0 %2961 }
 0x38e   : > { %v3537_v12 = vrot.slane %v2964_v3, %v6847_v14  ;;  %v3532_v44 = vrot.slane %v2962_v35, %v6850_v25 }
 0x390   : > { %v3533_v6 = vsel %vm3273_vm4, %v3532_v44, %v3528_v16  ;;  %3077 = vadd.xlane.f32.xlu1 %v2839_v32  ;;  %3047 = vadd.xlane.f32.xlu0 %v2824_v54 }
 0x391   : > { %v2968_v39 = vpop.xlane.xlu1 %2967  ;;  %v3538_v1 = vsel %vm3280_vm5, %v3537_v12, %v3533_v6  ;;  %v2966_v55 = vpop.xlane.xlu0 %2965 }
 0x392   : > { %v3547_v51 = vrot.slane %v2968_v39, %v6869_v48  ;;  %v3542_v13 = vrot.slane %v2966_v55, %v6861_v5 }
 0x394   : > { %v3543_v4 = vsel %vm3287_vm6, %v3542_v13, %v3538_v1  ;;  %3079 = vadd.xlane.f32.xlu1 %v2840_v59  ;;  %3107 = vadd.xlane.f32.xlu0 %v2854_v61 }
 0x395   : > { %v2972_v38 = vpop.xlane.xlu1 %2971  ;;  %v3548_v56 = vsel %vm3294_vm7, %v3547_v51, %v3543_v4  ;;  %v2970_v41 = vpop.xlane.xlu0 %2969 }
 0x396   : > { %v3557_v31 = vrot.slane %v2972_v38, %v6874_v58  ;;  %v3552_v45 = vrot.slane %v2970_v41, %v6877_v27 }
 0x398   : > { %v3553_v21 = vsel %vm3301_vm8, %v3552_v45, %v3548_v56  ;;  %3109 = vadd.xlane.f32.xlu0 %v2855_v20  ;;  %3111 = vadd.xlane.f32.xlu1 %v2856_v10 }
 0x399   : > { %v2976_v33 = vpop.xlane.xlu1 %2975  ;;  %v3558_v34 = vsel %vm3308_vm9, %v3557_v31, %v3553_v21  ;;  %v2974_v36 = vpop.xlane.xlu0 %2973 }
 0x39a   : > { %v3567_v60 = vrot.slane %v2976_v33, %v6890_v49  ;;  %v3562_v11 = vrot.slane %v2974_v36, %v6893_v24 }
 0x39c   : > { %v3563_v26 = vsel %vm3315_vm10, %v3562_v11, %v3558_v34 }
 0x39d   : > { %v2980_v0 = vpop.xlane.xlu1 %2979  ;;  %v3568_v43 = vsel %vm3322_vm11, %v3567_v60, %v3563_v26  ;;  %v2978_v37 = vpop.xlane.xlu0 %2977 }
 0x39e   : > { %v3577_v29 = vrot.slane %v2980_v0, %v6898_v50  ;;  %v3572_v17 = vrot.slane %v2978_v37, %v6901_v46 }
 0x3a0   : > { %v3573_v63 = vsel %vm3329_vm12, %v3572_v17, %v3568_v43 }
 0x3a1   : > { %v2984_v8 = vpop.xlane.xlu1 %2983  ;;  %v3578_v57 = vsel %vm3336_vm13, %v3577_v29, %v3573_v63  ;;  %v2982_v23 = vpop.xlane.xlu0 %2981 }
 0x3a2   : > { %v3587_v42 = vrot.slane %v2984_v8, %v6912_v30  ;;  %v3582_v7 = vrot.slane %v2982_v23, %v6915_v28 }
 0x3a4   : > { %v3583_v19 = vsel %vm3343_vm14, %v3582_v7, %v3578_v57 }
 0x3a5   : > { %v3588_v18 = vsel %vm3350_vm15, %v3587_v42, %v3583_v19  ;;  %v2988_v62 = vpop.xlane.xlu1 %2987  ;;  %v2986_v53 = vpop.xlane.xlu0 %2985 }
 0x3a6   : > { %v3910_v52 = vsel %vm3909_vm0, %v3588_v18, %v6991_v40  ;;  %v3596_v22 = vrot.slane %v2988_v62, %v6841_v9  ;;  %v3592_v3 = vrot.slane %v2986_v53, %v6835_v15  ;;  %vm3911_vm0 = vcmask 1044484  }
 0x3a8   : > { %v3597_v16 = vsel %vm3252_vm1, %v3596_v22, %v3592_v3 }
 0x3a9   : > { %v2992_v35 = vpop.xlane.xlu1 %2991  ;;  %v2990_v32 = vpop.xlane.xlu0 %2989 }
 0x3aa   : > { %v3606_v54 = vrot.slane %v2992_v35, %v6838_v2  ;;  %v3601_v12 = vrot.slane %v2990_v32, %v6844_v47 }
 0x3ac   : > { %v3602_v44 = vsel %vm3259_vm2, %v3601_v12, %v3597_v16 }
 0x3ad   : > { %v2996_v6 = vpop.xlane.xlu1 %2995  ;;  %v3607_v39 = vsel %vm3266_vm3, %v3606_v54, %v3602_v44  ;;  %v2994_v1 = vpop.xlane.xlu0 %2993 }
 0x3ae   : > { %v3616_v40 = vrot.slane %v2996_v6, %v6847_v14  ;;  %v3611_v55 = vrot.slane %v2994_v1, %v6850_v25 }
 0x3b0   : > { %v3612_v59 = vsel %vm3273_vm4, %v3611_v55, %v3607_v39 }
 0x3b1   : > { %v3000_v61 = vpop.xlane.xlu1 %2999  ;;  %v3617_v51 = vsel %vm3280_vm5, %v3616_v40, %v3612_v59  ;;  %v2998_v13 = vpop.xlane.xlu0 %2997 }
 0x3b2   : > { %v3626_v4 = vrot.slane %v3000_v61, %v6869_v48  ;;  %v3621_v38 = vrot.slane %v2998_v13, %v6861_v5 }
 0x3b4   : > { %v3622_v56 = vsel %vm3287_vm6, %v3621_v38, %v3617_v51 }
 0x3b5   : > { %v3004_v41 = vpop.xlane.xlu1 %3003  ;;  %v3627_v20 = vsel %vm3294_vm7, %v3626_v4, %v3622_v56  ;;  %v3002_v10 = vpop.xlane.xlu0 %3001 }
 0x3b6   : > { %v3636_v31 = vrot.slane %v3004_v41, %v6874_v58  ;;  %v3631_v45 = vrot.slane %v3002_v10, %v6877_v27 }
 0x3b8   : > { %v3632_v21 = vsel %vm3301_vm8, %v3631_v45, %v3627_v20 }
 0x3b9   : > { %v3008_v33 = vpop.xlane.xlu1 %3007  ;;  %v3637_v34 = vsel %vm3308_vm9, %v3636_v31, %v3632_v21  ;;  %v3006_v36 = vpop.xlane.xlu0 %3005 }
 0x3ba   : > { %v3646_v60 = vrot.slane %v3008_v33, %v6890_v49  ;;  %v3641_v11 = vrot.slane %v3006_v36, %v6893_v24 }
 0x3bc   : > { %v3642_v26 = vsel %vm3315_vm10, %v3641_v11, %v3637_v34 }
 0x3bd   : > { %v3012_v0 = vpop.xlane.xlu1 %3011  ;;  %v3647_v43 = vsel %vm3322_vm11, %v3646_v60, %v3642_v26  ;;  %v3010_v37 = vpop.xlane.xlu0 %3009 }
 0x3be   : > { %v3656_v29 = vrot.slane %v3012_v0, %v6898_v50  ;;  %v3651_v17 = vrot.slane %v3010_v37, %v6901_v46 }
 0x3c0   : > { %v3652_v63 = vsel %vm3329_vm12, %v3651_v17, %v3647_v43 }
 0x3c1   : > { %v3016_v8 = vpop.xlane.xlu1 %3015  ;;  %v3657_v57 = vsel %vm3336_vm13, %v3656_v29, %v3652_v63  ;;  %v3014_v23 = vpop.xlane.xlu0 %3013 }
 0x3c2   : > { %v3666_v42 = vrot.slane %v3016_v8, %v6912_v30  ;;  %v3661_v7 = vrot.slane %v3014_v23, %v6915_v28 }
 0x3c4   : > { %v3662_v19 = vsel %vm3343_vm14, %v3661_v7, %v3657_v57 }
 0x3c5   : > { %v3667_v18 = vsel %vm3350_vm15, %v3666_v42, %v3662_v19  ;;  %v3020_v62 = vpop.xlane.xlu1 %3019  ;;  %v3018_v53 = vpop.xlane.xlu0 %3017 }
 0x3c6   : > { %v3675_v22 = vrot.slane %v3020_v62, %v6841_v9  ;;  %v3671_v3 = vrot.slane %v3018_v53, %v6835_v15  ;;  %v7058_v16 = vsel %vm3911_vm0, %v3667_v18, %v3910_v52 }
 0x3c8   : > { %v3676_v35 = vsel %vm3252_vm1, %v3675_v22, %v3671_v3 }
 0x3c9   : > { %v3024_v32 = vpop.xlane.xlu1 %3023  ;;  %v3022_v54 = vpop.xlane.xlu0 %3021 }
 0x3ca   : > { %v3685_v12 = vrot.slane %v3024_v32, %v6838_v2  ;;  %v3680_v44 = vrot.slane %v3022_v54, %v6844_v47 }
 0x3cc   : > { %v3681_v6 = vsel %vm3259_vm2, %v3680_v44, %v3676_v35 }
 0x3cd   : > { %v3052_v39 = vpop.xlane.xlu1 %3051  ;;  %v3050_v1 = vpop.xlane.xlu0 %3049  ;;  %v3686_v40 = vsel %vm3266_vm3, %v3685_v12, %v3681_v6 }
 0x3ce   : > { %v3754_v55 = vrot.slane %v3052_v39, %v6841_v9  ;;  %v3750_v59 = vrot.slane %v3050_v1, %v6835_v15 }
 0x3d0   : > { %v3755_v52 = vsel %vm3252_vm1, %v3754_v55, %v3750_v59 }
 0x3d1   : > { %v3082_v61 = vpop.xlane.xlu1 %3081  ;;  %v3054_v51 = vpop.xlane.xlu0 %3053 }
 0x3d2   : > { %v3759_v13 = vrot.slane %v3054_v51, %v6844_v47  ;;  %v3829_v35 = vrot.slane %v3082_v61, %v6835_v15 }
 0x3d4   : > { %v3760_v4 = vsel %vm3259_vm2, %v3759_v13, %v3755_v52 }
 0x3d5   : > { %v3026_v38 = vpop.xlane.xlu1 %3025  ;;  %v3084_v56 = vpop.xlane.xlu0 %3083 }
 0x3d6   : > { %v3833_v53 = vrot.slane %v3084_v56, %v6841_v9  ;;  %v3690_v22 = vrot.slane %v3026_v38, %v6850_v25 }
 0x3d8   : > { %v3834_v39 = vsel %vm3252_vm1, %v3833_v53, %v3829_v35  ;;  %v3691_v55 = vsel %vm3273_vm4, %v3690_v22, %v3686_v40  ;;  %vm3913_vm1 = vcmask 1045509  }
 0x3d9   : > { %v3086_v41 = vpop.xlane.xlu1 %3085  ;;  %v3056_v20 = vpop.xlane.xlu0 %3055 }
 0x3da   : > { %v3838_v3 = vrot.slane %v3086_v41, %v6844_v47  ;;  %v3764_v32 = vrot.slane %v3056_v20, %v6838_v2 }
 0x3dc   : > { %v3839_v47 = vsel %vm3259_vm2, %v3838_v3, %v3834_v39  ;;  %v3765_v52 = vsel %vm3266_vm3, %v3764_v32, %v3760_v4  ;;  %vm3915_vm2 = vcmask 1046534  }
 0x3dd   : > { %v3058_v10 = vpop.xlane.xlu1 %3057  ;;  %v3028_v31 = vpop.xlane.xlu0 %3027 }
 0x3de   : > { %v3769_v44 = vrot.slane %v3058_v10, %v6850_v25  ;;  %v3695_v6 = vrot.slane %v3028_v31, %v6847_v14 }
 0x3e0   : > { %v3696_v40 = vsel %vm3280_vm5, %v3695_v6, %v3691_v55 }
 0x3e1   : > { %v3030_v45 = vpop.xlane.xlu1 %3029  ;;  %v3088_v21 = vpop.xlane.xlu0 %3087 }
 0x3e2   : > { %v3700_v1 = vrot.slane %v3030_v45, %v6861_v5  ;;  %v3843_v9 = vrot.slane %v3088_v21, %v6838_v2  ;;  %v3770_v2 = vsel %vm3273_vm4, %v3769_v44, %v3765_v52 }
 0x3e4   : > { %v3701_v4 = vsel %vm3287_vm6, %v3700_v1, %v3696_v40 }
 0x3e5   : > { %v3090_v33 = vpop.xlane.xlu1 %3089  ;;  %v3060_v34 = vpop.xlane.xlu0 %3059 }
 0x3e6   : > { %v3774_v15 = vrot.slane %v3060_v34, %v6847_v14  ;;  %v3848_v61 = vrot.slane %v3090_v33, %v6850_v25  ;;  %v3844_v25 = vsel %vm3266_vm3, %v3843_v9, %v3839_v47  ;;  %vm3917_vm3 = vcmask 1047559  }
 0x3e8   : > { %v3775_v45 = vsel %vm3280_vm5, %v3774_v15, %v3770_v2  ;;  %v3849_v34 = vsel %vm3273_vm4, %v3848_v61, %v3844_v25 }
 0x3e9   : > { %v3062_v36 = vpop.xlane.xlu1 %3061  ;;  %v3032_v60 = vpop.xlane.xlu0 %3031 }
 0x3ea   : > { %v3705_v59 = vrot.slane %v3032_v60, %v6869_v48  ;;  %v3779_v51 = vrot.slane %v3062_v36, %v6861_v5 }
 0x3ec   : > { %v3706_v21 = vsel %vm3294_vm7, %v3705_v59, %v3701_v4  ;;  %v3780_v36 = vsel %vm3287_vm6, %v3779_v51, %v3775_v45 }
 0x3ed   : > { %v3034_v11 = vpop.xlane.xlu1 %3033  ;;  %v3092_v26 = vpop.xlane.xlu0 %3091 }
 0x3ee   : > { %v3710_v13 = vrot.slane %v3034_v11, %v6877_v27  ;;  %v3853_v41 = vrot.slane %v3092_v26, %v6847_v14 }
 0x3f0   : > { %v3711_v60 = vsel %vm3301_vm8, %v3710_v13, %v3706_v21 }
 0x3f1   : > { %v7070_v0 = vpop.xlane.xlu1 %3093  ;;  %v3064_v43 = vpop.xlane.xlu0 %3063 }
 0x3f2   : > { %v3784_v10 = vrot.slane %v3064_v43, %v6869_v48  ;;  %v3858_v35 = vrot.slane %v7070_v0, %v6861_v5 }
 0x3f5   : > { %v7072_v37 = vpop.xlane.xlu1 %3065  ;;  %v3036_v29 = vpop.xlane.xlu0 %3035 }
 0x3f6   : > { %v3715_v20 = vrot.slane %v3036_v29, %v6874_v58  ;;  %v3789_v33 = vrot.slane %v7072_v37, %v6877_v27  ;;  %v3854_v29 = vsel %vm3280_vm5, %v3853_v41, %v3849_v34 }
 0x3f9   : > { %v3038_v17 = vpop.xlane.xlu1 %3037  ;;  %v7074_v63 = vpop.xlane.xlu0 %3095 }
 0x3fa   : > { %v3720_v31 = vrot.slane %v3038_v17, %v6893_v24  ;;  %v3716_v17 = vsel %vm3308_vm9, %v3715_v20, %v3711_v60 }
 0x3fc   : > { %v3721_v22 = vsel %vm3315_vm10, %v3720_v31, %v3716_v17 }
 0x3fd   : > { %v7076_v8 = vpop.xlane.xlu1 %3097  ;;  %v7078_v57 = vpop.xlane.xlu0 %3067 }
 0x3fe   : > { %v3794_v53 = vrot.slane %v7078_v57, %v6874_v58  ;;  %v3868_v6 = vrot.slane %v7076_v8, %v6877_v27 }
 0x401   : > { %v7080_v23 = vpop.xlane.xlu1 %3069  ;;  %v3040_v42 = vpop.xlane.xlu0 %3039 }
 0x402   : > { %v3725_v14 = vrot.slane %v3040_v42, %v6890_v49  ;;  %v3785_v42 = vsel %vm3294_vm7, %v3784_v10, %v3780_v36  ;;  %v3799_v3 = vrot.slane %v7080_v23, %v6893_v24 }
 0x403   : > { %v3790_v32 = vsel %vm3301_vm8, %v3789_v33, %v3785_v42 }
 0x404   : > { %v3726_v44 = vsel %vm3322_vm11, %v3725_v14, %v3721_v22  ;;  %v3795_v0 = vsel %vm3308_vm9, %v3794_v53, %v3790_v32 }
 0x405   : > { %v3042_v7 = vpop.xlane.xlu1 %3041  ;;  %v7082_v19 = vpop.xlane.xlu0 %3099 }
 0x406   : > { %v3730_v11 = vrot.slane %v3042_v7, %v6901_v46  ;;  %v3873_v27 = vrot.slane %v7082_v19, %v6874_v58 }
 0x408   : > { %v3731_v23 = vsel %vm3329_vm12, %v3730_v11, %v3726_v44 }
 0x409   : > { %v7084_v18 = vpop.xlane.xlu1 %3101  ;;  %v7086_v62 = vpop.xlane.xlu0 %3071 }
 0x40a   : > { %v3804_v57 = vrot.slane %v7086_v62, %v6890_v49  ;;  %v3878_v47 = vrot.slane %v7084_v18, %v6893_v24 }
 0x40d   : > { %v7093_v54 = vpop.xlane.xlu1 %3073  ;;  %v3044_v12 = vpop.xlane.xlu0 %3043 }
 0x40e   : > { %v3735_v37 = vrot.slane %v3044_v12, %v6898_v50  ;;  %v3863_v12 = vrot.slane %v7074_v63, %v6869_v48  ;;  %v3809_v39 = vrot.slane %v7093_v54, %v6901_v46  ;;  %v3800_v48 = vsel %vm3315_vm10, %v3799_v3, %v3795_v0 }
 0x40f   : > { %v3859_v54 = vsel %vm3287_vm6, %v3858_v35, %v3854_v29  ;;  %v3805_v15 = vsel %vm3322_vm11, %v3804_v57, %v3800_v48 }
 0x410   : > { %v3736_v9 = vsel %vm3336_vm13, %v3735_v37, %v3731_v23  ;;  %v3864_v52 = vsel %vm3294_vm7, %v3863_v12, %v3859_v54  ;;  %v3810_v61 = vsel %vm3329_vm12, %v3809_v39, %v3805_v15 }
 0x411   : > { %v3046_v38 = vpop.xlane.xlu1 %3045  ;;  %v7108_v56 = vpop.xlane.xlu0 %3103 }
 0x412   : > { %v3740_v7 = vrot.slane %v3046_v38, %v6915_v28  ;;  %v3883_v58 = vrot.slane %v7108_v56, %v6890_v49  ;;  %v3869_v38 = vsel %vm3301_vm8, %v3868_v6, %v3864_v52 }
 0x413   : > { %v3874_v40 = vsel %vm3308_vm9, %v3873_v27, %v3869_v38 }
 0x414   : > { %v3741_v63 = vsel %vm3343_vm14, %v3740_v7, %v3736_v9  ;;  %v3879_v56 = vsel %vm3315_vm10, %v3878_v47, %v3874_v40 }
 0x415   : > { %v3106_v26 = vpop.xlane.xlu1 %3105  ;;  %v3076_v43 = vpop.xlane.xlu0 %3075  ;;  %v3884_v20 = vsel %vm3322_vm11, %v3883_v58, %v3879_v56 }
 0x416   : > { %v3814_v55 = vrot.slane %v3076_v43, %v6898_v50  ;;  %v3888_v24 = vrot.slane %v3106_v26, %v6901_v46 }
 0x418   : > { %v3815_v18 = vsel %vm3336_vm13, %v3814_v55, %v3810_v61  ;;  %v3889_v10 = vsel %vm3329_vm12, %v3888_v24, %v3884_v20 }
 0x419   : > { %v3078_v1 = vpop.xlane.xlu1 %3077  ;;  %v3048_v5 = vpop.xlane.xlu0 %3047 }
 0x41a   : > { %v3745_v62 = vrot.slane %v3048_v5, %v6912_v30  ;;  %v3819_v8 = vrot.slane %v3078_v1, %v6915_v28 }
 0x41c   : > { %v3746_v59 = vsel %vm3350_vm15, %v3745_v62, %v3741_v63  ;;  %v3820_v41 = vsel %vm3343_vm14, %v3819_v8, %v3815_v18 }
 0x41d   : > { %v3914_v19 = vsel %vm3913_vm1, %v3746_v59, %v7058_v16  ;;  %v3080_v51 = vpop.xlane.xlu1 %3079  ;;  %v3108_v13 = vpop.xlane.xlu0 %3107 }
 0x41e   : > { %v3824_v2 = vrot.slane %v3080_v51, %v6912_v30  ;;  %v3893_v49 = vrot.slane %v3108_v13, %v6898_v50 }
 0x420   : > { %v3825_v16 = vsel %vm3350_vm15, %v3824_v2, %v3820_v41  ;;  %v3894_v21 = vsel %vm3336_vm13, %v3893_v49, %v3889_v10 }
 0x421   : > { %v3916_v4 = vsel %vm3915_vm2, %v3825_v16, %v3914_v19  ;;  %v3110_v46 = vpop.xlane.xlu0 %3109  ;;  %v3112_v25 = vpop.xlane.xlu1 %3111 }
 0x422   : > { %v3898_v31 = vrot.slane %v3110_v46, %v6915_v28  ;;  %v3903_v45 = vrot.slane %v3112_v25, %v6912_v30 }
 0x424   : > { %v3899_v50 = vsel %vm3343_vm14, %v3898_v31, %v3894_v21 }
 0x425   : > { %v3904_v33 = vsel %vm3350_vm15, %v3903_v45, %v3899_v50 }
 0x426   : > { %v3918_v14 = vsel %vm3917_vm3, %v3904_v33, %v3916_v4 }
 0x427   : > { %3920 = vst [vmem:[%s674_s2] sm:$0xff] %v3918_v14 }
 0x428 PF: > { %s4030_s11 = sshll.u32 %s4250_s12, 7  ;;  %s3935_s16 = sshll.u32 %s674_s2, 4  ;;  %s3936_s16 = int_to_ptr.vmem [resolvable:$true] %s3935_s16 }
 0x429   : > { %s3933_s5 = scalar_lea.hbm %s7244_s1, %s4030_s11  ;;  %s3922_s17 = scalar_lea.sflag [#allocation5], %s672_s23 }
 0x42a   : > { %s4154_s21 = scalar_lea.vmem %s3936_s16, 128  ;;  %s4265_s20 = smov [#allocation4]  }
 0x42b   : > { %p4155_p6 = scmp.ne.s32.totalorder %s3936_s16, %s4154_s21  ;;  %s4158_s22 = sshll.u32 %s4265_s20, 4  ;;  %s4159_s22 = int_to_ptr.vmem [resolvable:$false] %s4158_s22 }
 0x42c   : > { %s4160_s25 = scalar_lea.vmem %s4159_s22, 256  ;;  %p4161_p10 = scmp.lt.s32.totalorder %s3936_s16, %s4159_s22 }
 0x42d   : > { %p4156_p8 = pnand %p4155_p6, %p4348_p7  ;;  %p4162_p11 = scmp.lt.s32.totalorder %s4160_s25, %s4154_s21 }
 0x42f   : > { %p4157_p9 = pneg %p4156_p8  ;;  %p4163_p13 = por %p4162_p11, %p4161_p10 }
 0x431   : > { %p4164_p0 = pnand %p4163_p13, %p4157_p9 }
 0x433   : > { %4167 = shalt.err (!%p4164_p0)
}
 0x434   : > { %s4168_s12 = scalar_lea.hbm %s3933_s5, 128  ;;  %s4172_s30 = scalar_lea.hbm %s7244_s1, 256 }
 0x435   : > { %p4169_p1 = scmp.ne.s32.totalorder %s3933_s5, %s4168_s12  ;;  %p4173_p4 = scmp.lt.s32.totalorder %s3933_s5, %s7244_s1 }
 0x436   : > { %p4174_p5 = scmp.lt.s32.totalorder %s4172_s30, %s4168_s12 }
 0x437   : > { %p4170_p2 = pnand %p4169_p1, %p4348_p7 }
 0x438   : > { %p4175_p6 = por %p4174_p5, %p4173_p4 }
 0x439   : > { %p4171_p3 = pneg %p4170_p2 }
 0x43b   : > { %p4176_p8 = pnand %p4175_p6, %p4171_p3 }
 0x43d   : > { %4179 = shalt.err (!%p4176_p8)
}
 0x43e   : > { %4034 = dma.vmem_to_hbm [thread:$0]  (%p4348_p7), %s3936_s16, 128, %s3933_s5, %s3922_s17  }
 0x43f PF: > { %p4040_p9 = scmp.ge.s32.totalorder %s4262_s15, 2  ;;  %s3947_s11 = sand.u32 1, %s4226_s6  }
 0x440   : > { %s3948_s3 = scalar_lea.sflag [#allocation5], %s3947_s11 }
 0x441   : > { %p4037_p10 = pnand %p4040_p9, %p4356_p12 }
 0x443   : > { %p4038_p11 = pneg %p4037_p10 }
 0x445   : > { %4221 = dma.done.wait (%p4038_p11), %s3948_s3, 128  }
 0x446   : > { %4223 = vsyncadd (%p4038_p11), %s3948_s3, 4294967168  ;;  %s14_s15 = sadd.s32 1, %s4262_s15   ;;  %s8085_s6 = smov %s4230_s7 }
 0x447   : > { %p11_p13 = scmp.ge.s32.totalorder %s14_s15, 8   ;;  %s8086_s7 = smov %s4234_s8 }
 0x448   : > { %s8087_s8 = smov %s4361_s28  ;;  %s8088_s9 = smov %s4242_s10 }
 0x449   : > { %s8089_s10 = smov %s4364_s29  ;;  %s8090_s11 = smov %s4254_s13 }
 0x44a   : > { %s8091_s12 = smov %s4258_s14  ;;  %s8092_s13 = smov %s8095_s18 }
 0x44b   : > { %s8093_s14 = smov %s8099_s19  ;;  %13 = sbr.rel (!%p11_p13) target bundleno = 6 (0x6), region = 118 }
 0x450   :  { %3953 = vsyncpa [#allocation5], 1 }
 0x451   :  { %3955 = vsyncpa [#allocation5 + $0x1], 1 }

</bundles_post_ra>
